<compile_context>
chip_gen: v7x
topology: tpu7x:2x2x1
jax: 0.10.0
libtpu: 0.0.40
codegen_flags: <defaults>
</compile_context>

<pallas_src>
import functools

import jax
import jax.numpy as jnp
from jax import lax
from jax.experimental import pallas as pl
from jax.experimental.pallas import tpu as pltpu


def _round_up(x, m):
    return (x + m - 1) // m * m


# ----------------------------------------------------------------------------
# Pallas kernels
# ----------------------------------------------------------------------------
def _matmul_bias_relu_kernel(x_ref, w_ref, b_ref, o_ref):
    # bf16 operands, f32 MXU accumulation; bias + ReLU in f32 (VPU), bf16 store.
    y = jnp.dot(x_ref[...], w_ref[...], preferred_element_type=jnp.float32)
    y = jnp.maximum(y + b_ref[...], 0.0)
    o_ref[...] = y.astype(o_ref.dtype)


def _head_kernel(f_ref, w6_ref, b6_ref, wh_ref, bh_ref, wo_ref, bo_ref, o_ref):
    # conv6 as a dense layer on the flattened (3,3,128) NHWC feature map.
    x6 = jnp.dot(f_ref[...], w6_ref[...], preferred_element_type=jnp.float32)
    x6 = jnp.maximum(x6 + b6_ref[...], 0.0)
    # v-hidden (cols 0:100 of a 128-lane half) and fc-hidden (cols 128:228) in one matmul.
    h = jnp.dot(x6.astype(jnp.bfloat16), wh_ref[...],
                preferred_element_type=jnp.float32)
    h = jnp.maximum(h + bh_ref[...], 0.0)
    # v (col 0), alpha (cols 1:4), beta (cols 4:7) packed into one lane-dense slab.
    o = jnp.dot(h.astype(jnp.bfloat16), wo_ref[...],
                preferred_element_type=jnp.float32)
    o = o + bo_ref[...]
    # softplus(x) + 1 on the alpha/beta columns only; v stays linear.
    sp = jnp.maximum(o, 0.0) + jnp.log(1.0 + jnp.exp(-jnp.abs(o))) + 1.0
    col = lax.broadcasted_iota(jnp.int32, o.shape, 1)
    o_ref[...] = jnp.where((col >= 1) & (col <= 6), sp, o)


# ----------------------------------------------------------------------------
# Conv layer: one fused im2col (XLA) + one fused matmul+bias+ReLU (Pallas)
# ----------------------------------------------------------------------------
def conv2d_relu(x_nhwc, w_p, b_p, k, s, cout):
    """x_nhwc: (N,H,W,C) bf16; w_p: (Kp,128) bf16; b_p: (1,128) f32."""
    N, H, W, C = x_nhwc.shape
    Ho = (H - k) // s + 1
    Wo = (W - k) // s + 1
    K = C * k * k
    Kp = w_p.shape[0]

    # Single fused patch-extraction op (replaces the old python stack of slices).
    p = lax.conv_general_dilated_patches(
        x_nhwc, (k, k), (s, s), "VALID",
        dimension_numbers=("NHWC", "HWIO", "NHWC"))        # (N, Ho, Wo, K) bf16

    M = Ho * Wo
    if M >= 512:
        # Batch-gridded call: >=2 evenly sized "parallel" steps (v7x megacore).
        Mp = _round_up(M, 16)
        p2 = jnp.pad(p.reshape(N, M, K), ((0, 0), (0, Mp - M), (0, Kp - K)))
        cost = pl.CostEstimate(
            flops=2 * N * Mp * Kp * 128,
            transcendentals=0,
            bytes_accessed=2 * (N * Mp * Kp + Kp * 128 + N * Mp * 128) + 4 * 128)
        y = pl.pallas_call(
            _matmul_bias_relu_kernel,
            out_shape=jax.ShapeDtypeStruct((N, Mp, 128), jnp.bfloat16),
            grid=(N,),
            in_specs=[
                pl.BlockSpec((None, Mp, Kp), lambda i: (i, 0, 0)),
                pl.BlockSpec((Kp, 128), lambda i: (0, 0)),
                pl.BlockSpec((1, 128), lambda i: (0, 0)),
            ],
            out_specs=pl.BlockSpec((None, Mp, 128), lambda i: (i, 0, 0)),
            compiler_params=pltpu.CompilerParams(
                dimension_semantics=("parallel",)),
            cost_estimate=cost,
        )(p2, w_p, b_p)
        y = y[:, :M, :cout]
    else:
        # Tiny layer: one full-array block, no grid.
        Mt = N * M
        Mp = _round_up(Mt, 16)
        p2 = jnp.pad(p.reshape(Mt, K), ((0, Mp - Mt), (0, Kp - K)))
        cost = pl.CostEstimate(
            flops=2 * Mp * Kp * 128,
            transcendentals=0,
            bytes_accessed=2 * (Mp * Kp + Kp * 128 + Mp * 128) + 4 * 128)
        y = pl.pallas_call(
            _matmul_bias_relu_kernel,
            out_shape=jax.ShapeDtypeStruct((Mp, 128), jnp.bfloat16),
            cost_estimate=cost,
        )(p2, w_p, b_p)
        y = y[:Mt, :cout]
    return y.reshape(N, Ho, Wo, cout)


# ----------------------------------------------------------------------------
# Parameter initialization (deterministic, mirrors the PyTorch init scheme)
# ----------------------------------------------------------------------------
def xavier_uniform_conv(key, cout, cin, k, gain):
    fan_in = cin * k * k
    fan_out = cout * k * k
    bound = gain * (6.0 / (fan_in + fan_out)) ** 0.5
    return jax.random.uniform(key, (cout, cin, k, k), jnp.float32, -bound, bound)


def linear_init(key, in_f, out_f):
    kw, kb = jax.random.split(key)
    bound = 1.0 / (in_f ** 0.5)
    w = jax.random.uniform(kw, (in_f, out_f), jnp.float32, -bound, bound)
    b = jax.random.uniform(kb, (out_f,), jnp.float32, -bound, bound)
    return w, b


def init_raw_params(key, img_stack):
    """PyTorch-equivalent parameters: conv OIHW + bias, linear (in,out) + bias."""
    gain_relu = 2.0 ** 0.5
    cfg = [(img_stack, 8, 4, 2), (8, 16, 3, 2), (16, 32, 3, 2),
           (32, 64, 3, 2), (64, 128, 3, 1), (128, 256, 3, 1)]
    keys = jax.random.split(key, len(cfg) + 5)
    convs = []
    for i, (cin, cout, k, s) in enumerate(cfg):
        w = xavier_uniform_conv(keys[i], cout, cin, k, gain_relu)
        b = jnp.full((cout,), 0.1, jnp.float32)
        convs.append((w, b, s))
    return {
        "convs": convs,
        "v1": linear_init(keys[-5], 256, 100),
        "v2": linear_init(keys[-4], 100, 1),
        "fc": linear_init(keys[-3], 256, 100),
        "alpha": linear_init(keys[-2], 100, 3),
        "beta": linear_init(keys[-1], 100, 3),
    }


def _patch_perm(cin, k):
    """Map conv_general_dilated_patches feature index -> canonical (cin,kh,kw)
    flat index.  Derived once (at init) with tiny integer probes whose values
    stay exactly representable even if the conv runs at bf16 precision."""
    dn = ("NHWC", "HWIO", "NHWC")
    chan = jnp.broadcast_to(jnp.arange(cin, dtype=jnp.float32), (1, k, k, cin))
    spat = jnp.broadcast_to(
        jnp.arange(k * k, dtype=jnp.float32).reshape(1, k, k, 1), (1, k, k, cin))
    pc = lax.conv_general_dilated_patches(chan, (k, k), (1, 1), "VALID",
                                          dimension_numbers=dn).reshape(-1)
    ps = lax.conv_general_dilated_patches(spat, (k, k), (1, 1), "VALID",
                                          dimension_numbers=dn).reshape(-1)
    perm = jnp.round(pc).astype(jnp.int32) * (k * k) + jnp.round(ps).astype(jnp.int32)
    assert bool(jnp.array_equal(jnp.sort(perm), jnp.arange(cin * k * k))), "patch perm"
    return perm


def prepare_params(raw):
    """One-time packing: MXU-aligned, bf16 weight matrices + fused head weights."""
    convs = []
    meta = []
    for (w, b, _s) in raw["convs"][:5]:
        cout, cin, k, _ = w.shape
        K = cin * k * k
        Kp = _round_up(K, 128)
        perm = _patch_perm(cin, k)
        w_canon = jnp.transpose(w.reshape(cout, K))            # (K, cout), rows=(cin,kh,kw)
        w_rows = w_canon[perm, :]                              # rows in patches feature order
        w_p = (jnp.zeros((Kp, 128), jnp.float32)
               .at[:K, :cout].set(w_rows)).astype(jnp.bfloat16)
        b_p = jnp.zeros((1, 128), jnp.float32).at[0, :cout].set(b)
        convs.append({"w": w_p, "b": b_p})
        meta.append((k, _s, cout))

    # conv6 + all five head linears fused into one kernel's weights.
    w6, b6, _ = raw["convs"][5]                                # (256, 128, 3, 3)
    c6out, c6in, k6, _ = w6.shape
    w6_mat = jnp.transpose(w6, (2, 3, 1, 0)).reshape(k6 * k6 * c6in, c6out)  # NHWC-flatten order
    v1w, v1b = raw["v1"]
    v2w, v2b = raw["v2"]
    fcw, fcb = raw["fc"]
    aw, ab = raw["alpha"]
    bw, bb = raw["beta"]
    wh = (jnp.zeros((256, 256), jnp.float32)
          .at[:, 0:100].set(v1w).at[:, 128:228].set(fcw))
    bh = (jnp.zeros((1, 256), jnp.float32)
          .at[0, 0:100].set(v1b).at[0, 128:228].set(fcb))
    wo = (jnp.zeros((256, 128), jnp.float32)
          .at[0:100, 0:1].set(v2w).at[128:228, 1:4].set(aw).at[128:228, 4:7].set(bw))
    bo = (jnp.zeros((1, 128), jnp.float32)
          .at[0, 0:1].set(v2b).at[0, 1:4].set(ab).at[0, 4:7].set(bb))
    head = {
        "w6": w6_mat.astype(jnp.bfloat16), "b6": b6.reshape(1, -1).astype(jnp.float32),
        "wh": wh.astype(jnp.bfloat16), "bh": bh,
        "wo": wo.astype(jnp.bfloat16), "bo": bo,
    }
    return {"convs": convs, "head": head}, tuple(meta)


# ----------------------------------------------------------------------------
# Forward pass (Pallas path)
# ----------------------------------------------------------------------------
def net_forward(params, x_nchw, *, meta):
    # layout: NCHW (PyTorch convention) in -> NHWC bf16 internally.
    x = jnp.transpose(x_nchw, (0, 2, 3, 1)).astype(jnp.bfloat16)
    for layer, (k, s, cout) in zip(params["convs"], meta):
        x = conv2d_relu(x, layer["w"], layer["b"], k, s, cout)

    # conv5 output is (N, 3, 3, 128); its NHWC flatten IS conv6's im2col row.
    N = x.shape[0]
    kin = x.shape[1] * x.shape[2] * x.shape[3]
    feat = x.reshape(N, kin)
    Mp = _round_up(N, 16)
    feat = jnp.pad(feat, ((0, Mp - N), (0, 0)))

    hp = params["head"]
    cost = pl.CostEstimate(
        flops=2 * Mp * (kin * 256 + 256 * 256 + 256 * 128),
        transcendentals=2 * Mp * 128,
        bytes_accessed=2 * (Mp * kin + kin * 256 + 256 * 256 + 256 * 128)
                       + 4 * (Mp * 128 + 640))
    out = pl.pallas_call(
        _head_kernel,
        out_shape=jax.ShapeDtypeStruct((Mp, 128), jnp.float32),
        cost_estimate=cost,
    )(feat, hp["w6"], hp["b6"], hp["wh"], hp["bh"], hp["wo"], hp["bo"])

    v = out[:N, 0:1]
    alpha = out[:N, 1:4]
    beta = out[:N, 4:7]
    return (alpha, beta), v


# ----------------------------------------------------------------------------
# Pure-XLA f32 reference (for the numerical self-check only)
# ----------------------------------------------------------------------------
def reference_forward(raw, x_nchw):
    h = x_nchw
    for (w, b, s) in raw["convs"]:
        h = lax.conv_general_dilated(h, w, (s, s), "VALID",
                                     dimension_numbers=("NCHW", "OIHW", "NCHW"))
        h = jax.nn.relu(h + b[None, :, None, None])
    feat = h.reshape(h.shape[0], 256)
    v1w, v1b = raw["v1"]
    v2w, v2b = raw["v2"]
    fcw, fcb = raw["fc"]
    aw, ab = raw["alpha"]
    bw, bb = raw["beta"]
    vh = jax.nn.relu(feat @ v1w + v1b)
    v = vh @ v2w + v2b
    fh = jax.nn.relu(feat @ fcw + fcb)
    alpha = jax.nn.softplus(fh @ aw + ab) + 1.0
    beta = jax.nn.softplus(fh @ bw + bb) + 1.0
    return (alpha, beta), v


if __name__ == "__main__":
    img_stack = 4
    batch = 2
    key = jax.random.PRNGKey(0)
    k_params, k_x = jax.random.split(key)

    raw = init_raw_params(k_params, img_stack)
    params, meta = prepare_params(raw)          # one-time weight packing / padding

    # 96x96 input is required so the conv stack reduces to 1x1x256 (view(-1,256)).
    x = jax.random.normal(k_x, (batch, img_stack, 96, 96), jnp.float32)

    fwd = jax.jit(functools.partial(net_forward, meta=meta))
    (alpha, beta), v = fwd(params, x)
    jax.block_until_ready((alpha, beta, v))

    assert alpha.shape == (batch, 3)
    assert beta.shape == (batch, 3)
    assert v.shape == (batch, 1)
    assert bool(jnp.all(alpha > 1.0)) and bool(jnp.all(beta > 1.0))

    # Numerical self-check against a plain-XLA f32 reference (loose tolerance:
    # the Pallas path uses bf16 MXU operands with f32 accumulation).
    (alpha_r, beta_r), v_r = reference_forward(raw, x)
    for got, ref in ((alpha, alpha_r), (beta, beta_r), (v, v_r)):
        err = float(jnp.max(jnp.abs(got - ref)))
        tol = 0.1 + 0.05 * float(jnp.max(jnp.abs(ref)))
        assert err < tol, f"mismatch vs reference: {err} >= {tol}"

    print("KERNEL_OK")
</pallas_src>

<mosaic_0001>
module attributes {stable_mosaic.version = 11 : i64} {
  func.func @_matmul_bias_relu_kernel(%arg0: i32, %arg1: memref<1x2224x128xbf16, #tpu.memory_space<vmem>>, %arg2: memref<128x128xbf16, #tpu.memory_space<vmem>>, %arg3: memref<1x128xf32, #tpu.memory_space<vmem>>, %arg4: memref<1x2224x128xbf16, #tpu.memory_space<vmem>>) attributes {dimension_semantics = [#tpu.dimension_semantics<parallel>], iteration_bounds = array<i64: 2>, scalar_prefetch = 0 : i64, scratch_operands = 0 : i64, tpu.core_type = #tpu.core_type<tc>, window_params = [{transform_indices = @transform_0, window_bounds = array<i64: 1, 2224, 128>}, {pipeline_mode = #tpu.pipeline_mode<synchronous>, transform_indices = @transform_1, window_bounds = array<i64: 128, 128>}, {pipeline_mode = #tpu.pipeline_mode<synchronous>, transform_indices = @transform_2, window_bounds = array<i64: 1, 128>}, {transform_indices = @transform_3, window_bounds = array<i64: 1, 2224, 128>}]} {
    %c0 = arith.constant 0 : index
    %c0_0 = arith.constant 0 : index
    %c0_1 = arith.constant 0 : index
    %0 = vector.load %arg1[%c0, %c0_0, %c0_1] : memref<1x2224x128xbf16, #tpu.memory_space<vmem>>, vector<1x2224x128xbf16>
    %1 = vector.shape_cast %0 : vector<1x2224x128xbf16> to vector<2224x128xbf16>
    %c0_2 = arith.constant 0 : index
    %c0_3 = arith.constant 0 : index
    %2 = vector.load %arg2[%c0_2, %c0_3] : memref<128x128xbf16, #tpu.memory_space<vmem>>, vector<128x128xbf16>
    %cst = arith.constant dense<0.000000e+00> : vector<2224x128xf32>
    %3 = tpu.matmul %1, %2, %cst {dimension_numbers = #tpu.dot_dimension_numbers<[1], [0], [0], [1], [0, 0, 1, 1], [], []>} : vector<2224x128xbf16>, vector<128x128xbf16>, vector<2224x128xf32> -> vector<2224x128xf32>
    %c0_4 = arith.constant 0 : index
    %c0_5 = arith.constant 0 : index
    %4 = vector.load %arg3[%c0_4, %c0_5] : memref<1x128xf32, #tpu.memory_space<vmem>>, vector<1x128xf32>
    %5 = vector.broadcast %4 : vector<1x128xf32> to vector<2224x128xf32>
    %6 = arith.addf %3, %5 : vector<2224x128xf32>
    %cst_6 = arith.constant 0.000000e+00 : f32
    %7 = vector.broadcast %cst_6 : f32 to vector<2224x128xf32>
    %8 = arith.maximumf %6, %7 : vector<2224x128xf32>
    %9 = arith.truncf %8 : vector<2224x128xf32> to vector<2224x128xbf16>
    %c0_7 = arith.constant 0 : index
    %c0_8 = arith.constant 0 : index
    %c0_9 = arith.constant 0 : index
    %10 = vector.load %arg4[%c0_7, %c0_8, %c0_9] : memref<1x2224x128xbf16, #tpu.memory_space<vmem>>, vector<1x2224x128xbf16>
    %11 = vector.shape_cast %10 : vector<1x2224x128xbf16> to vector<2224x128xbf16>
    %12 = vector.shape_cast %9 : vector<2224x128xbf16> to vector<1x2224x128xbf16>
    tpu.vector_store %arg4[%c0_7, %c0_8, %c0_9], %12 {strides = array<i32>} : memref<1x2224x128xbf16, #tpu.memory_space<vmem>>, vector<1x2224x128xbf16>,
    return
  }
  func.func @transform_0(%arg0: i32) -> (i32, i32, i32) {
    %c0_i32 = arith.constant 0 : i32
    %c0_i32_0 = arith.constant 0 : i32
    %c0_i32_1 = arith.constant 0 : i32
    return %arg0, %c0_i32, %c0_i32_0 : i32, i32, i32
  }
  func.func @transform_1(%arg0: i32) -> (i32, i32) {
    %c0_i32 = arith.constant 0 : i32
    %c0_i32_0 = arith.constant 0 : i32
    %c0_i32_1 = arith.constant 0 : i32
    return %c0_i32, %c0_i32_0 : i32, i32
  }
  func.func @transform_2(%arg0: i32) -> (i32, i32) {
    %c0_i32 = arith.constant 0 : i32
    %c0_i32_0 = arith.constant 0 : i32
    %c0_i32_1 = arith.constant 0 : i32
    return %c0_i32, %c0_i32_0 : i32, i32
  }
  func.func @transform_3(%arg0: i32) -> (i32, i32, i32) {
    %c0_i32 = arith.constant 0 : i32
    %c0_i32_0 = arith.constant 0 : i32
    %c0_i32_1 = arith.constant 0 : i32
    return %arg0, %c0_i32, %c0_i32_0 : i32, i32, i32
  }
}

module attributes {stable_mosaic.version = 11 : i64} {
  func.func @_matmul_bias_relu_kernel(%arg0: i32, %arg1: memref<1x544x128xbf16, #tpu.memory_space<vmem>>, %arg2: memref<128x128xbf16, #tpu.memory_space<vmem>>, %arg3: memref<1x128xf32, #tpu.memory_space<vmem>>, %arg4: memref<1x544x128xbf16, #tpu.memory_space<vmem>>) attributes {dimension_semantics = [#tpu.dimension_semantics<parallel>], iteration_bounds = array<i64: 2>, scalar_prefetch = 0 : i64, scratch_operands = 0 : i64, tpu.core_type = #tpu.core_type<tc>, window_params = [{transform_indices = @transform_0, window_bounds = array<i64: 1, 544, 128>}, {pipeline_mode = #tpu.pipeline_mode<synchronous>, transform_indices = @transform_1, window_bounds = array<i64: 128, 128>}, {pipeline_mode = #tpu.pipeline_mode<synchronous>, transform_indices = @transform_2, window_bounds = array<i64: 1, 128>}, {transform_indices = @transform_3, window_bounds = array<i64: 1, 544, 128>}]} {
    %c0 = arith.constant 0 : index
    %c0_0 = arith.constant 0 : index
    %c0_1 = arith.constant 0 : index
    %0 = vector.load %arg1[%c0, %c0_0, %c0_1] : memref<1x544x128xbf16, #tpu.memory_space<vmem>>, vector<1x544x128xbf16>
    %1 = vector.shape_cast %0 : vector<1x544x128xbf16> to vector<544x128xbf16>
    %c0_2 = arith.constant 0 : index
    %c0_3 = arith.constant 0 : index
    %2 = vector.load %arg2[%c0_2, %c0_3] : memref<128x128xbf16, #tpu.memory_space<vmem>>, vector<128x128xbf16>
    %cst = arith.constant dense<0.000000e+00> : vector<544x128xf32>
    %3 = tpu.matmul %1, %2, %cst {dimension_numbers = #tpu.dot_dimension_numbers<[1], [0], [0], [1], [0, 0, 1, 1], [], []>} : vector<544x128xbf16>, vector<128x128xbf16>, vector<544x128xf32> -> vector<544x128xf32>
    %c0_4 = arith.constant 0 : index
    %c0_5 = arith.constant 0 : index
    %4 = vector.load %arg3[%c0_4, %c0_5] : memref<1x128xf32, #tpu.memory_space<vmem>>, vector<1x128xf32>
    %5 = vector.broadcast %4 : vector<1x128xf32> to vector<544x128xf32>
    %6 = arith.addf %3, %5 : vector<544x128xf32>
    %cst_6 = arith.constant 0.000000e+00 : f32
    %7 = vector.broadcast %cst_6 : f32 to vector<544x128xf32>
    %8 = arith.maximumf %6, %7 : vector<544x128xf32>
    %9 = arith.truncf %8 : vector<544x128xf32> to vector<544x128xbf16>
    %c0_7 = arith.constant 0 : index
    %c0_8 = arith.constant 0 : index
    %c0_9 = arith.constant 0 : index
    %10 = vector.load %arg4[%c0_7, %c0_8, %c0_9] : memref<1x544x128xbf16, #tpu.memory_space<vmem>>, vector<1x544x128xbf16>
    %11 = vector.shape_cast %10 : vector<1x544x128xbf16> to vector<544x128xbf16>
    %12 = vector.shape_cast %9 : vector<544x128xbf16> to vector<1x544x128xbf16>
    tpu.vector_store %arg4[%c0_7, %c0_8, %c0_9], %12 {strides = array<i32>} : memref<1x544x128xbf16, #tpu.memory_space<vmem>>, vector<1x544x128xbf16>,
    return
  }
  func.func @transform_0(%arg0: i32) -> (i32, i32, i32) {
    %c0_i32 = arith.constant 0 : i32
    %c0_i32_0 = arith.constant 0 : i32
    %c0_i32_1 = arith.constant 0 : i32
    return %arg0, %c0_i32, %c0_i32_0 : i32, i32, i32
  }
  func.func @transform_1(%arg0: i32) -> (i32, i32) {
    %c0_i32 = arith.constant 0 : i32
    %c0_i32_0 = arith.constant 0 : i32
    %c0_i32_1 = arith.constant 0 : i32
    return %c0_i32, %c0_i32_0 : i32, i32
  }
  func.func @transform_2(%arg0: i32) -> (i32, i32) {
    %c0_i32 = arith.constant 0 : i32
    %c0_i32_0 = arith.constant 0 : i32
    %c0_i32_1 = arith.constant 0 : i32
    return %c0_i32, %c0_i32_0 : i32, i32
  }
  func.func @transform_3(%arg0: i32) -> (i32, i32, i32) {
    %c0_i32 = arith.constant 0 : i32
    %c0_i32_0 = arith.constant 0 : i32
    %c0_i32_1 = arith.constant 0 : i32
    return %arg0, %c0_i32, %c0_i32_0 : i32, i32, i32
  }
}

module attributes {stable_mosaic.version = 11 : i64} {
  func.func @_matmul_bias_relu_kernel(%arg0: memref<256x256xbf16, #tpu.memory_space<vmem>>, %arg1: memref<256x128xbf16, #tpu.memory_space<vmem>>, %arg2: memref<1x128xf32, #tpu.memory_space<vmem>>, %arg3: memref<256x128xbf16, #tpu.memory_space<vmem>>) attributes {dimension_semantics = [], scalar_prefetch = 0 : i64, scratch_operands = 0 : i64, tpu.core_type = #tpu.core_type<tc>} {
    %c0 = arith.constant 0 : index
    %c0_0 = arith.constant 0 : index
    %0 = vector.load %arg0[%c0, %c0_0] : memref<256x256xbf16, #tpu.memory_space<vmem>>, vector<256x256xbf16>
    %c0_1 = arith.constant 0 : index
    %c0_2 = arith.constant 0 : index
    %1 = vector.load %arg1[%c0_1, %c0_2] : memref<256x128xbf16, #tpu.memory_space<vmem>>, vector<256x128xbf16>
    %cst = arith.constant dense<0.000000e+00> : vector<256x128xf32>
    %2 = tpu.matmul %0, %1, %cst {dimension_numbers = #tpu.dot_dimension_numbers<[1], [0], [0], [1], [0, 0, 1, 1], [], []>} : vector<256x256xbf16>, vector<256x128xbf16>, vector<256x128xf32> -> vector<256x128xf32>
    %c0_3 = arith.constant 0 : index
    %c0_4 = arith.constant 0 : index
    %3 = vector.load %arg2[%c0_3, %c0_4] : memref<1x128xf32, #tpu.memory_space<vmem>>, vector<1x128xf32>
    %4 = vector.broadcast %3 : vector<1x128xf32> to vector<256x128xf32>
    %5 = arith.addf %2, %4 : vector<256x128xf32>
    %cst_5 = arith.constant 0.000000e+00 : f32
    %6 = vector.broadcast %cst_5 : f32 to vector<256x128xf32>
    %7 = arith.maximumf %5, %6 : vector<256x128xf32>
    %8 = arith.truncf %7 : vector<256x128xf32> to vector<256x128xbf16>
    %c0_6 = arith.constant 0 : index
    %c0_7 = arith.constant 0 : index
    %9 = vector.load %arg3[%c0_6, %c0_7] : memref<256x128xbf16, #tpu.memory_space<vmem>>, vector<256x128xbf16>
    tpu.vector_store %arg3[%c0_6, %c0_7], %8 {strides = array<i32>} : memref<256x128xbf16, #tpu.memory_space<vmem>>, vector<256x128xbf16>,
    return
  }
}

module attributes {stable_mosaic.version = 11 : i64} {
  func.func @_matmul_bias_relu_kernel(%arg0: memref<64x384xbf16, #tpu.memory_space<vmem>>, %arg1: memref<384x128xbf16, #tpu.memory_space<vmem>>, %arg2: memref<1x128xf32, #tpu.memory_space<vmem>>, %arg3: memref<64x128xbf16, #tpu.memory_space<vmem>>) attributes {dimension_semantics = [], scalar_prefetch = 0 : i64, scratch_operands = 0 : i64, tpu.core_type = #tpu.core_type<tc>} {
    %c0 = arith.constant 0 : index
    %c0_0 = arith.constant 0 : index
    %0 = vector.load %arg0[%c0, %c0_0] : memref<64x384xbf16, #tpu.memory_space<vmem>>, vector<64x384xbf16>
    %c0_1 = arith.constant 0 : index
    %c0_2 = arith.constant 0 : index
    %1 = vector.load %arg1[%c0_1, %c0_2] : memref<384x128xbf16, #tpu.memory_space<vmem>>, vector<384x128xbf16>
    %cst = arith.constant dense<0.000000e+00> : vector<64x128xf32>
    %2 = tpu.matmul %0, %1, %cst {dimension_numbers = #tpu.dot_dimension_numbers<[1], [0], [0], [1], [0, 0, 1, 1], [], []>} : vector<64x384xbf16>, vector<384x128xbf16>, vector<64x128xf32> -> vector<64x128xf32>
    %c0_3 = arith.constant 0 : index
    %c0_4 = arith.constant 0 : index
    %3 = vector.load %arg2[%c0_3, %c0_4] : memref<1x128xf32, #tpu.memory_space<vmem>>, vector<1x128xf32>
    %4 = vector.broadcast %3 : vector<1x128xf32> to vector<64x128xf32>
    %5 = arith.addf %2, %4 : vector<64x128xf32>
    %cst_5 = arith.constant 0.000000e+00 : f32
    %6 = vector.broadcast %cst_5 : f32 to vector<64x128xf32>
    %7 = arith.maximumf %5, %6 : vector<64x128xf32>
    %8 = arith.truncf %7 : vector<64x128xf32> to vector<64x128xbf16>
    %c0_6 = arith.constant 0 : index
    %c0_7 = arith.constant 0 : index
    %9 = vector.load %arg3[%c0_6, %c0_7] : memref<64x128xbf16, #tpu.memory_space<vmem>>, vector<64x128xbf16>
    tpu.vector_store %arg3[%c0_6, %c0_7], %8 {strides = array<i32>} : memref<64x128xbf16, #tpu.memory_space<vmem>>, vector<64x128xbf16>,
    return
  }
}

module attributes {stable_mosaic.version = 11 : i64} {
  func.func @_matmul_bias_relu_kernel(%arg0: memref<32x640xbf16, #tpu.memory_space<vmem>>, %arg1: memref<640x128xbf16, #tpu.memory_space<vmem>>, %arg2: memref<1x128xf32, #tpu.memory_space<vmem>>, %arg3: memref<32x128xbf16, #tpu.memory_space<vmem>>) attributes {dimension_semantics = [], scalar_prefetch = 0 : i64, scratch_operands = 0 : i64, tpu.core_type = #tpu.core_type<tc>} {
    %c0 = arith.constant 0 : index
    %c0_0 = arith.constant 0 : index
    %0 = vector.load %arg0[%c0, %c0_0] : memref<32x640xbf16, #tpu.memory_space<vmem>>, vector<32x640xbf16>
    %c0_1 = arith.constant 0 : index
    %c0_2 = arith.constant 0 : index
    %1 = vector.load %arg1[%c0_1, %c0_2] : memref<640x128xbf16, #tpu.memory_space<vmem>>, vector<640x128xbf16>
    %cst = arith.constant dense<0.000000e+00> : vector<32x128xf32>
    %2 = tpu.matmul %0, %1, %cst {dimension_numbers = #tpu.dot_dimension_numbers<[1], [0], [0], [1], [0, 0, 1, 1], [], []>} : vector<32x640xbf16>, vector<640x128xbf16>, vector<32x128xf32> -> vector<32x128xf32>
    %c0_3 = arith.constant 0 : index
    %c0_4 = arith.constant 0 : index
    %3 = vector.load %arg2[%c0_3, %c0_4] : memref<1x128xf32, #tpu.memory_space<vmem>>, vector<1x128xf32>
    %4 = vector.broadcast %3 : vector<1x128xf32> to vector<32x128xf32>
    %5 = arith.addf %2, %4 : vector<32x128xf32>
    %cst_5 = arith.constant 0.000000e+00 : f32
    %6 = vector.broadcast %cst_5 : f32 to vector<32x128xf32>
    %7 = arith.maximumf %5, %6 : vector<32x128xf32>
    %8 = arith.truncf %7 : vector<32x128xf32> to vector<32x128xbf16>
    %c0_6 = arith.constant 0 : index
    %c0_7 = arith.constant 0 : index
    %9 = vector.load %arg3[%c0_6, %c0_7] : memref<32x128xbf16, #tpu.memory_space<vmem>>, vector<32x128xbf16>
    tpu.vector_store %arg3[%c0_6, %c0_7], %8 {strides = array<i32>} : memref<32x128xbf16, #tpu.memory_space<vmem>>, vector<32x128xbf16>,
    return
  }
}

module attributes {stable_mosaic.version = 11 : i64} {
  func.func @_head_kernel(%arg0: memref<16x1152xbf16, #tpu.memory_space<vmem>>, %arg1: memref<1152x256xbf16, #tpu.memory_space<vmem>>, %arg2: memref<1x256xf32, #tpu.memory_space<vmem>>, %arg3: memref<256x256xbf16, #tpu.memory_space<vmem>>, %arg4: memref<1x256xf32, #tpu.memory_space<vmem>>, %arg5: memref<256x128xbf16, #tpu.memory_space<vmem>>, %arg6: memref<1x128xf32, #tpu.memory_space<vmem>>, %arg7: memref<16x128xf32, #tpu.memory_space<vmem>>) attributes {dimension_semantics = [], scalar_prefetch = 0 : i64, scratch_operands = 0 : i64, tpu.core_type = #tpu.core_type<tc>} {
    %c0 = arith.constant 0 : index
    %c0_0 = arith.constant 0 : index
    %0 = vector.load %arg0[%c0, %c0_0] : memref<16x1152xbf16, #tpu.memory_space<vmem>>, vector<16x1152xbf16>
    %c0_1 = arith.constant 0 : index
    %c0_2 = arith.constant 0 : index
    %1 = vector.load %arg1[%c0_1, %c0_2] : memref<1152x256xbf16, #tpu.memory_space<vmem>>, vector<1152x256xbf16>
    %cst = arith.constant dense<0.000000e+00> : vector<16x256xf32>
    %2 = tpu.matmul %0, %1, %cst {dimension_numbers = #tpu.dot_dimension_numbers<[1], [0], [0], [1], [0, 0, 1, 1], [], []>} : vector<16x1152xbf16>, vector<1152x256xbf16>, vector<16x256xf32> -> vector<16x256xf32>
    %c0_3 = arith.constant 0 : index
    %c0_4 = arith.constant 0 : index
    %3 = vector.load %arg2[%c0_3, %c0_4] : memref<1x256xf32, #tpu.memory_space<vmem>>, vector<1x256xf32>
    %4 = vector.broadcast %3 : vector<1x256xf32> to vector<16x256xf32>
    %5 = arith.addf %2, %4 : vector<16x256xf32>
    %cst_5 = arith.constant 0.000000e+00 : f32
    %6 = vector.broadcast %cst_5 : f32 to vector<16x256xf32>
    %7 = arith.maximumf %5, %6 : vector<16x256xf32>
    %8 = arith.truncf %7 : vector<16x256xf32> to vector<16x256xbf16>
    %c0_6 = arith.constant 0 : index
    %c0_7 = arith.constant 0 : index
    %9 = vector.load %arg3[%c0_6, %c0_7] : memref<256x256xbf16, #tpu.memory_space<vmem>>, vector<256x256xbf16>
    %cst_8 = arith.constant dense<0.000000e+00> : vector<16x256xf32>
    %10 = tpu.matmul %8, %9, %cst_8 {dimension_numbers = #tpu.dot_dimension_numbers<[1], [0], [0], [1], [0, 0, 1, 1], [], []>} : vector<16x256xbf16>, vector<256x256xbf16>, vector<16x256xf32> -> vector<16x256xf32>
    %c0_9 = arith.constant 0 : index
    %c0_10 = arith.constant 0 : index
    %11 = vector.load %arg4[%c0_9, %c0_10] : memref<1x256xf32, #tpu.memory_space<vmem>>, vector<1x256xf32>
    %12 = vector.broadcast %11 : vector<1x256xf32> to vector<16x256xf32>
    %13 = arith.addf %10, %12 : vector<16x256xf32>
    %cst_11 = arith.constant 0.000000e+00 : f32
    %14 = vector.broadcast %cst_11 : f32 to vector<16x256xf32>
    %15 = arith.maximumf %13, %14 : vector<16x256xf32>
    %16 = arith.truncf %15 : vector<16x256xf32> to vector<16x256xbf16>
    %c0_12 = arith.constant 0 : index
    %c0_13 = arith.constant 0 : index
    %17 = vector.load %arg5[%c0_12, %c0_13] : memref<256x128xbf16, #tpu.memory_space<vmem>>, vector<256x128xbf16>
    %cst_14 = arith.constant dense<0.000000e+00> : vector<16x128xf32>
    %18 = tpu.matmul %16, %17, %cst_14 {dimension_numbers = #tpu.dot_dimension_numbers<[1], [0], [0], [1], [0, 0, 1, 1], [], []>} : vector<16x256xbf16>, vector<256x128xbf16>, vector<16x128xf32> -> vector<16x128xf32>
    %c0_15 = arith.constant 0 : index
    %c0_16 = arith.constant 0 : index
    %19 = vector.load %arg6[%c0_15, %c0_16] : memref<1x128xf32, #tpu.memory_space<vmem>>, vector<1x128xf32>
    %20 = vector.broadcast %19 : vector<1x128xf32> to vector<16x128xf32>
    %21 = arith.addf %18, %20 : vector<16x128xf32>
    %cst_17 = arith.constant 0.000000e+00 : f32
    %22 = vector.broadcast %cst_17 : f32 to vector<16x128xf32>
    %23 = arith.maximumf %21, %22 : vector<16x128xf32>
    %24 = math.absf %21 : vector<16x128xf32>
    %cst_18 = arith.constant 0.000000e+00 : f32
    %25 = vector.broadcast %cst_18 : f32 to vector<16x128xf32>
    %26 = arith.subf %25, %24 : vector<16x128xf32>
    %27 = math.exp %26 : vector<16x128xf32>
    %cst_19 = arith.constant 1.000000e+00 : f32
    %28 = vector.broadcast %cst_19 : f32 to vector<16x128xf32>
    %29 = arith.addf %28, %27 : vector<16x128xf32>
    %30 = math.log %29 : vector<16x128xf32>
    %31 = arith.addf %23, %30 : vector<16x128xf32>
    %cst_20 = arith.constant 1.000000e+00 : f32
    %32 = vector.broadcast %cst_20 : f32 to vector<16x128xf32>
    %33 = arith.addf %31, %32 : vector<16x128xf32>
    %34 = tpu.iota {dimensions = array<i32: 1>} : vector<16x128xi32>
    %c1_i32 = arith.constant 1 : i32
    %35 = vector.broadcast %c1_i32 : i32 to vector<16x128xi32>
    %36 = arith.cmpi sge, %34, %35 : vector<16x128xi32>
    %c6_i32 = arith.constant 6 : i32
    %37 = vector.broadcast %c6_i32 : i32 to vector<16x128xi32>
    %38 = arith.cmpi sle, %34, %37 : vector<16x128xi32>
    %39 = arith.andi %36, %38 : vector<16x128xi1>
    %40 = arith.select %39, %33, %21 : vector<16x128xi1>, vector<16x128xf32>
    %c0_21 = arith.constant 0 : index
    %c0_22 = arith.constant 0 : index
    %41 = vector.load %arg7[%c0_21, %c0_22] : memref<16x128xf32, #tpu.memory_space<vmem>>, vector<16x128xf32>
    tpu.vector_store %arg7[%c0_21, %c0_22], %40 {strides = array<i32>} : memref<16x128xf32, #tpu.memory_space<vmem>>, vector<16x128xf32>,
    return
  }
}

</mosaic_0001>

<bundles_post_ra>
// kernel: net_forward.6
= control target key start
LH: loop header
LB: loop body
LE: loop exit
PB: predicated region body
PF: predicated region fallthrough
CT: control target
= control target key end

     0   :  { %s6695_s12 = smov 0   ;;  %s7617_s0 = inlined_call_operand.vmem [shape: bf16[2,2224,128], index: 0, kind: input, shape index: {}]   ;;  %s7618_s1 = inlined_call_operand.vmem [shape: bf16[128,128], index: 1, kind: input, shape index: {}]   ;;  %s7619_s2 = inlined_call_operand.vmem [shape: f32[1,128], index: 2, kind: input, shape index: {}]   ;;  %s7620_s3 = inlined_call_operand.vmem [shape: bf16[2,2224,128], index: 3, kind: output, shape index: {}]  }
   0x1 LB: > { %s4223_s13 = sadd.s32 4294967295, %s6671_s12   ;;  %p4227_p0 = scmp.ge.s32.totalorder %s6671_s12, 1  ;;  %s6671_s12 = sphi %s6695_s12, %s13_s12  }
   0x2   : > { %p137_p1 = scmp.lt.s32.totalorder %s6671_s12, 3 }
   0x4   : > { %p138_p2 = pnand %p4227_p0, %p137_p1 }
   0x5   : > { %v6515_v0 = vld [vmem:[%s7618_s1] sm:$0xff] (!%p138_p2)   ;;  %v6673_v1 = vmov (!%p138_p2), 0.0   ;;  %v6516_v2 = vld [vmem:[%s7618_s1 + $0x8] sm:$0xff] (!%p138_p2)   ;;  %p161_p3 = scmp.lt.s32.totalorder (!%p138_p2), %s4223_s13, 1  ;;  %vm6674_vm0 = vmmov (!%p138_p2), 0   ;;  %v6517_v3 = vld [vmem:[%s7618_s1 + $0x10] sm:$0xff] (!%p138_p2)  }
   0x6   : > { %141 = sbr.rel (%p138_p2) target bundleno = 811 (0x32b), region = 32  ;;  %5916 = vmatprep.subr.bf16.mxu0 (!%p138_p2), %v6673_v1  ;;  %6488 = vmatprep.subr.bf16.mxu1 (!%p138_p2), %v6673_v1  ;;  %v6518_v4 = vld [vmem:[%s7618_s1 + $0x18] sm:$0xff] (!%p138_p2)   ;;  %v6519_v5 = vld [vmem:[%s7618_s1 + $0x20] sm:$0xff] (!%p138_p2)   ;;  %v6520_v6 = vld [vmem:[%s7618_s1 + $0x28] sm:$0xff] (!%p138_p2)  }
   0x7   : > { %5917 = vmatpush3.bf16.msra.mxu0 (!%p138_p2), %v6515_v0  ;;  %6496 = vmatpush3.bf16.msra.mxu1 (!%p138_p2), %v6515_v0  ;;  %v6521_v7 = vld [vmem:[%s7618_s1 + $0x30] sm:$0xff] (!%p138_p2)   ;;  %v6522_v8 = vld [vmem:[%s7618_s1 + $0x38] sm:$0xff] (!%p138_p2)   ;;  %v6918_v63 = vld [vmem:[%s7619_s2] ss:$0 sm:$0xff] (!%p138_p2) }
   0x8   : > { %5918 = vmatprep.subr.bf16.mxu0 (!%p138_p2), %v6673_v1  ;;  %6489 = vmatprep.subr.bf16.mxu1 (!%p138_p2), %v6673_v1 }
   0x9   : > { %5932 = vmatprep.mubr.msk.bf16.mxu0 (!%p138_p2), %vm6674_vm0, %v6673_v1  ;;  %6212 = vmatprep.mubr.msk.bf16.mxu1 (!%p138_p2), %vm6674_vm0, %v6673_v1 }
   0xb   : > { %5919 = vmatpush3.bf16.msra.mxu0 (!%p138_p2), %v6516_v2  ;;  %6497 = vmatpush3.bf16.msra.mxu1 (!%p138_p2), %v6516_v2 }
   0xc   : > { %5920 = vmatprep.subr.bf16.mxu0 (!%p138_p2), %v6673_v1  ;;  %6490 = vmatprep.subr.bf16.mxu1 (!%p138_p2), %v6673_v1 }
   0xd   : > { %s7622_s13 = smov (!%p161_p3, %s4223_s13), 1 }
   0xe   : > { %s6504_s20 = smul.u32 1112, %s7622_s13 }
   0xf   : > { %5921 = vmatpush3.bf16.msra.mxu0 %v6517_v3  ;;  %6498 = vmatpush3.bf16.msra.mxu1 %v6517_v3 }
  0x10   : > { %s6730_s23 = scalar_lea.vmem %s7617_s0, %s6504_s20  ;;  %5922 = vmatprep.subr.bf16.mxu0 %v6673_v1  ;;  %6491 = vmatprep.subr.bf16.mxu1 %v6673_v1  ;;  %s6935_s11 = scalar_lea.vmem %s7620_s3, %s6504_s20 }
  0x11   : > { %v6523_v9 = vld [vmem:[%s6730_s23] sm:$0xff]   ;;  %v6524_v10 = vld [vmem:[%s6730_s23 + $0x230] sm:$0xff]   ;;  %v6525_v11 = vld [vmem:[%s6730_s23 + $0x8] sm:$0xff]  }
  0x12   : > { %v6526_v12 = vld [vmem:[%s6730_s23 + $0x238] sm:$0xff]   ;;  %v6527_v13 = vld [vmem:[%s6730_s23 + $0x10] sm:$0xff]   ;;  %v6528_v14 = vld [vmem:[%s6730_s23 + $0x240] sm:$0xff]  }
  0x13   : > { %5923 = vmatpush3.bf16.msra.mxu0 %v6518_v4  ;;  %6499 = vmatpush3.bf16.msra.mxu1 %v6518_v4  ;;  %v6529_v15 = vld [vmem:[%s6730_s23 + $0x18] sm:$0xff]   ;;  %v6530_v16 = vld [vmem:[%s6730_s23 + $0x248] sm:$0xff]   ;;  %v6531_v17 = vld [vmem:[%s6730_s23 + $0x20] sm:$0xff]  }
  0x14   : > { %5924 = vmatprep.subr.bf16.mxu0 %v6673_v1  ;;  %6492 = vmatprep.subr.bf16.mxu1 %v6673_v1  ;;  %v6532_v18 = vld [vmem:[%s6730_s23 + $0x250] sm:$0xff]   ;;  %v6533_v19 = vld [vmem:[%s6730_s23 + $0x28] sm:$0xff]   ;;  %v6534_v20 = vld [vmem:[%s6730_s23 + $0x258] sm:$0xff]  }
  0x15   : > { %v6535_v21 = vld [vmem:[%s6730_s23 + $0x30] sm:$0xff]   ;;  %v6536_v22 = vld [vmem:[%s6730_s23 + $0x260] sm:$0xff]   ;;  %v6537_v23 = vld [vmem:[%s6730_s23 + $0x38] sm:$0xff]  }
  0x16   : > { %v6538_v24 = vld [vmem:[%s6730_s23 + $0x268] sm:$0xff]   ;;  %v6539_v25 = vld [vmem:[%s6730_s23 + $0x40] sm:$0xff]   ;;  %v6540_v26 = vld [vmem:[%s6730_s23 + $0x270] sm:$0xff]  }
  0x17   : > { %5925 = vmatpush3.bf16.msra.mxu0 %v6519_v5  ;;  %6500 = vmatpush3.bf16.msra.mxu1 %v6519_v5  ;;  %v6541_v27 = vld [vmem:[%s6730_s23 + $0x48] sm:$0xff]   ;;  %v6542_v28 = vld [vmem:[%s6730_s23 + $0x278] sm:$0xff]   ;;  %v6543_v29 = vld [vmem:[%s6730_s23 + $0x50] sm:$0xff]  }
  0x18   : > { %5926 = vmatprep.subr.bf16.mxu0 %v6673_v1  ;;  %6493 = vmatprep.subr.bf16.mxu1 %v6673_v1  ;;  %v6544_v30 = vld [vmem:[%s6730_s23 + $0x280] sm:$0xff]   ;;  %v6545_v31 = vld [vmem:[%s6730_s23 + $0x58] sm:$0xff]   ;;  %v6546_v32 = vld [vmem:[%s6730_s23 + $0x288] sm:$0xff]  }
  0x19   : > { %v6547_v33 = vld [vmem:[%s6730_s23 + $0x60] sm:$0xff]   ;;  %v6548_v34 = vld [vmem:[%s6730_s23 + $0x290] sm:$0xff]   ;;  %v6549_v35 = vld [vmem:[%s6730_s23 + $0x68] sm:$0xff]  }
  0x1a   : > { %v6550_v36 = vld [vmem:[%s6730_s23 + $0x298] sm:$0xff]   ;;  %v6551_v37 = vld [vmem:[%s6730_s23 + $0x70] sm:$0xff]   ;;  %v6552_v38 = vld [vmem:[%s6730_s23 + $0x2a0] sm:$0xff]  }
  0x1b   : > { %5927 = vmatpush3.bf16.msra.mxu0 %v6520_v6  ;;  %6501 = vmatpush3.bf16.msra.mxu1 %v6520_v6  ;;  %v6553_v39 = vld [vmem:[%s6730_s23 + $0x78] sm:$0xff]   ;;  %v6554_v40 = vld [vmem:[%s6730_s23 + $0x2a8] sm:$0xff]   ;;  %v6555_v41 = vld [vmem:[%s6730_s23 + $0x80] sm:$0xff]  }
  0x1c   : > { %5928 = vmatprep.subr.bf16.mxu0 %v6673_v1  ;;  %6494 = vmatprep.subr.bf16.mxu1 %v6673_v1  ;;  %v6556_v42 = vld [vmem:[%s6730_s23 + $0x2b0] sm:$0xff]   ;;  %v6557_v43 = vld [vmem:[%s6730_s23 + $0x88] sm:$0xff]   ;;  %v6558_v44 = vld [vmem:[%s6730_s23 + $0x2b8] sm:$0xff]  }
  0x1d   : > { %v6559_v45 = vld [vmem:[%s6730_s23 + $0x90] sm:$0xff]   ;;  %v6560_v46 = vld [vmem:[%s6730_s23 + $0x2c0] sm:$0xff]   ;;  %v6561_v47 = vld [vmem:[%s6730_s23 + $0x98] sm:$0xff]  }
  0x1e   : > { %v6562_v48 = vld [vmem:[%s6730_s23 + $0x2c8] sm:$0xff]   ;;  %v6563_v49 = vld [vmem:[%s6730_s23 + $0xa0] sm:$0xff]   ;;  %v6564_v50 = vld [vmem:[%s6730_s23 + $0x2d0] sm:$0xff]  }
  0x1f   : > { %5929 = vmatpush3.bf16.msra.mxu0 %v6521_v7  ;;  %6502 = vmatpush3.bf16.msra.mxu1 %v6521_v7  ;;  %v6565_v51 = vld [vmem:[%s6730_s23 + $0xa8] sm:$0xff]   ;;  %v6566_v52 = vld [vmem:[%s6730_s23 + $0x2d8] sm:$0xff]   ;;  %v6567_v53 = vld [vmem:[%s6730_s23 + $0xb0] sm:$0xff]  }
  0x20   : > { %5930 = vmatprep.subr.bf16.mxu0 %v6673_v1  ;;  %6495 = vmatprep.subr.bf16.mxu1 %v6673_v1  ;;  %v6568_v54 = vld [vmem:[%s6730_s23 + $0x2e0] sm:$0xff]   ;;  %v6569_v55 = vld [vmem:[%s6730_s23 + $0xb8] sm:$0xff]   ;;  %v6570_v56 = vld [vmem:[%s6730_s23 + $0x2e8] sm:$0xff]  }
  0x21   : > { %v6571_v57 = vld [vmem:[%s6730_s23 + $0xc0] sm:$0xff]   ;;  %v6572_v58 = vld [vmem:[%s6730_s23 + $0x2f0] sm:$0xff]   ;;  %v6573_v59 = vld [vmem:[%s6730_s23 + $0xc8] sm:$0xff]  }
  0x22   : > { %v6574_v60 = vld [vmem:[%s6730_s23 + $0x2f8] sm:$0xff]   ;;  %v6575_v61 = vld [vmem:[%s6730_s23 + $0xd0] sm:$0xff]   ;;  %v6576_v62 = vld [vmem:[%s6730_s23 + $0x300] sm:$0xff]  }
  0x23   : > { %5931 = vmatpush3.bf16.msra.mxu0 %v6522_v8  ;;  %6503 = vmatpush3.bf16.msra.mxu1 %v6522_v8  ;;  %v6577_v5 = vld [vmem:[%s6730_s23 + $0xd8] sm:$0xff]   ;;  %v6578_v8 = vld [vmem:[%s6730_s23 + $0x308] sm:$0xff]  }
  0x26   : > { %5933 = vmatmul.mubr.bf16.vlgmr.msra.gmra.mrb[0].mxu0 %v6523_v9  ;;  %6213 = vmatmul.mubr.bf16.vlgmr.msra.gmra.mrb[0].mxu1 %v6524_v10 }
  0x27   : > { %5936 = vmatprep.mubr.msk.bf16.mxu0 %vm6674_vm0, %v6673_v1  ;;  %6216 = vmatprep.mubr.msk.bf16.mxu1 %vm6674_vm0, %v6673_v1 }
  0x2e   : > { %5937 = vmatmul.mubr.bf16.gmra.mrb[4].mxu0 %v6525_v11  ;;  %6217 = vmatmul.mubr.bf16.gmra.mrb[4].mxu1 %v6526_v12 }
  0x2f   : > { %5940 = vmatprep.mubr.msk.bf16.mxu0 %vm6674_vm0, %v6673_v1  ;;  %6220 = vmatprep.mubr.msk.bf16.mxu1 %vm6674_vm0, %v6673_v1 }
  0x36   : > { %5941 = vmatmul.mubr.bf16.gmra.mrb[8].mxu0 %v6527_v13  ;;  %6221 = vmatmul.mubr.bf16.gmra.mrb[8].mxu1 %v6528_v14 }
  0x37   : > { %5944 = vmatprep.mubr.msk.bf16.mxu0 %vm6674_vm0, %v6673_v1  ;;  %6224 = vmatprep.mubr.msk.bf16.mxu1 %vm6674_vm0, %v6673_v1 }
  0x3e   : > { %5945 = vmatmul.mubr.bf16.gmra.mrb[12].mxu0 %v6529_v15  ;;  %6225 = vmatmul.mubr.bf16.gmra.mrb[12].mxu1 %v6530_v16 }
  0x3f   : > { %5948 = vmatprep.mubr.msk.bf16.mxu0 %vm6674_vm0, %v6673_v1  ;;  %6228 = vmatprep.mubr.msk.bf16.mxu1 %vm6674_vm0, %v6673_v1 }
  0x46   : > { %5949 = vmatmul.mubr.bf16.gmra.mrb[16].mxu0 %v6531_v17  ;;  %6229 = vmatmul.mubr.bf16.gmra.mrb[16].mxu1 %v6532_v18 }
  0x47   : > { %5952 = vmatprep.mubr.msk.bf16.mxu0 %vm6674_vm0, %v6673_v1  ;;  %6232 = vmatprep.mubr.msk.bf16.mxu1 %vm6674_vm0, %v6673_v1 }
  0x4e   : > { %5953 = vmatmul.mubr.bf16.gmra.mrb[20].mxu0 %v6533_v19  ;;  %6233 = vmatmul.mubr.bf16.gmra.mrb[20].mxu1 %v6534_v20 }
  0x4f   : > { %5956 = vmatprep.mubr.msk.bf16.mxu0 %vm6674_vm0, %v6673_v1  ;;  %6236 = vmatprep.mubr.msk.bf16.mxu1 %vm6674_vm0, %v6673_v1 }
  0x56   : > { %5957 = vmatmul.mubr.bf16.gmra.mrb[24].mxu0 %v6535_v21  ;;  %6237 = vmatmul.mubr.bf16.gmra.mrb[24].mxu1 %v6536_v22 }
  0x57   : > { %5960 = vmatprep.mubr.msk.bf16.mxu0 %vm6674_vm0, %v6673_v1  ;;  %6240 = vmatprep.mubr.msk.bf16.mxu1 %vm6674_vm0, %v6673_v1 }
  0x5e   : > { %5961 = vmatmul.mubr.bf16.gmra.mrb[28].mxu0 %v6537_v23  ;;  %6241 = vmatmul.mubr.bf16.gmra.mrb[28].mxu1 %v6538_v24 }
  0x5f   : > { %5964 = vmatprep.mubr.msk.bf16.mxu0 %vm6674_vm0, %v6673_v1  ;;  %6244 = vmatprep.mubr.msk.bf16.mxu1 %vm6674_vm0, %v6673_v1 }
  0x66   : > { %5965 = vmatmul.mubr.bf16.gmra.mrb[32].mxu0 %v6539_v25  ;;  %6245 = vmatmul.mubr.bf16.gmra.mrb[32].mxu1 %v6540_v26  ;;  %v6579_v25 = vld [vmem:[%s6730_s23 + $0xe0] sm:$0xff]  }
  0x67   : > { %5968 = vmatprep.mubr.msk.bf16.mxu0 %vm6674_vm0, %v6673_v1  ;;  %6248 = vmatprep.mubr.msk.bf16.mxu1 %vm6674_vm0, %v6673_v1 }
  0x6e   : > { %5969 = vmatmul.mubr.bf16.gmra.mrb[36].mxu0 %v6541_v27  ;;  %6249 = vmatmul.mubr.bf16.gmra.mrb[36].mxu1 %v6542_v28  ;;  %v6580_v28 = vld [vmem:[%s6730_s23 + $0x310] sm:$0xff]  }
  0x6f   : > { %5972 = vmatprep.mubr.msk.bf16.mxu0 %vm6674_vm0, %v6673_v1  ;;  %6252 = vmatprep.mubr.msk.bf16.mxu1 %vm6674_vm0, %v6673_v1 }
  0x76   : > { %5973 = vmatmul.mubr.bf16.gmra.mrb[40].mxu0 %v6543_v29  ;;  %6253 = vmatmul.mubr.bf16.gmra.mrb[40].mxu1 %v6544_v30 }
  0x77   : > { %5976 = vmatprep.mubr.msk.bf16.mxu0 %vm6674_vm0, %v6673_v1  ;;  %6256 = vmatprep.mubr.msk.bf16.mxu1 %vm6674_vm0, %v6673_v1 }
  0x7e   : > { %5977 = vmatmul.mubr.bf16.gmra.mrb[44].mxu0 %v6545_v31  ;;  %6257 = vmatmul.mubr.bf16.gmra.mrb[44].mxu1 %v6546_v32 }
  0x7f   : > { %5980 = vmatprep.mubr.msk.bf16.mxu0 %vm6674_vm0, %v6673_v1  ;;  %6260 = vmatprep.mubr.msk.bf16.mxu1 %vm6674_vm0, %v6673_v1 }
  0x86   : > { %5981 = vmatmul.mubr.bf16.gmra.mrb[48].mxu0 %v6547_v33  ;;  %6261 = vmatmul.mubr.bf16.gmra.mrb[48].mxu1 %v6548_v34 }
  0x87   : > { %5984 = vmatprep.mubr.msk.bf16.mxu0 %vm6674_vm0, %v6673_v1  ;;  %6264 = vmatprep.mubr.msk.bf16.mxu1 %vm6674_vm0, %v6673_v1 }
  0x8e   : > { %5985 = vmatmul.mubr.bf16.gmra.mrb[52].mxu0 %v6549_v35  ;;  %6265 = vmatmul.mubr.bf16.gmra.mrb[52].mxu1 %v6550_v36 }
  0x8f   : > { %5988 = vmatprep.mubr.msk.bf16.mxu0 %vm6674_vm0, %v6673_v1  ;;  %6268 = vmatprep.mubr.msk.bf16.mxu1 %vm6674_vm0, %v6673_v1 }
  0x96   : > { %5989 = vmatmul.mubr.bf16.gmra.mrb[56].mxu0 %v6551_v37  ;;  %6269 = vmatmul.mubr.bf16.gmra.mrb[56].mxu1 %v6552_v38 }
  0x97   : > { %5992 = vmatprep.mubr.msk.bf16.mxu0 %vm6674_vm0, %v6673_v1  ;;  %6272 = vmatprep.mubr.msk.bf16.mxu1 %vm6674_vm0, %v6673_v1 }
  0x9e   : > { %5993 = vmatmul.mubr.bf16.gmra.mrb[60].mxu0 %v6553_v39  ;;  %6273 = vmatmul.mubr.bf16.gmra.mrb[60].mxu1 %v6554_v40 }
  0x9f   : > { %5996 = vmatprep.mubr.msk.bf16.mxu0 %vm6674_vm0, %v6673_v1  ;;  %6276 = vmatprep.mubr.msk.bf16.mxu1 %vm6674_vm0, %v6673_v1 }
  0xa6   : > { %5997 = vmatmul.mubr.bf16.gmra.mrb[64].mxu0 %v6555_v41  ;;  %6277 = vmatmul.mubr.bf16.gmra.mrb[64].mxu1 %v6556_v42 }
  0xa7   : > { %6000 = vmatprep.mubr.msk.bf16.mxu0 %vm6674_vm0, %v6673_v1  ;;  %6280 = vmatprep.mubr.msk.bf16.mxu1 %vm6674_vm0, %v6673_v1 }
  0xae   : > { %6001 = vmatmul.mubr.bf16.gmra.mrb[68].mxu0 %v6557_v43  ;;  %6281 = vmatmul.mubr.bf16.gmra.mrb[68].mxu1 %v6558_v44 }
  0xaf   : > { %6004 = vmatprep.mubr.msk.bf16.mxu0 %vm6674_vm0, %v6673_v1  ;;  %6284 = vmatprep.mubr.msk.bf16.mxu1 %vm6674_vm0, %v6673_v1 }
  0xb6   : > { %6005 = vmatmul.mubr.bf16.gmra.mrb[72].mxu0 %v6559_v45  ;;  %6285 = vmatmul.mubr.bf16.gmra.mrb[72].mxu1 %v6560_v46  ;;  %v6581_v45 = vld [vmem:[%s6730_s23 + $0xe8] sm:$0xff]  }
  0xb7   : > { %6008 = vmatprep.mubr.msk.bf16.mxu0 %vm6674_vm0, %v6673_v1  ;;  %6288 = vmatprep.mubr.msk.bf16.mxu1 %vm6674_vm0, %v6673_v1 }
  0xbe   : > { %6009 = vmatmul.mubr.bf16.gmra.mrb[76].mxu0 %v6561_v47  ;;  %6289 = vmatmul.mubr.bf16.gmra.mrb[76].mxu1 %v6562_v48  ;;  %v6582_v48 = vld [vmem:[%s6730_s23 + $0x318] sm:$0xff]  }
  0xbf   : > { %6012 = vmatprep.mubr.msk.bf16.mxu0 %vm6674_vm0, %v6673_v1  ;;  %6292 = vmatprep.mubr.msk.bf16.mxu1 %vm6674_vm0, %v6673_v1 }
  0xc6   : > { %6013 = vmatmul.mubr.bf16.gmra.mrb[80].mxu0 %v6563_v49  ;;  %6293 = vmatmul.mubr.bf16.gmra.mrb[80].mxu1 %v6564_v50 }
  0xc7   : > { %6016 = vmatprep.mubr.msk.bf16.mxu0 %vm6674_vm0, %v6673_v1  ;;  %6296 = vmatprep.mubr.msk.bf16.mxu1 %vm6674_vm0, %v6673_v1 }
  0xce   : > { %6017 = vmatmul.mubr.bf16.gmra.mrb[84].mxu0 %v6565_v51  ;;  %6297 = vmatmul.mubr.bf16.gmra.mrb[84].mxu1 %v6566_v52 }
  0xcf   : > { %6020 = vmatprep.mubr.msk.bf16.mxu0 %vm6674_vm0, %v6673_v1  ;;  %6300 = vmatprep.mubr.msk.bf16.mxu1 %vm6674_vm0, %v6673_v1 }
  0xd6   : > { %6021 = vmatmul.mubr.bf16.gmra.mrb[88].mxu0 %v6567_v53  ;;  %6301 = vmatmul.mubr.bf16.gmra.mrb[88].mxu1 %v6568_v54 }
  0xd7   : > { %6024 = vmatprep.mubr.msk.bf16.mxu0 %vm6674_vm0, %v6673_v1  ;;  %6304 = vmatprep.mubr.msk.bf16.mxu1 %vm6674_vm0, %v6673_v1 }
  0xde   : > { %6025 = vmatmul.mubr.bf16.gmra.mrb[92].mxu0 %v6569_v55  ;;  %6305 = vmatmul.mubr.bf16.gmra.mrb[92].mxu1 %v6570_v56 }
  0xdf   : > { %6028 = vmatprep.mubr.msk.bf16.mxu0 %vm6674_vm0, %v6673_v1  ;;  %6308 = vmatprep.mubr.msk.bf16.mxu1 %vm6674_vm0, %v6673_v1 }
  0xe6   : > { %6029 = vmatmul.mubr.bf16.gmra.mrb[96].mxu0 %v6571_v57  ;;  %6309 = vmatmul.mubr.bf16.gmra.mrb[96].mxu1 %v6572_v58 }
  0xe7   : > { %6032 = vmatprep.mubr.msk.bf16.mxu0 %vm6674_vm0, %v6673_v1  ;;  %6312 = vmatprep.mubr.msk.bf16.mxu1 %vm6674_vm0, %v6673_v1 }
  0xee   : > { %6033 = vmatmul.mubr.bf16.gmra.mrb[100].mxu0 %v6573_v59  ;;  %6313 = vmatmul.mubr.bf16.gmra.mrb[100].mxu1 %v6574_v60 }
  0xef   : > { %6036 = vmatprep.mubr.msk.bf16.mxu0 %vm6674_vm0, %v6673_v1  ;;  %6316 = vmatprep.mubr.msk.bf16.mxu1 %vm6674_vm0, %v6673_v1 }
  0xf6   : > { %6037 = vmatmul.mubr.bf16.gmra.mrb[104].mxu0 %v6575_v61  ;;  %6317 = vmatmul.mubr.bf16.gmra.mrb[104].mxu1 %v6576_v62 }
  0xf7   : > { %6040 = vmatprep.mubr.msk.bf16.mxu0 %vm6674_vm0, %v6673_v1  ;;  %6320 = vmatprep.mubr.msk.bf16.mxu1 %vm6674_vm0, %v6673_v1 }
  0xf9   : > { %v1389_v0 = vpop.f32.mrb[0].mxu0  ;;  %v1949_v2 = vpop.f32.mrb[0].mxu1 }
  0xfa   : > { %v1390_v3 = vadd.f32 %v6918_v63, %v1389_v0  ;;  %v5934_v4 = vpop.f32.mrb[1].mxu0  ;;  %v1950_v6 = vadd.f32 %v6918_v63, %v1949_v2  ;;  %v6214_v7 = vpop.f32.mrb[1].mxu1 }
  0xfb   : > { %v1392_v9 = vpop.f32.mrb[2].mxu0  ;;  %v1952_v10 = vpop.f32.mrb[2].mxu1 }
  0xfc   : > { %v1393_v11 = vadd.f32 %v6918_v63, %v1392_v9  ;;  %v5935_v12 = vpop.f32.mrb[3].mxu0  ;;  %v2640_v13 = vmax.f32 %v1950_v6, 0.0  ;;  %v1953_v14 = vadd.f32 %v6918_v63, %v1952_v10  ;;  %v6215_v15 = vpop.f32.mrb[3].mxu1  ;;  %v2500_v16 = vmax.f32 %v1390_v3, 0.0  ;;  %v6583_v3 = vld [vmem:[%s6730_s23 + $0xf0] sm:$0xff]   ;;  %v6584_v6 = vld [vmem:[%s6730_s23 + $0x320] sm:$0xff]  }
  0xfe   : > { %v2501_v17 = vmax.f32 %v1393_v11, 0.0  ;;  %6041 = vmatmul.mubr.bf16.gmra.mrb[108].mxu0 %v6577_v5  ;;  %v2641_v18 = vmax.f32 %v1953_v14, 0.0  ;;  %6321 = vmatmul.mubr.bf16.gmra.mrb[108].mxu1 %v6578_v8 }
  0xff   : > { %6044 = vmatprep.mubr.msk.bf16.mxu0 %vm6674_vm0, %v6673_v1  ;;  %6324 = vmatprep.mubr.msk.bf16.mxu1 %vm6674_vm0, %v6673_v1 }
 0x100   : > { %v4939_v19 = vpack.c.bf16 %v2501_v17, %v2500_v16  ;;  %v5289_v20 = vpack.c.bf16 %v2641_v18, %v2640_v13 }
 0x101   : > { %v1397_v21 = vpop.f32.mrb[4].mxu0  ;;  %v1957_v22 = vpop.f32.mrb[4].mxu1 }
 0x102   : > { %4940 = vst [vmem:[%s6935_s11] sm:$0xff] %v4939_v19   ;;  %5700 = vst [vmem:[%s6935_s11 + $0x230] sm:$0xff] %v5289_v20   ;;  %v1398_v23 = vadd.f32 %v6918_v63, %v1397_v21  ;;  %v5938_v24 = vpop.f32.mrb[5].mxu0  ;;  %v1958_v26 = vadd.f32 %v6918_v63, %v1957_v22  ;;  %v6218_v27 = vpop.f32.mrb[5].mxu1 }
 0x103   : > { %v1400_v29 = vpop.f32.mrb[6].mxu0  ;;  %v1960_v30 = vpop.f32.mrb[6].mxu1 }
 0x104   : > { %v1401_v31 = vadd.f32 %v6918_v63, %v1400_v29  ;;  %v5939_v32 = vpop.f32.mrb[7].mxu0  ;;  %v2642_v33 = vmax.f32 %v1958_v26, 0.0  ;;  %v1961_v34 = vadd.f32 %v6918_v63, %v1960_v30  ;;  %v6219_v35 = vpop.f32.mrb[7].mxu1  ;;  %v2502_v36 = vmax.f32 %v1398_v23, 0.0  ;;  %v6585_v23 = vld [vmem:[%s6730_s23 + $0xf8] sm:$0xff]   ;;  %v6586_v26 = vld [vmem:[%s6730_s23 + $0x328] sm:$0xff]  }
 0x106   : > { %v2503_v37 = vmax.f32 %v1401_v31, 0.0  ;;  %6045 = vmatmul.mubr.bf16.gmra.mrb[112].mxu0 %v6579_v25  ;;  %v2643_v38 = vmax.f32 %v1961_v34, 0.0  ;;  %6325 = vmatmul.mubr.bf16.gmra.mrb[112].mxu1 %v6580_v28 }
 0x107   : > { %6048 = vmatprep.mubr.msk.bf16.mxu0 %vm6674_vm0, %v6673_v1  ;;  %6328 = vmatprep.mubr.msk.bf16.mxu1 %vm6674_vm0, %v6673_v1 }
 0x108   : > { %v4944_v39 = vpack.c.bf16 %v2503_v37, %v2502_v36  ;;  %v5294_v40 = vpack.c.bf16 %v2643_v38, %v2642_v33 }
 0x109   : > { %v1405_v41 = vpop.f32.mrb[8].mxu0  ;;  %v1965_v42 = vpop.f32.mrb[8].mxu1 }
 0x10a   : > { %5631 = vst [vmem:[%s6935_s11 + $0x8] sm:$0xff] %v4944_v39   ;;  %5701 = vst [vmem:[%s6935_s11 + $0x238] sm:$0xff] %v5294_v40   ;;  %v1406_v43 = vadd.f32 %v6918_v63, %v1405_v41  ;;  %v5942_v44 = vpop.f32.mrb[9].mxu0  ;;  %v1966_v46 = vadd.f32 %v6918_v63, %v1965_v42  ;;  %v6222_v47 = vpop.f32.mrb[9].mxu1 }
 0x10b   : > { %v1408_v49 = vpop.f32.mrb[10].mxu0  ;;  %v1968_v50 = vpop.f32.mrb[10].mxu1 }
 0x10c   : > { %v1409_v51 = vadd.f32 %v6918_v63, %v1408_v49  ;;  %v5943_v52 = vpop.f32.mrb[11].mxu0  ;;  %v2644_v53 = vmax.f32 %v1966_v46, 0.0  ;;  %v1969_v54 = vadd.f32 %v6918_v63, %v1968_v50  ;;  %v6223_v55 = vpop.f32.mrb[11].mxu1  ;;  %v2504_v56 = vmax.f32 %v1406_v43, 0.0  ;;  %v6587_v43 = vld [vmem:[%s6730_s23 + $0x100] sm:$0xff]   ;;  %v6588_v46 = vld [vmem:[%s6730_s23 + $0x330] sm:$0xff]  }
 0x10e   : > { %v2505_v57 = vmax.f32 %v1409_v51, 0.0  ;;  %6049 = vmatmul.mubr.bf16.gmra.mrb[116].mxu0 %v6581_v45  ;;  %v2645_v58 = vmax.f32 %v1969_v54, 0.0  ;;  %6329 = vmatmul.mubr.bf16.gmra.mrb[116].mxu1 %v6582_v48 }
 0x10f   : > { %6052 = vmatprep.mubr.msk.bf16.mxu0 %vm6674_vm0, %v6673_v1  ;;  %6332 = vmatprep.mubr.msk.bf16.mxu1 %vm6674_vm0, %v6673_v1 }
 0x110   : > { %v4949_v59 = vpack.c.bf16 %v2505_v57, %v2504_v56  ;;  %v5299_v60 = vpack.c.bf16 %v2645_v58, %v2644_v53 }
 0x111   : > { %v1413_v61 = vpop.f32.mrb[12].mxu0  ;;  %v1973_v62 = vpop.f32.mrb[12].mxu1 }
 0x112   : > { %5632 = vst [vmem:[%s6935_s11 + $0x10] sm:$0xff] %v4949_v59   ;;  %5702 = vst [vmem:[%s6935_s11 + $0x240] sm:$0xff] %v5299_v60   ;;  %v1414_v0 = vadd.f32 %v6918_v63, %v1413_v61  ;;  %v5946_v2 = vpop.f32.mrb[13].mxu0  ;;  %v1974_v4 = vadd.f32 %v6918_v63, %v1973_v62  ;;  %v6226_v5 = vpop.f32.mrb[13].mxu1 }
 0x113   : > { %v1416_v7 = vpop.f32.mrb[14].mxu0  ;;  %v1976_v8 = vpop.f32.mrb[14].mxu1 }
 0x114   : > { %v1417_v9 = vadd.f32 %v6918_v63, %v1416_v7  ;;  %v5947_v10 = vpop.f32.mrb[15].mxu0  ;;  %v2646_v11 = vmax.f32 %v1974_v4, 0.0  ;;  %v1977_v12 = vadd.f32 %v6918_v63, %v1976_v8  ;;  %v6227_v13 = vpop.f32.mrb[15].mxu1  ;;  %v2506_v14 = vmax.f32 %v1414_v0, 0.0  ;;  %v6589_v0 = vld [vmem:[%s6730_s23 + $0x108] sm:$0xff]   ;;  %v6590_v4 = vld [vmem:[%s6730_s23 + $0x338] sm:$0xff]  }
 0x116   : > { %v2507_v15 = vmax.f32 %v1417_v9, 0.0  ;;  %6053 = vmatmul.mubr.bf16.gmra.mrb[120].mxu0 %v6583_v3  ;;  %v2647_v16 = vmax.f32 %v1977_v12, 0.0  ;;  %6333 = vmatmul.mubr.bf16.gmra.mrb[120].mxu1 %v6584_v6 }
 0x117   : > { %6056 = vmatprep.mubr.msk.bf16.mxu0 %vm6674_vm0, %v6673_v1  ;;  %6336 = vmatprep.mubr.msk.bf16.mxu1 %vm6674_vm0, %v6673_v1 }
 0x118   : > { %v4954_v17 = vpack.c.bf16 %v2507_v15, %v2506_v14  ;;  %v5304_v18 = vpack.c.bf16 %v2647_v16, %v2646_v11 }
 0x119   : > { %v1421_v19 = vpop.f32.mrb[16].mxu0  ;;  %v1981_v20 = vpop.f32.mrb[16].mxu1 }
 0x11a   : > { %5633 = vst [vmem:[%s6935_s11 + $0x18] sm:$0xff] %v4954_v17   ;;  %5703 = vst [vmem:[%s6935_s11 + $0x248] sm:$0xff] %v5304_v18   ;;  %v1422_v21 = vadd.f32 %v6918_v63, %v1421_v19  ;;  %v5950_v22 = vpop.f32.mrb[17].mxu0  ;;  %v1982_v24 = vadd.f32 %v6918_v63, %v1981_v20  ;;  %v6230_v25 = vpop.f32.mrb[17].mxu1 }
 0x11b   : > { %v1424_v27 = vpop.f32.mrb[18].mxu0  ;;  %v1984_v28 = vpop.f32.mrb[18].mxu1 }
 0x11c   : > { %v1425_v29 = vadd.f32 %v6918_v63, %v1424_v27  ;;  %v5951_v30 = vpop.f32.mrb[19].mxu0  ;;  %v2648_v31 = vmax.f32 %v1982_v24, 0.0  ;;  %v1985_v32 = vadd.f32 %v6918_v63, %v1984_v28  ;;  %v6231_v33 = vpop.f32.mrb[19].mxu1  ;;  %v2508_v34 = vmax.f32 %v1422_v21, 0.0  ;;  %v6591_v21 = vld [vmem:[%s6730_s23 + $0x110] sm:$0xff]   ;;  %v6592_v24 = vld [vmem:[%s6730_s23 + $0x340] sm:$0xff]  }
 0x11e   : > { %v2509_v35 = vmax.f32 %v1425_v29, 0.0  ;;  %6057 = vmatmul.mubr.bf16.gmra.mrb[124].mxu0 %v6585_v23  ;;  %v2649_v36 = vmax.f32 %v1985_v32, 0.0  ;;  %6337 = vmatmul.mubr.bf16.gmra.mrb[124].mxu1 %v6586_v26 }
 0x11f   : > { %6060 = vmatprep.mubr.msk.bf16.mxu0 %vm6674_vm0, %v6673_v1  ;;  %6340 = vmatprep.mubr.msk.bf16.mxu1 %vm6674_vm0, %v6673_v1 }
 0x120   : > { %v4959_v37 = vpack.c.bf16 %v2509_v35, %v2508_v34  ;;  %v5309_v38 = vpack.c.bf16 %v2649_v36, %v2648_v31 }
 0x121   : > { %v1429_v39 = vpop.f32.mrb[20].mxu0  ;;  %v1989_v40 = vpop.f32.mrb[20].mxu1 }
 0x122   : > { %5634 = vst [vmem:[%s6935_s11 + $0x20] sm:$0xff] %v4959_v37   ;;  %5704 = vst [vmem:[%s6935_s11 + $0x250] sm:$0xff] %v5309_v38   ;;  %v1430_v41 = vadd.f32 %v6918_v63, %v1429_v39  ;;  %v5954_v42 = vpop.f32.mrb[21].mxu0  ;;  %v1990_v44 = vadd.f32 %v6918_v63, %v1989_v40  ;;  %v6234_v45 = vpop.f32.mrb[21].mxu1 }
 0x123   : > { %v1432_v47 = vpop.f32.mrb[22].mxu0  ;;  %v1992_v48 = vpop.f32.mrb[22].mxu1 }
 0x124   : > { %v1433_v49 = vadd.f32 %v6918_v63, %v1432_v47  ;;  %v5955_v50 = vpop.f32.mrb[23].mxu0  ;;  %v2650_v51 = vmax.f32 %v1990_v44, 0.0  ;;  %v1993_v52 = vadd.f32 %v6918_v63, %v1992_v48  ;;  %v6235_v53 = vpop.f32.mrb[23].mxu1  ;;  %v2510_v54 = vmax.f32 %v1430_v41, 0.0  ;;  %v6593_v41 = vld [vmem:[%s6730_s23 + $0x118] sm:$0xff]   ;;  %v6594_v44 = vld [vmem:[%s6730_s23 + $0x348] sm:$0xff]  }
 0x126   : > { %v2511_v55 = vmax.f32 %v1433_v49, 0.0  ;;  %6061 = vmatmul.mubr.bf16.gmra.mrb[128].mxu0 %v6587_v43  ;;  %v2651_v56 = vmax.f32 %v1993_v52, 0.0  ;;  %6341 = vmatmul.mubr.bf16.gmra.mrb[128].mxu1 %v6588_v46 }
 0x127   : > { %6064 = vmatprep.mubr.msk.bf16.mxu0 %vm6674_vm0, %v6673_v1  ;;  %6344 = vmatprep.mubr.msk.bf16.mxu1 %vm6674_vm0, %v6673_v1 }
 0x128   : > { %v4964_v57 = vpack.c.bf16 %v2511_v55, %v2510_v54  ;;  %v5314_v58 = vpack.c.bf16 %v2651_v56, %v2650_v51 }
 0x129   : > { %v1437_v59 = vpop.f32.mrb[24].mxu0  ;;  %v1997_v60 = vpop.f32.mrb[24].mxu1 }
 0x12a   : > { %5635 = vst [vmem:[%s6935_s11 + $0x28] sm:$0xff] %v4964_v57   ;;  %5705 = vst [vmem:[%s6935_s11 + $0x258] sm:$0xff] %v5314_v58   ;;  %v1438_v61 = vadd.f32 %v6918_v63, %v1437_v59  ;;  %v5958_v62 = vpop.f32.mrb[25].mxu0  ;;  %v1998_v2 = vadd.f32 %v6918_v63, %v1997_v60  ;;  %v6238_v3 = vpop.f32.mrb[25].mxu1 }
 0x12b   : > { %v1440_v5 = vpop.f32.mrb[26].mxu0  ;;  %v2000_v6 = vpop.f32.mrb[26].mxu1 }
 0x12c   : > { %v1441_v7 = vadd.f32 %v6918_v63, %v1440_v5  ;;  %v5959_v8 = vpop.f32.mrb[27].mxu0  ;;  %v2652_v9 = vmax.f32 %v1998_v2, 0.0  ;;  %v2001_v10 = vadd.f32 %v6918_v63, %v2000_v6  ;;  %v6239_v11 = vpop.f32.mrb[27].mxu1  ;;  %v2512_v12 = vmax.f32 %v1438_v61, 0.0  ;;  %v6595_v61 = vld [vmem:[%s6730_s23 + $0x120] sm:$0xff]   ;;  %v6596_v2 = vld [vmem:[%s6730_s23 + $0x350] sm:$0xff]  }
 0x12e   : > { %v2513_v13 = vmax.f32 %v1441_v7, 0.0  ;;  %6065 = vmatmul.mubr.bf16.gmra.mrb[132].mxu0 %v6589_v0  ;;  %v2653_v14 = vmax.f32 %v2001_v10, 0.0  ;;  %6345 = vmatmul.mubr.bf16.gmra.mrb[132].mxu1 %v6590_v4 }
 0x12f   : > { %6068 = vmatprep.mubr.msk.bf16.mxu0 %vm6674_vm0, %v6673_v1  ;;  %6348 = vmatprep.mubr.msk.bf16.mxu1 %vm6674_vm0, %v6673_v1 }
 0x130   : > { %v4969_v15 = vpack.c.bf16 %v2513_v13, %v2512_v12  ;;  %v5319_v16 = vpack.c.bf16 %v2653_v14, %v2652_v9 }
 0x131   : > { %v1445_v17 = vpop.f32.mrb[28].mxu0  ;;  %v2005_v18 = vpop.f32.mrb[28].mxu1 }
 0x132   : > { %5636 = vst [vmem:[%s6935_s11 + $0x30] sm:$0xff] %v4969_v15   ;;  %5706 = vst [vmem:[%s6935_s11 + $0x260] sm:$0xff] %v5319_v16   ;;  %v1446_v19 = vadd.f32 %v6918_v63, %v1445_v17  ;;  %v5962_v20 = vpop.f32.mrb[29].mxu0  ;;  %v2006_v22 = vadd.f32 %v6918_v63, %v2005_v18  ;;  %v6242_v23 = vpop.f32.mrb[29].mxu1 }
 0x133   : > { %v1448_v25 = vpop.f32.mrb[30].mxu0  ;;  %v2008_v26 = vpop.f32.mrb[30].mxu1 }
 0x134   : > { %v1449_v27 = vadd.f32 %v6918_v63, %v1448_v25  ;;  %v5963_v28 = vpop.f32.mrb[31].mxu0  ;;  %v2654_v29 = vmax.f32 %v2006_v22, 0.0  ;;  %v2009_v30 = vadd.f32 %v6918_v63, %v2008_v26  ;;  %v6243_v31 = vpop.f32.mrb[31].mxu1  ;;  %v2514_v32 = vmax.f32 %v1446_v19, 0.0  ;;  %v6597_v19 = vld [vmem:[%s6730_s23 + $0x128] sm:$0xff]   ;;  %v6598_v22 = vld [vmem:[%s6730_s23 + $0x358] sm:$0xff]  }
 0x136   : > { %v2515_v33 = vmax.f32 %v1449_v27, 0.0  ;;  %6069 = vmatmul.mubr.bf16.gmra.mrb[136].mxu0 %v6591_v21  ;;  %v2655_v34 = vmax.f32 %v2009_v30, 0.0  ;;  %6349 = vmatmul.mubr.bf16.gmra.mrb[136].mxu1 %v6592_v24 }
 0x137   : > { %6072 = vmatprep.mubr.msk.bf16.mxu0 %vm6674_vm0, %v6673_v1  ;;  %6352 = vmatprep.mubr.msk.bf16.mxu1 %vm6674_vm0, %v6673_v1 }
 0x138   : > { %v4974_v35 = vpack.c.bf16 %v2515_v33, %v2514_v32  ;;  %v5324_v36 = vpack.c.bf16 %v2655_v34, %v2654_v29 }
 0x139   : > { %v1453_v37 = vpop.f32.mrb[32].mxu0  ;;  %v2013_v38 = vpop.f32.mrb[32].mxu1 }
 0x13a   : > { %5637 = vst [vmem:[%s6935_s11 + $0x38] sm:$0xff] %v4974_v35   ;;  %5707 = vst [vmem:[%s6935_s11 + $0x268] sm:$0xff] %v5324_v36   ;;  %v1454_v39 = vadd.f32 %v6918_v63, %v1453_v37  ;;  %v5966_v40 = vpop.f32.mrb[33].mxu0  ;;  %v2014_v42 = vadd.f32 %v6918_v63, %v2013_v38  ;;  %v6246_v43 = vpop.f32.mrb[33].mxu1 }
 0x13b   : > { %v1456_v45 = vpop.f32.mrb[34].mxu0  ;;  %v2016_v46 = vpop.f32.mrb[34].mxu1 }
 0x13c   : > { %v1457_v47 = vadd.f32 %v6918_v63, %v1456_v45  ;;  %v5967_v48 = vpop.f32.mrb[35].mxu0  ;;  %v2656_v49 = vmax.f32 %v2014_v42, 0.0  ;;  %v2017_v50 = vadd.f32 %v6918_v63, %v2016_v46  ;;  %v6247_v51 = vpop.f32.mrb[35].mxu1  ;;  %v2516_v52 = vmax.f32 %v1454_v39, 0.0  ;;  %v6599_v39 = vld [vmem:[%s6730_s23 + $0x130] sm:$0xff]   ;;  %v6600_v42 = vld [vmem:[%s6730_s23 + $0x360] sm:$0xff]  }
 0x13e   : > { %v2517_v53 = vmax.f32 %v1457_v47, 0.0  ;;  %6073 = vmatmul.mubr.bf16.gmra.mrb[140].mxu0 %v6593_v41  ;;  %v2657_v54 = vmax.f32 %v2017_v50, 0.0  ;;  %6353 = vmatmul.mubr.bf16.gmra.mrb[140].mxu1 %v6594_v44 }
 0x13f   : > { %6076 = vmatprep.mubr.msk.bf16.mxu0 %vm6674_vm0, %v6673_v1  ;;  %6356 = vmatprep.mubr.msk.bf16.mxu1 %vm6674_vm0, %v6673_v1 }
 0x140   : > { %v4979_v55 = vpack.c.bf16 %v2517_v53, %v2516_v52  ;;  %v5329_v56 = vpack.c.bf16 %v2657_v54, %v2656_v49 }
 0x141   : > { %v1461_v57 = vpop.f32.mrb[36].mxu0  ;;  %v2021_v58 = vpop.f32.mrb[36].mxu1 }
 0x142   : > { %5638 = vst [vmem:[%s6935_s11 + $0x40] sm:$0xff] %v4979_v55   ;;  %5708 = vst [vmem:[%s6935_s11 + $0x270] sm:$0xff] %v5329_v56   ;;  %v1462_v59 = vadd.f32 %v6918_v63, %v1461_v57  ;;  %v5970_v60 = vpop.f32.mrb[37].mxu0  ;;  %v2022_v62 = vadd.f32 %v6918_v63, %v2021_v58  ;;  %v6250_v0 = vpop.f32.mrb[37].mxu1 }
 0x143   : > { %v1464_v3 = vpop.f32.mrb[38].mxu0  ;;  %v2024_v4 = vpop.f32.mrb[38].mxu1 }
 0x144   : > { %v1465_v5 = vadd.f32 %v6918_v63, %v1464_v3  ;;  %v5971_v6 = vpop.f32.mrb[39].mxu0  ;;  %v2658_v7 = vmax.f32 %v2022_v62, 0.0  ;;  %v2025_v8 = vadd.f32 %v6918_v63, %v2024_v4  ;;  %v6251_v9 = vpop.f32.mrb[39].mxu1  ;;  %v2518_v10 = vmax.f32 %v1462_v59, 0.0  ;;  %v6601_v59 = vld [vmem:[%s6730_s23 + $0x138] sm:$0xff]   ;;  %v6602_v62 = vld [vmem:[%s6730_s23 + $0x368] sm:$0xff]  }
 0x146   : > { %v2519_v11 = vmax.f32 %v1465_v5, 0.0  ;;  %6077 = vmatmul.mubr.bf16.gmra.mrb[144].mxu0 %v6595_v61  ;;  %v2659_v12 = vmax.f32 %v2025_v8, 0.0  ;;  %6357 = vmatmul.mubr.bf16.gmra.mrb[144].mxu1 %v6596_v2 }
 0x147   : > { %6080 = vmatprep.mubr.msk.bf16.mxu0 %vm6674_vm0, %v6673_v1  ;;  %6360 = vmatprep.mubr.msk.bf16.mxu1 %vm6674_vm0, %v6673_v1 }
 0x148   : > { %v4984_v13 = vpack.c.bf16 %v2519_v11, %v2518_v10  ;;  %v5334_v14 = vpack.c.bf16 %v2659_v12, %v2658_v7 }
 0x149   : > { %v1469_v15 = vpop.f32.mrb[40].mxu0  ;;  %v2029_v16 = vpop.f32.mrb[40].mxu1 }
 0x14a   : > { %5639 = vst [vmem:[%s6935_s11 + $0x48] sm:$0xff] %v4984_v13   ;;  %5709 = vst [vmem:[%s6935_s11 + $0x278] sm:$0xff] %v5334_v14   ;;  %v1470_v17 = vadd.f32 %v6918_v63, %v1469_v15  ;;  %v5974_v18 = vpop.f32.mrb[41].mxu0  ;;  %v2030_v20 = vadd.f32 %v6918_v63, %v2029_v16  ;;  %v6254_v21 = vpop.f32.mrb[41].mxu1 }
 0x14b   : > { %v1472_v23 = vpop.f32.mrb[42].mxu0  ;;  %v2032_v24 = vpop.f32.mrb[42].mxu1 }
 0x14c   : > { %v1473_v25 = vadd.f32 %v6918_v63, %v1472_v23  ;;  %v5975_v26 = vpop.f32.mrb[43].mxu0  ;;  %v2660_v27 = vmax.f32 %v2030_v20, 0.0  ;;  %v2033_v28 = vadd.f32 %v6918_v63, %v2032_v24  ;;  %v6255_v29 = vpop.f32.mrb[43].mxu1  ;;  %v2520_v30 = vmax.f32 %v1470_v17, 0.0  ;;  %v6603_v17 = vld [vmem:[%s6730_s23 + $0x140] sm:$0xff]   ;;  %v6604_v20 = vld [vmem:[%s6730_s23 + $0x370] sm:$0xff]  }
 0x14e   : > { %v2521_v31 = vmax.f32 %v1473_v25, 0.0  ;;  %6081 = vmatmul.mubr.bf16.gmra.mrb[148].mxu0 %v6597_v19  ;;  %v2661_v32 = vmax.f32 %v2033_v28, 0.0  ;;  %6361 = vmatmul.mubr.bf16.gmra.mrb[148].mxu1 %v6598_v22 }
 0x14f   : > { %6084 = vmatprep.mubr.msk.bf16.mxu0 %vm6674_vm0, %v6673_v1  ;;  %6364 = vmatprep.mubr.msk.bf16.mxu1 %vm6674_vm0, %v6673_v1 }
 0x150   : > { %v4989_v33 = vpack.c.bf16 %v2521_v31, %v2520_v30  ;;  %v5339_v34 = vpack.c.bf16 %v2661_v32, %v2660_v27 }
 0x151   : > { %v1477_v35 = vpop.f32.mrb[44].mxu0  ;;  %v2037_v36 = vpop.f32.mrb[44].mxu1 }
 0x152   : > { %5640 = vst [vmem:[%s6935_s11 + $0x50] sm:$0xff] %v4989_v33   ;;  %5710 = vst [vmem:[%s6935_s11 + $0x280] sm:$0xff] %v5339_v34   ;;  %v1478_v37 = vadd.f32 %v6918_v63, %v1477_v35  ;;  %v5978_v38 = vpop.f32.mrb[45].mxu0  ;;  %v2038_v40 = vadd.f32 %v6918_v63, %v2037_v36  ;;  %v6258_v41 = vpop.f32.mrb[45].mxu1 }
 0x153   : > { %v1480_v43 = vpop.f32.mrb[46].mxu0  ;;  %v2040_v44 = vpop.f32.mrb[46].mxu1 }
 0x154   : > { %v1481_v45 = vadd.f32 %v6918_v63, %v1480_v43  ;;  %v5979_v46 = vpop.f32.mrb[47].mxu0  ;;  %v2662_v47 = vmax.f32 %v2038_v40, 0.0  ;;  %v2041_v48 = vadd.f32 %v6918_v63, %v2040_v44  ;;  %v6259_v49 = vpop.f32.mrb[47].mxu1  ;;  %v2522_v50 = vmax.f32 %v1478_v37, 0.0  ;;  %v6605_v37 = vld [vmem:[%s6730_s23 + $0x148] sm:$0xff]   ;;  %v6606_v40 = vld [vmem:[%s6730_s23 + $0x378] sm:$0xff]  }
 0x156   : > { %v2523_v51 = vmax.f32 %v1481_v45, 0.0  ;;  %6085 = vmatmul.mubr.bf16.gmra.mrb[152].mxu0 %v6599_v39  ;;  %v2663_v52 = vmax.f32 %v2041_v48, 0.0  ;;  %6365 = vmatmul.mubr.bf16.gmra.mrb[152].mxu1 %v6600_v42 }
 0x157   : > { %6088 = vmatprep.mubr.msk.bf16.mxu0 %vm6674_vm0, %v6673_v1  ;;  %6368 = vmatprep.mubr.msk.bf16.mxu1 %vm6674_vm0, %v6673_v1 }
 0x158   : > { %v4994_v53 = vpack.c.bf16 %v2523_v51, %v2522_v50  ;;  %v5344_v54 = vpack.c.bf16 %v2663_v52, %v2662_v47 }
 0x159   : > { %v1485_v55 = vpop.f32.mrb[48].mxu0  ;;  %v2045_v56 = vpop.f32.mrb[48].mxu1 }
 0x15a   : > { %5641 = vst [vmem:[%s6935_s11 + $0x58] sm:$0xff] %v4994_v53   ;;  %5711 = vst [vmem:[%s6935_s11 + $0x288] sm:$0xff] %v5344_v54   ;;  %v1486_v57 = vadd.f32 %v6918_v63, %v1485_v55  ;;  %v5982_v58 = vpop.f32.mrb[49].mxu0  ;;  %v2046_v60 = vadd.f32 %v6918_v63, %v2045_v56  ;;  %v6262_v61 = vpop.f32.mrb[49].mxu1 }
 0x15b   : > { %v1488_v0 = vpop.f32.mrb[50].mxu0  ;;  %v2048_v2 = vpop.f32.mrb[50].mxu1 }
 0x15c   : > { %v1489_v3 = vadd.f32 %v6918_v63, %v1488_v0  ;;  %v5983_v4 = vpop.f32.mrb[51].mxu0  ;;  %v2664_v5 = vmax.f32 %v2046_v60, 0.0  ;;  %v2049_v6 = vadd.f32 %v6918_v63, %v2048_v2  ;;  %v6263_v7 = vpop.f32.mrb[51].mxu1  ;;  %v2524_v8 = vmax.f32 %v1486_v57, 0.0  ;;  %v6607_v57 = vld [vmem:[%s6730_s23 + $0x150] sm:$0xff]   ;;  %v6608_v60 = vld [vmem:[%s6730_s23 + $0x380] sm:$0xff]  }
 0x15e   : > { %v2525_v9 = vmax.f32 %v1489_v3, 0.0  ;;  %6089 = vmatmul.mubr.bf16.gmra.mrb[156].mxu0 %v6601_v59  ;;  %v2665_v10 = vmax.f32 %v2049_v6, 0.0  ;;  %6369 = vmatmul.mubr.bf16.gmra.mrb[156].mxu1 %v6602_v62 }
 0x15f   : > { %6092 = vmatprep.mubr.msk.bf16.mxu0 %vm6674_vm0, %v6673_v1  ;;  %6372 = vmatprep.mubr.msk.bf16.mxu1 %vm6674_vm0, %v6673_v1 }
 0x160   : > { %v4999_v11 = vpack.c.bf16 %v2525_v9, %v2524_v8  ;;  %v5349_v12 = vpack.c.bf16 %v2665_v10, %v2664_v5 }
 0x161   : > { %v1493_v13 = vpop.f32.mrb[52].mxu0  ;;  %v2053_v14 = vpop.f32.mrb[52].mxu1 }
 0x162   : > { %5642 = vst [vmem:[%s6935_s11 + $0x60] sm:$0xff] %v4999_v11   ;;  %5712 = vst [vmem:[%s6935_s11 + $0x290] sm:$0xff] %v5349_v12   ;;  %v1494_v15 = vadd.f32 %v6918_v63, %v1493_v13  ;;  %v5986_v16 = vpop.f32.mrb[53].mxu0  ;;  %v2054_v18 = vadd.f32 %v6918_v63, %v2053_v14  ;;  %v6266_v19 = vpop.f32.mrb[53].mxu1 }
 0x163   : > { %v1496_v21 = vpop.f32.mrb[54].mxu0  ;;  %v2056_v22 = vpop.f32.mrb[54].mxu1 }
 0x164   : > { %v1497_v23 = vadd.f32 %v6918_v63, %v1496_v21  ;;  %v5987_v24 = vpop.f32.mrb[55].mxu0  ;;  %v2666_v25 = vmax.f32 %v2054_v18, 0.0  ;;  %v2057_v26 = vadd.f32 %v6918_v63, %v2056_v22  ;;  %v6267_v27 = vpop.f32.mrb[55].mxu1  ;;  %v2526_v28 = vmax.f32 %v1494_v15, 0.0  ;;  %v6609_v15 = vld [vmem:[%s6730_s23 + $0x158] sm:$0xff]   ;;  %v6610_v18 = vld [vmem:[%s6730_s23 + $0x388] sm:$0xff]  }
 0x166   : > { %v2527_v29 = vmax.f32 %v1497_v23, 0.0  ;;  %6093 = vmatmul.mubr.bf16.gmra.mrb[160].mxu0 %v6603_v17  ;;  %v2667_v30 = vmax.f32 %v2057_v26, 0.0  ;;  %6373 = vmatmul.mubr.bf16.gmra.mrb[160].mxu1 %v6604_v20 }
 0x167   : > { %6096 = vmatprep.mubr.msk.bf16.mxu0 %vm6674_vm0, %v6673_v1  ;;  %6376 = vmatprep.mubr.msk.bf16.mxu1 %vm6674_vm0, %v6673_v1 }
 0x168   : > { %v5004_v31 = vpack.c.bf16 %v2527_v29, %v2526_v28  ;;  %v5354_v32 = vpack.c.bf16 %v2667_v30, %v2666_v25 }
 0x169   : > { %v1501_v33 = vpop.f32.mrb[56].mxu0  ;;  %v2061_v34 = vpop.f32.mrb[56].mxu1 }
 0x16a   : > { %5643 = vst [vmem:[%s6935_s11 + $0x68] sm:$0xff] %v5004_v31   ;;  %5713 = vst [vmem:[%s6935_s11 + $0x298] sm:$0xff] %v5354_v32   ;;  %v1502_v35 = vadd.f32 %v6918_v63, %v1501_v33  ;;  %v5990_v36 = vpop.f32.mrb[57].mxu0  ;;  %v2062_v38 = vadd.f32 %v6918_v63, %v2061_v34  ;;  %v6270_v39 = vpop.f32.mrb[57].mxu1 }
 0x16b   : > { %v1504_v41 = vpop.f32.mrb[58].mxu0  ;;  %v2064_v42 = vpop.f32.mrb[58].mxu1 }
 0x16c   : > { %v1505_v43 = vadd.f32 %v6918_v63, %v1504_v41  ;;  %v5991_v44 = vpop.f32.mrb[59].mxu0  ;;  %v2668_v45 = vmax.f32 %v2062_v38, 0.0  ;;  %v2065_v46 = vadd.f32 %v6918_v63, %v2064_v42  ;;  %v6271_v47 = vpop.f32.mrb[59].mxu1  ;;  %v2528_v48 = vmax.f32 %v1502_v35, 0.0  ;;  %v6611_v35 = vld [vmem:[%s6730_s23 + $0x160] sm:$0xff]   ;;  %v6612_v38 = vld [vmem:[%s6730_s23 + $0x390] sm:$0xff]  }
 0x16e   : > { %v2529_v49 = vmax.f32 %v1505_v43, 0.0  ;;  %6097 = vmatmul.mubr.bf16.gmra.mrb[164].mxu0 %v6605_v37  ;;  %v2669_v50 = vmax.f32 %v2065_v46, 0.0  ;;  %6377 = vmatmul.mubr.bf16.gmra.mrb[164].mxu1 %v6606_v40 }
 0x16f   : > { %6100 = vmatprep.mubr.msk.bf16.mxu0 %vm6674_vm0, %v6673_v1  ;;  %6380 = vmatprep.mubr.msk.bf16.mxu1 %vm6674_vm0, %v6673_v1 }
 0x170   : > { %v5009_v51 = vpack.c.bf16 %v2529_v49, %v2528_v48  ;;  %v5359_v52 = vpack.c.bf16 %v2669_v50, %v2668_v45 }
 0x171   : > { %v1509_v53 = vpop.f32.mrb[60].mxu0  ;;  %v2069_v54 = vpop.f32.mrb[60].mxu1 }
 0x172   : > { %5644 = vst [vmem:[%s6935_s11 + $0x70] sm:$0xff] %v5009_v51   ;;  %5714 = vst [vmem:[%s6935_s11 + $0x2a0] sm:$0xff] %v5359_v52   ;;  %v1510_v55 = vadd.f32 %v6918_v63, %v1509_v53  ;;  %v5994_v56 = vpop.f32.mrb[61].mxu0  ;;  %v2070_v58 = vadd.f32 %v6918_v63, %v2069_v54  ;;  %v6274_v59 = vpop.f32.mrb[61].mxu1 }
 0x173   : > { %v1512_v61 = vpop.f32.mrb[62].mxu0  ;;  %v2072_v62 = vpop.f32.mrb[62].mxu1 }
 0x174   : > { %v1513_v0 = vadd.f32 %v6918_v63, %v1512_v61  ;;  %v5995_v2 = vpop.f32.mrb[63].mxu0  ;;  %v2670_v3 = vmax.f32 %v2070_v58, 0.0  ;;  %v2073_v4 = vadd.f32 %v6918_v63, %v2072_v62  ;;  %v6275_v5 = vpop.f32.mrb[63].mxu1  ;;  %v2530_v6 = vmax.f32 %v1510_v55, 0.0  ;;  %v6613_v55 = vld [vmem:[%s6730_s23 + $0x168] sm:$0xff]   ;;  %v6614_v58 = vld [vmem:[%s6730_s23 + $0x398] sm:$0xff]  }
 0x176   : > { %v2531_v7 = vmax.f32 %v1513_v0, 0.0  ;;  %6101 = vmatmul.mubr.bf16.gmra.mrb[168].mxu0 %v6607_v57  ;;  %v2671_v8 = vmax.f32 %v2073_v4, 0.0  ;;  %6381 = vmatmul.mubr.bf16.gmra.mrb[168].mxu1 %v6608_v60 }
 0x177   : > { %6104 = vmatprep.mubr.msk.bf16.mxu0 %vm6674_vm0, %v6673_v1  ;;  %6384 = vmatprep.mubr.msk.bf16.mxu1 %vm6674_vm0, %v6673_v1 }
 0x178   : > { %v5014_v9 = vpack.c.bf16 %v2531_v7, %v2530_v6  ;;  %v5364_v10 = vpack.c.bf16 %v2671_v8, %v2670_v3 }
 0x179   : > { %v1517_v11 = vpop.f32.mrb[64].mxu0  ;;  %v2077_v12 = vpop.f32.mrb[64].mxu1 }
 0x17a   : > { %5645 = vst [vmem:[%s6935_s11 + $0x78] sm:$0xff] %v5014_v9   ;;  %5715 = vst [vmem:[%s6935_s11 + $0x2a8] sm:$0xff] %v5364_v10   ;;  %v1518_v13 = vadd.f32 %v6918_v63, %v1517_v11  ;;  %v5998_v14 = vpop.f32.mrb[65].mxu0  ;;  %v2078_v16 = vadd.f32 %v6918_v63, %v2077_v12  ;;  %v6278_v17 = vpop.f32.mrb[65].mxu1 }
 0x17b   : > { %v1520_v19 = vpop.f32.mrb[66].mxu0  ;;  %v2080_v20 = vpop.f32.mrb[66].mxu1 }
 0x17c   : > { %v1521_v21 = vadd.f32 %v6918_v63, %v1520_v19  ;;  %v5999_v22 = vpop.f32.mrb[67].mxu0  ;;  %v2672_v23 = vmax.f32 %v2078_v16, 0.0  ;;  %v2081_v24 = vadd.f32 %v6918_v63, %v2080_v20  ;;  %v6279_v25 = vpop.f32.mrb[67].mxu1  ;;  %v2532_v26 = vmax.f32 %v1518_v13, 0.0  ;;  %v6615_v13 = vld [vmem:[%s6730_s23 + $0x170] sm:$0xff]   ;;  %v6616_v16 = vld [vmem:[%s6730_s23 + $0x3a0] sm:$0xff]  }
 0x17e   : > { %v2533_v27 = vmax.f32 %v1521_v21, 0.0  ;;  %6105 = vmatmul.mubr.bf16.gmra.mrb[172].mxu0 %v6609_v15  ;;  %v2673_v28 = vmax.f32 %v2081_v24, 0.0  ;;  %6385 = vmatmul.mubr.bf16.gmra.mrb[172].mxu1 %v6610_v18 }
 0x17f   : > { %6108 = vmatprep.mubr.msk.bf16.mxu0 %vm6674_vm0, %v6673_v1  ;;  %6388 = vmatprep.mubr.msk.bf16.mxu1 %vm6674_vm0, %v6673_v1 }
 0x180   : > { %v5019_v29 = vpack.c.bf16 %v2533_v27, %v2532_v26  ;;  %v5369_v30 = vpack.c.bf16 %v2673_v28, %v2672_v23 }
 0x181   : > { %v1525_v31 = vpop.f32.mrb[68].mxu0  ;;  %v2085_v32 = vpop.f32.mrb[68].mxu1 }
 0x182   : > { %5646 = vst [vmem:[%s6935_s11 + $0x80] sm:$0xff] %v5019_v29   ;;  %5716 = vst [vmem:[%s6935_s11 + $0x2b0] sm:$0xff] %v5369_v30   ;;  %v1526_v33 = vadd.f32 %v6918_v63, %v1525_v31  ;;  %v6002_v34 = vpop.f32.mrb[69].mxu0  ;;  %v2086_v36 = vadd.f32 %v6918_v63, %v2085_v32  ;;  %v6282_v37 = vpop.f32.mrb[69].mxu1 }
 0x183   : > { %v1528_v39 = vpop.f32.mrb[70].mxu0  ;;  %v2088_v40 = vpop.f32.mrb[70].mxu1 }
 0x184   : > { %v1529_v41 = vadd.f32 %v6918_v63, %v1528_v39  ;;  %v6003_v42 = vpop.f32.mrb[71].mxu0  ;;  %v2674_v43 = vmax.f32 %v2086_v36, 0.0  ;;  %v2089_v44 = vadd.f32 %v6918_v63, %v2088_v40  ;;  %v6283_v45 = vpop.f32.mrb[71].mxu1  ;;  %v2534_v46 = vmax.f32 %v1526_v33, 0.0  ;;  %v6617_v33 = vld [vmem:[%s6730_s23 + $0x178] sm:$0xff]   ;;  %v6618_v36 = vld [vmem:[%s6730_s23 + $0x3a8] sm:$0xff]  }
 0x186   : > { %v2535_v47 = vmax.f32 %v1529_v41, 0.0  ;;  %6109 = vmatmul.mubr.bf16.gmra.mrb[176].mxu0 %v6611_v35  ;;  %v2675_v48 = vmax.f32 %v2089_v44, 0.0  ;;  %6389 = vmatmul.mubr.bf16.gmra.mrb[176].mxu1 %v6612_v38 }
 0x187   : > { %6112 = vmatprep.mubr.msk.bf16.mxu0 %vm6674_vm0, %v6673_v1  ;;  %6392 = vmatprep.mubr.msk.bf16.mxu1 %vm6674_vm0, %v6673_v1 }
 0x188   : > { %v5024_v49 = vpack.c.bf16 %v2535_v47, %v2534_v46  ;;  %v5374_v50 = vpack.c.bf16 %v2675_v48, %v2674_v43 }
 0x189   : > { %v1533_v51 = vpop.f32.mrb[72].mxu0  ;;  %v2093_v52 = vpop.f32.mrb[72].mxu1 }
 0x18a   : > { %5647 = vst [vmem:[%s6935_s11 + $0x88] sm:$0xff] %v5024_v49   ;;  %5717 = vst [vmem:[%s6935_s11 + $0x2b8] sm:$0xff] %v5374_v50   ;;  %v1534_v53 = vadd.f32 %v6918_v63, %v1533_v51  ;;  %v6006_v54 = vpop.f32.mrb[73].mxu0  ;;  %v2094_v56 = vadd.f32 %v6918_v63, %v2093_v52  ;;  %v6286_v57 = vpop.f32.mrb[73].mxu1 }
 0x18b   : > { %v1536_v59 = vpop.f32.mrb[74].mxu0  ;;  %v2096_v60 = vpop.f32.mrb[74].mxu1 }
 0x18c   : > { %v1537_v61 = vadd.f32 %v6918_v63, %v1536_v59  ;;  %v6007_v62 = vpop.f32.mrb[75].mxu0  ;;  %v2676_v0 = vmax.f32 %v2094_v56, 0.0  ;;  %v2097_v2 = vadd.f32 %v6918_v63, %v2096_v60  ;;  %v6287_v3 = vpop.f32.mrb[75].mxu1  ;;  %v2536_v4 = vmax.f32 %v1534_v53, 0.0  ;;  %v6619_v53 = vld [vmem:[%s6730_s23 + $0x180] sm:$0xff]   ;;  %v6620_v56 = vld [vmem:[%s6730_s23 + $0x3b0] sm:$0xff]  }
 0x18e   : > { %v2537_v5 = vmax.f32 %v1537_v61, 0.0  ;;  %6113 = vmatmul.mubr.bf16.gmra.mrb[180].mxu0 %v6613_v55  ;;  %v2677_v6 = vmax.f32 %v2097_v2, 0.0  ;;  %6393 = vmatmul.mubr.bf16.gmra.mrb[180].mxu1 %v6614_v58 }
 0x18f   : > { %6116 = vmatprep.mubr.msk.bf16.mxu0 %vm6674_vm0, %v6673_v1  ;;  %6396 = vmatprep.mubr.msk.bf16.mxu1 %vm6674_vm0, %v6673_v1 }
 0x190   : > { %v5029_v7 = vpack.c.bf16 %v2537_v5, %v2536_v4  ;;  %v5379_v8 = vpack.c.bf16 %v2677_v6, %v2676_v0 }
 0x191   : > { %v1541_v9 = vpop.f32.mrb[76].mxu0  ;;  %v2101_v10 = vpop.f32.mrb[76].mxu1 }
 0x192   : > { %5648 = vst [vmem:[%s6935_s11 + $0x90] sm:$0xff] %v5029_v7   ;;  %5718 = vst [vmem:[%s6935_s11 + $0x2c0] sm:$0xff] %v5379_v8   ;;  %v1542_v11 = vadd.f32 %v6918_v63, %v1541_v9  ;;  %v6010_v12 = vpop.f32.mrb[77].mxu0  ;;  %v2102_v14 = vadd.f32 %v6918_v63, %v2101_v10  ;;  %v6290_v15 = vpop.f32.mrb[77].mxu1 }
 0x193   : > { %v1544_v17 = vpop.f32.mrb[78].mxu0  ;;  %v2104_v18 = vpop.f32.mrb[78].mxu1 }
 0x194   : > { %v1545_v19 = vadd.f32 %v6918_v63, %v1544_v17  ;;  %v6011_v20 = vpop.f32.mrb[79].mxu0  ;;  %v2678_v21 = vmax.f32 %v2102_v14, 0.0  ;;  %v2105_v22 = vadd.f32 %v6918_v63, %v2104_v18  ;;  %v6291_v23 = vpop.f32.mrb[79].mxu1  ;;  %v2538_v24 = vmax.f32 %v1542_v11, 0.0  ;;  %v7174_v63 = vld [vmem:[%s7619_s2] ss:$0 sm:$0xff] }
 0x195   : > { %v6621_v11 = vld [vmem:[%s6730_s23 + $0x188] sm:$0xff]   ;;  %v6622_v14 = vld [vmem:[%s6730_s23 + $0x3b8] sm:$0xff]  }
 0x196   : > { %v2539_v25 = vmax.f32 %v1545_v19, 0.0  ;;  %6117 = vmatmul.mubr.bf16.gmra.mrb[184].mxu0 %v6615_v13  ;;  %v2679_v26 = vmax.f32 %v2105_v22, 0.0  ;;  %6397 = vmatmul.mubr.bf16.gmra.mrb[184].mxu1 %v6616_v16 }
 0x197   : > { %6120 = vmatprep.mubr.msk.bf16.mxu0 %vm6674_vm0, %v6673_v1  ;;  %6400 = vmatprep.mubr.msk.bf16.mxu1 %vm6674_vm0, %v6673_v1 }
 0x198   : > { %v5034_v27 = vpack.c.bf16 %v2539_v25, %v2538_v24  ;;  %v5384_v28 = vpack.c.bf16 %v2679_v26, %v2678_v21 }
 0x199   : > { %v1549_v29 = vpop.f32.mrb[80].mxu0  ;;  %v2109_v30 = vpop.f32.mrb[80].mxu1 }
 0x19a   : > { %5649 = vst [vmem:[%s6935_s11 + $0x98] sm:$0xff] %v5034_v27   ;;  %5719 = vst [vmem:[%s6935_s11 + $0x2c8] sm:$0xff] %v5384_v28   ;;  %v1550_v31 = vadd.f32 %v7174_v63, %v1549_v29  ;;  %v6014_v32 = vpop.f32.mrb[81].mxu0  ;;  %v2110_v34 = vadd.f32 %v7174_v63, %v2109_v30  ;;  %v6294_v35 = vpop.f32.mrb[81].mxu1 }
 0x19b   : > { %v1552_v37 = vpop.f32.mrb[82].mxu0  ;;  %v2112_v38 = vpop.f32.mrb[82].mxu1 }
 0x19c   : > { %v1553_v39 = vadd.f32 %v7174_v63, %v1552_v37  ;;  %v6015_v40 = vpop.f32.mrb[83].mxu0  ;;  %v2680_v41 = vmax.f32 %v2110_v34, 0.0  ;;  %v2113_v42 = vadd.f32 %v7174_v63, %v2112_v38  ;;  %v6295_v43 = vpop.f32.mrb[83].mxu1  ;;  %v2540_v44 = vmax.f32 %v1550_v31, 0.0  ;;  %v6623_v31 = vld [vmem:[%s6730_s23 + $0x190] sm:$0xff]   ;;  %v6624_v34 = vld [vmem:[%s6730_s23 + $0x3c0] sm:$0xff]  }
 0x19e   : > { %v2541_v45 = vmax.f32 %v1553_v39, 0.0  ;;  %6121 = vmatmul.mubr.bf16.gmra.mrb[188].mxu0 %v6617_v33  ;;  %v2681_v46 = vmax.f32 %v2113_v42, 0.0  ;;  %6401 = vmatmul.mubr.bf16.gmra.mrb[188].mxu1 %v6618_v36 }
 0x19f   : > { %6124 = vmatprep.mubr.msk.bf16.mxu0 %vm6674_vm0, %v6673_v1  ;;  %6404 = vmatprep.mubr.msk.bf16.mxu1 %vm6674_vm0, %v6673_v1 }
 0x1a0   : > { %v5039_v47 = vpack.c.bf16 %v2541_v45, %v2540_v44  ;;  %v5389_v48 = vpack.c.bf16 %v2681_v46, %v2680_v41 }
 0x1a1   : > { %v1557_v49 = vpop.f32.mrb[84].mxu0  ;;  %v2117_v50 = vpop.f32.mrb[84].mxu1 }
 0x1a2   : > { %5650 = vst [vmem:[%s6935_s11 + $0xa0] sm:$0xff] %v5039_v47   ;;  %5720 = vst [vmem:[%s6935_s11 + $0x2d0] sm:$0xff] %v5389_v48   ;;  %v1558_v51 = vadd.f32 %v7174_v63, %v1557_v49  ;;  %v6018_v52 = vpop.f32.mrb[85].mxu0  ;;  %v2118_v54 = vadd.f32 %v7174_v63, %v2117_v50  ;;  %v6298_v55 = vpop.f32.mrb[85].mxu1 }
 0x1a3   : > { %v1560_v57 = vpop.f32.mrb[86].mxu0  ;;  %v2120_v58 = vpop.f32.mrb[86].mxu1 }
 0x1a4   : > { %v1561_v59 = vadd.f32 %v7174_v63, %v1560_v57  ;;  %v6019_v60 = vpop.f32.mrb[87].mxu0  ;;  %v2682_v61 = vmax.f32 %v2118_v54, 0.0  ;;  %v2121_v62 = vadd.f32 %v7174_v63, %v2120_v58  ;;  %v6299_v0 = vpop.f32.mrb[87].mxu1  ;;  %v2542_v2 = vmax.f32 %v1558_v51, 0.0  ;;  %v6625_v51 = vld [vmem:[%s6730_s23 + $0x198] sm:$0xff]   ;;  %v6626_v54 = vld [vmem:[%s6730_s23 + $0x3c8] sm:$0xff]  }
 0x1a6   : > { %v2543_v3 = vmax.f32 %v1561_v59, 0.0  ;;  %6125 = vmatmul.mubr.bf16.gmra.mrb[192].mxu0 %v6619_v53  ;;  %v2683_v4 = vmax.f32 %v2121_v62, 0.0  ;;  %6405 = vmatmul.mubr.bf16.gmra.mrb[192].mxu1 %v6620_v56 }
 0x1a7   : > { %6128 = vmatprep.mubr.msk.bf16.mxu0 %vm6674_vm0, %v6673_v1  ;;  %6408 = vmatprep.mubr.msk.bf16.mxu1 %vm6674_vm0, %v6673_v1 }
 0x1a8   : > { %v5044_v5 = vpack.c.bf16 %v2543_v3, %v2542_v2  ;;  %v5394_v6 = vpack.c.bf16 %v2683_v4, %v2682_v61 }
 0x1a9   : > { %v1565_v7 = vpop.f32.mrb[88].mxu0  ;;  %v2125_v8 = vpop.f32.mrb[88].mxu1 }
 0x1aa   : > { %5651 = vst [vmem:[%s6935_s11 + $0xa8] sm:$0xff] %v5044_v5   ;;  %5721 = vst [vmem:[%s6935_s11 + $0x2d8] sm:$0xff] %v5394_v6   ;;  %v1566_v9 = vadd.f32 %v7174_v63, %v1565_v7  ;;  %v6022_v10 = vpop.f32.mrb[89].mxu0  ;;  %v2126_v12 = vadd.f32 %v7174_v63, %v2125_v8  ;;  %v6302_v13 = vpop.f32.mrb[89].mxu1 }
 0x1ab   : > { %v1568_v15 = vpop.f32.mrb[90].mxu0  ;;  %v2128_v16 = vpop.f32.mrb[90].mxu1 }
 0x1ac   : > { %v1569_v17 = vadd.f32 %v7174_v63, %v1568_v15  ;;  %v6023_v18 = vpop.f32.mrb[91].mxu0  ;;  %v2684_v19 = vmax.f32 %v2126_v12, 0.0  ;;  %v2129_v20 = vadd.f32 %v7174_v63, %v2128_v16  ;;  %v6303_v21 = vpop.f32.mrb[91].mxu1  ;;  %v2544_v22 = vmax.f32 %v1566_v9, 0.0  ;;  %v6627_v9 = vld [vmem:[%s6730_s23 + $0x1a0] sm:$0xff]   ;;  %v6628_v12 = vld [vmem:[%s6730_s23 + $0x3d0] sm:$0xff]  }
 0x1ae   : > { %v2545_v23 = vmax.f32 %v1569_v17, 0.0  ;;  %6129 = vmatmul.mubr.bf16.gmra.mrb[196].mxu0 %v6621_v11  ;;  %v2685_v24 = vmax.f32 %v2129_v20, 0.0  ;;  %6409 = vmatmul.mubr.bf16.gmra.mrb[196].mxu1 %v6622_v14 }
 0x1af   : > { %6132 = vmatprep.mubr.msk.bf16.mxu0 %vm6674_vm0, %v6673_v1  ;;  %6412 = vmatprep.mubr.msk.bf16.mxu1 %vm6674_vm0, %v6673_v1 }
 0x1b0   : > { %v5049_v25 = vpack.c.bf16 %v2545_v23, %v2544_v22  ;;  %v5399_v26 = vpack.c.bf16 %v2685_v24, %v2684_v19 }
 0x1b1   : > { %v1573_v27 = vpop.f32.mrb[92].mxu0  ;;  %v2133_v28 = vpop.f32.mrb[92].mxu1 }
 0x1b2   : > { %5652 = vst [vmem:[%s6935_s11 + $0xb0] sm:$0xff] %v5049_v25   ;;  %5722 = vst [vmem:[%s6935_s11 + $0x2e0] sm:$0xff] %v5399_v26   ;;  %v1574_v29 = vadd.f32 %v7174_v63, %v1573_v27  ;;  %v6026_v30 = vpop.f32.mrb[93].mxu0  ;;  %v2134_v32 = vadd.f32 %v7174_v63, %v2133_v28  ;;  %v6306_v33 = vpop.f32.mrb[93].mxu1 }
 0x1b3   : > { %v1576_v35 = vpop.f32.mrb[94].mxu0  ;;  %v2136_v36 = vpop.f32.mrb[94].mxu1 }
 0x1b4   : > { %v1577_v37 = vadd.f32 %v7174_v63, %v1576_v35  ;;  %v6027_v38 = vpop.f32.mrb[95].mxu0  ;;  %v2686_v39 = vmax.f32 %v2134_v32, 0.0  ;;  %v2137_v40 = vadd.f32 %v7174_v63, %v2136_v36  ;;  %v6307_v41 = vpop.f32.mrb[95].mxu1  ;;  %v2546_v42 = vmax.f32 %v1574_v29, 0.0  ;;  %v6629_v29 = vld [vmem:[%s6730_s23 + $0x1a8] sm:$0xff]   ;;  %v6630_v32 = vld [vmem:[%s6730_s23 + $0x3d8] sm:$0xff]  }
 0x1b6   : > { %v2547_v43 = vmax.f32 %v1577_v37, 0.0  ;;  %6133 = vmatmul.mubr.bf16.gmra.mrb[200].mxu0 %v6623_v31  ;;  %v2687_v44 = vmax.f32 %v2137_v40, 0.0  ;;  %6413 = vmatmul.mubr.bf16.gmra.mrb[200].mxu1 %v6624_v34 }
 0x1b7   : > { %6136 = vmatprep.mubr.msk.bf16.mxu0 %vm6674_vm0, %v6673_v1  ;;  %6416 = vmatprep.mubr.msk.bf16.mxu1 %vm6674_vm0, %v6673_v1 }
 0x1b8   : > { %v5054_v45 = vpack.c.bf16 %v2547_v43, %v2546_v42  ;;  %v5404_v46 = vpack.c.bf16 %v2687_v44, %v2686_v39 }
 0x1b9   : > { %v1581_v47 = vpop.f32.mrb[96].mxu0  ;;  %v2141_v48 = vpop.f32.mrb[96].mxu1 }
 0x1ba   : > { %5653 = vst [vmem:[%s6935_s11 + $0xb8] sm:$0xff] %v5054_v45   ;;  %5723 = vst [vmem:[%s6935_s11 + $0x2e8] sm:$0xff] %v5404_v46   ;;  %v1582_v49 = vadd.f32 %v7174_v63, %v1581_v47  ;;  %v6030_v50 = vpop.f32.mrb[97].mxu0  ;;  %v2142_v52 = vadd.f32 %v7174_v63, %v2141_v48  ;;  %v6310_v53 = vpop.f32.mrb[97].mxu1 }
 0x1bb   : > { %v1584_v55 = vpop.f32.mrb[98].mxu0  ;;  %v2144_v56 = vpop.f32.mrb[98].mxu1 }
 0x1bc   : > { %v1585_v57 = vadd.f32 %v7174_v63, %v1584_v55  ;;  %v6031_v58 = vpop.f32.mrb[99].mxu0  ;;  %v2688_v59 = vmax.f32 %v2142_v52, 0.0  ;;  %v2145_v60 = vadd.f32 %v7174_v63, %v2144_v56  ;;  %v6311_v61 = vpop.f32.mrb[99].mxu1  ;;  %v2548_v62 = vmax.f32 %v1582_v49, 0.0  ;;  %v6631_v49 = vld [vmem:[%s6730_s23 + $0x1b0] sm:$0xff]   ;;  %v6632_v52 = vld [vmem:[%s6730_s23 + $0x3e0] sm:$0xff]  }
 0x1be   : > { %v2549_v0 = vmax.f32 %v1585_v57, 0.0  ;;  %6137 = vmatmul.mubr.bf16.gmra.mrb[204].mxu0 %v6625_v51  ;;  %v2689_v2 = vmax.f32 %v2145_v60, 0.0  ;;  %6417 = vmatmul.mubr.bf16.gmra.mrb[204].mxu1 %v6626_v54 }
 0x1bf   : > { %6140 = vmatprep.mubr.msk.bf16.mxu0 %vm6674_vm0, %v6673_v1  ;;  %6420 = vmatprep.mubr.msk.bf16.mxu1 %vm6674_vm0, %v6673_v1 }
 0x1c0   : > { %v5059_v3 = vpack.c.bf16 %v2549_v0, %v2548_v62  ;;  %v5409_v4 = vpack.c.bf16 %v2689_v2, %v2688_v59 }
 0x1c1   : > { %v1589_v5 = vpop.f32.mrb[100].mxu0  ;;  %v2149_v6 = vpop.f32.mrb[100].mxu1 }
 0x1c2   : > { %5654 = vst [vmem:[%s6935_s11 + $0xc0] sm:$0xff] %v5059_v3   ;;  %5724 = vst [vmem:[%s6935_s11 + $0x2f0] sm:$0xff] %v5409_v4   ;;  %v1590_v7 = vadd.f32 %v7174_v63, %v1589_v5  ;;  %v6034_v8 = vpop.f32.mrb[101].mxu0  ;;  %v2150_v10 = vadd.f32 %v7174_v63, %v2149_v6  ;;  %v6314_v11 = vpop.f32.mrb[101].mxu1 }
 0x1c3   : > { %v1592_v13 = vpop.f32.mrb[102].mxu0  ;;  %v2152_v14 = vpop.f32.mrb[102].mxu1 }
 0x1c4   : > { %v1593_v15 = vadd.f32 %v7174_v63, %v1592_v13  ;;  %v6035_v16 = vpop.f32.mrb[103].mxu0  ;;  %v2690_v17 = vmax.f32 %v2150_v10, 0.0  ;;  %v2153_v18 = vadd.f32 %v7174_v63, %v2152_v14  ;;  %v6315_v19 = vpop.f32.mrb[103].mxu1  ;;  %v2550_v20 = vmax.f32 %v1590_v7, 0.0  ;;  %v6633_v7 = vld [vmem:[%s6730_s23 + $0x1b8] sm:$0xff]   ;;  %v6634_v10 = vld [vmem:[%s6730_s23 + $0x3e8] sm:$0xff]  }
 0x1c6   : > { %v2551_v21 = vmax.f32 %v1593_v15, 0.0  ;;  %6141 = vmatmul.mubr.bf16.gmra.mrb[208].mxu0 %v6627_v9  ;;  %v2691_v22 = vmax.f32 %v2153_v18, 0.0  ;;  %6421 = vmatmul.mubr.bf16.gmra.mrb[208].mxu1 %v6628_v12 }
 0x1c7   : > { %6144 = vmatprep.mubr.msk.bf16.mxu0 %vm6674_vm0, %v6673_v1  ;;  %6424 = vmatprep.mubr.msk.bf16.mxu1 %vm6674_vm0, %v6673_v1 }
 0x1c8   : > { %v5064_v23 = vpack.c.bf16 %v2551_v21, %v2550_v20  ;;  %v5414_v24 = vpack.c.bf16 %v2691_v22, %v2690_v17 }
 0x1c9   : > { %v1597_v25 = vpop.f32.mrb[104].mxu0  ;;  %v2157_v26 = vpop.f32.mrb[104].mxu1 }
 0x1ca   : > { %5655 = vst [vmem:[%s6935_s11 + $0xc8] sm:$0xff] %v5064_v23   ;;  %5725 = vst [vmem:[%s6935_s11 + $0x2f8] sm:$0xff] %v5414_v24   ;;  %v1598_v27 = vadd.f32 %v7174_v63, %v1597_v25  ;;  %v6038_v28 = vpop.f32.mrb[105].mxu0  ;;  %v2158_v30 = vadd.f32 %v7174_v63, %v2157_v26  ;;  %v6318_v31 = vpop.f32.mrb[105].mxu1 }
 0x1cb   : > { %v1600_v33 = vpop.f32.mrb[106].mxu0  ;;  %v2160_v34 = vpop.f32.mrb[106].mxu1 }
 0x1cc   : > { %v1601_v35 = vadd.f32 %v7174_v63, %v1600_v33  ;;  %v6039_v36 = vpop.f32.mrb[107].mxu0  ;;  %v2692_v37 = vmax.f32 %v2158_v30, 0.0  ;;  %v2161_v38 = vadd.f32 %v7174_v63, %v2160_v34  ;;  %v6319_v39 = vpop.f32.mrb[107].mxu1  ;;  %v2552_v40 = vmax.f32 %v1598_v27, 0.0  ;;  %v6635_v27 = vld [vmem:[%s6730_s23 + $0x1c0] sm:$0xff]   ;;  %v6636_v30 = vld [vmem:[%s6730_s23 + $0x3f0] sm:$0xff]  }
 0x1ce   : > { %v2553_v41 = vmax.f32 %v1601_v35, 0.0  ;;  %6145 = vmatmul.mubr.bf16.gmra.mrb[212].mxu0 %v6629_v29  ;;  %v2693_v42 = vmax.f32 %v2161_v38, 0.0  ;;  %6425 = vmatmul.mubr.bf16.gmra.mrb[212].mxu1 %v6630_v32 }
 0x1cf   : > { %6148 = vmatprep.mubr.msk.bf16.mxu0 %vm6674_vm0, %v6673_v1  ;;  %6428 = vmatprep.mubr.msk.bf16.mxu1 %vm6674_vm0, %v6673_v1 }
 0x1d0   : > { %v5069_v43 = vpack.c.bf16 %v2553_v41, %v2552_v40  ;;  %v5419_v44 = vpack.c.bf16 %v2693_v42, %v2692_v37 }
 0x1d1   : > { %v1605_v45 = vpop.f32.mrb[108].mxu0  ;;  %v2165_v46 = vpop.f32.mrb[108].mxu1 }
 0x1d2   : > { %5656 = vst [vmem:[%s6935_s11 + $0xd0] sm:$0xff] %v5069_v43   ;;  %5726 = vst [vmem:[%s6935_s11 + $0x300] sm:$0xff] %v5419_v44   ;;  %v1606_v47 = vadd.f32 %v7174_v63, %v1605_v45  ;;  %v6042_v48 = vpop.f32.mrb[109].mxu0  ;;  %v2166_v50 = vadd.f32 %v7174_v63, %v2165_v46  ;;  %v6322_v51 = vpop.f32.mrb[109].mxu1 }
 0x1d3   : > { %v1608_v53 = vpop.f32.mrb[110].mxu0  ;;  %v2168_v54 = vpop.f32.mrb[110].mxu1 }
 0x1d4   : > { %v1609_v55 = vadd.f32 %v7174_v63, %v1608_v53  ;;  %v6043_v56 = vpop.f32.mrb[111].mxu0  ;;  %v2694_v57 = vmax.f32 %v2166_v50, 0.0  ;;  %v2169_v58 = vadd.f32 %v7174_v63, %v2168_v54  ;;  %v6323_v59 = vpop.f32.mrb[111].mxu1  ;;  %v2554_v60 = vmax.f32 %v1606_v47, 0.0  ;;  %v6637_v47 = vld [vmem:[%s6730_s23 + $0x1c8] sm:$0xff]   ;;  %v6638_v50 = vld [vmem:[%s6730_s23 + $0x3f8] sm:$0xff]  }
 0x1d6   : > { %v2555_v61 = vmax.f32 %v1609_v55, 0.0  ;;  %6149 = vmatmul.mubr.bf16.gmra.mrb[216].mxu0 %v6631_v49  ;;  %v2695_v62 = vmax.f32 %v2169_v58, 0.0  ;;  %6429 = vmatmul.mubr.bf16.gmra.mrb[216].mxu1 %v6632_v52 }
 0x1d7   : > { %6152 = vmatprep.mubr.msk.bf16.mxu0 %vm6674_vm0, %v6673_v1  ;;  %6432 = vmatprep.mubr.msk.bf16.mxu1 %vm6674_vm0, %v6673_v1 }
 0x1d8   : > { %v5074_v0 = vpack.c.bf16 %v2555_v61, %v2554_v60  ;;  %v5424_v2 = vpack.c.bf16 %v2695_v62, %v2694_v57 }
 0x1d9   : > { %v1613_v3 = vpop.f32.mrb[112].mxu0  ;;  %v2173_v4 = vpop.f32.mrb[112].mxu1 }
 0x1da   : > { %5657 = vst [vmem:[%s6935_s11 + $0xd8] sm:$0xff] %v5074_v0   ;;  %5727 = vst [vmem:[%s6935_s11 + $0x308] sm:$0xff] %v5424_v2   ;;  %v1614_v5 = vadd.f32 %v7174_v63, %v1613_v3  ;;  %v6046_v6 = vpop.f32.mrb[113].mxu0  ;;  %v2174_v8 = vadd.f32 %v7174_v63, %v2173_v4  ;;  %v6326_v9 = vpop.f32.mrb[113].mxu1 }
 0x1db   : > { %v1616_v11 = vpop.f32.mrb[114].mxu0  ;;  %v2176_v12 = vpop.f32.mrb[114].mxu1 }
 0x1dc   : > { %v1617_v13 = vadd.f32 %v7174_v63, %v1616_v11  ;;  %v6047_v14 = vpop.f32.mrb[115].mxu0  ;;  %v2696_v15 = vmax.f32 %v2174_v8, 0.0  ;;  %v2177_v16 = vadd.f32 %v7174_v63, %v2176_v12  ;;  %v6327_v17 = vpop.f32.mrb[115].mxu1  ;;  %v2556_v18 = vmax.f32 %v1614_v5, 0.0  ;;  %v6639_v5 = vld [vmem:[%s6730_s23 + $0x1d0] sm:$0xff]   ;;  %v6640_v8 = vld [vmem:[%s6730_s23 + $0x400] sm:$0xff]  }
 0x1de   : > { %v2557_v19 = vmax.f32 %v1617_v13, 0.0  ;;  %6153 = vmatmul.mubr.bf16.gmra.mrb[220].mxu0 %v6633_v7  ;;  %v2697_v20 = vmax.f32 %v2177_v16, 0.0  ;;  %6433 = vmatmul.mubr.bf16.gmra.mrb[220].mxu1 %v6634_v10 }
 0x1df   : > { %6156 = vmatprep.mubr.msk.bf16.mxu0 %vm6674_vm0, %v6673_v1  ;;  %6436 = vmatprep.mubr.msk.bf16.mxu1 %vm6674_vm0, %v6673_v1 }
 0x1e0   : > { %v5079_v21 = vpack.c.bf16 %v2557_v19, %v2556_v18  ;;  %v5429_v22 = vpack.c.bf16 %v2697_v20, %v2696_v15 }
 0x1e1   : > { %v1621_v23 = vpop.f32.mrb[116].mxu0  ;;  %v2181_v24 = vpop.f32.mrb[116].mxu1 }
 0x1e2   : > { %5658 = vst [vmem:[%s6935_s11 + $0xe0] sm:$0xff] %v5079_v21   ;;  %5728 = vst [vmem:[%s6935_s11 + $0x310] sm:$0xff] %v5429_v22   ;;  %v1622_v25 = vadd.f32 %v7174_v63, %v1621_v23  ;;  %v6050_v26 = vpop.f32.mrb[117].mxu0  ;;  %v2182_v28 = vadd.f32 %v7174_v63, %v2181_v24  ;;  %v6330_v29 = vpop.f32.mrb[117].mxu1 }
 0x1e3   : > { %v1624_v31 = vpop.f32.mrb[118].mxu0  ;;  %v2184_v32 = vpop.f32.mrb[118].mxu1 }
 0x1e4   : > { %v1625_v33 = vadd.f32 %v7174_v63, %v1624_v31  ;;  %v6051_v34 = vpop.f32.mrb[119].mxu0  ;;  %v2698_v35 = vmax.f32 %v2182_v28, 0.0  ;;  %v2185_v36 = vadd.f32 %v7174_v63, %v2184_v32  ;;  %v6331_v37 = vpop.f32.mrb[119].mxu1  ;;  %v2558_v38 = vmax.f32 %v1622_v25, 0.0  ;;  %v6641_v25 = vld [vmem:[%s6730_s23 + $0x1d8] sm:$0xff]   ;;  %v6642_v28 = vld [vmem:[%s6730_s23 + $0x408] sm:$0xff]  }
 0x1e6   : > { %v2559_v39 = vmax.f32 %v1625_v33, 0.0  ;;  %6157 = vmatmul.mubr.bf16.gmra.mrb[224].mxu0 %v6635_v27  ;;  %v2699_v40 = vmax.f32 %v2185_v36, 0.0  ;;  %6437 = vmatmul.mubr.bf16.gmra.mrb[224].mxu1 %v6636_v30 }
 0x1e7   : > { %6160 = vmatprep.mubr.msk.bf16.mxu0 %vm6674_vm0, %v6673_v1  ;;  %6440 = vmatprep.mubr.msk.bf16.mxu1 %vm6674_vm0, %v6673_v1 }
 0x1e8   : > { %v5084_v41 = vpack.c.bf16 %v2559_v39, %v2558_v38  ;;  %v5434_v42 = vpack.c.bf16 %v2699_v40, %v2698_v35 }
 0x1e9   : > { %v1629_v43 = vpop.f32.mrb[120].mxu0  ;;  %v2189_v44 = vpop.f32.mrb[120].mxu1 }
 0x1ea   : > { %5659 = vst [vmem:[%s6935_s11 + $0xe8] sm:$0xff] %v5084_v41   ;;  %5729 = vst [vmem:[%s6935_s11 + $0x318] sm:$0xff] %v5434_v42   ;;  %v1630_v45 = vadd.f32 %v7174_v63, %v1629_v43  ;;  %v6054_v46 = vpop.f32.mrb[121].mxu0  ;;  %v2190_v48 = vadd.f32 %v7174_v63, %v2189_v44  ;;  %v6334_v49 = vpop.f32.mrb[121].mxu1 }
 0x1eb   : > { %v1632_v51 = vpop.f32.mrb[122].mxu0  ;;  %v2192_v52 = vpop.f32.mrb[122].mxu1 }
 0x1ec   : > { %v1633_v53 = vadd.f32 %v7174_v63, %v1632_v51  ;;  %v6055_v54 = vpop.f32.mrb[123].mxu0  ;;  %v2700_v55 = vmax.f32 %v2190_v48, 0.0  ;;  %v2193_v56 = vadd.f32 %v7174_v63, %v2192_v52  ;;  %v6335_v57 = vpop.f32.mrb[123].mxu1  ;;  %v2560_v58 = vmax.f32 %v1630_v45, 0.0  ;;  %v6643_v45 = vld [vmem:[%s6730_s23 + $0x1e0] sm:$0xff]   ;;  %v6644_v48 = vld [vmem:[%s6730_s23 + $0x410] sm:$0xff]  }
 0x1ee   : > { %v2561_v59 = vmax.f32 %v1633_v53, 0.0  ;;  %6161 = vmatmul.mubr.bf16.gmra.mrb[228].mxu0 %v6637_v47  ;;  %v2701_v60 = vmax.f32 %v2193_v56, 0.0  ;;  %6441 = vmatmul.mubr.bf16.gmra.mrb[228].mxu1 %v6638_v50 }
 0x1ef   : > { %6164 = vmatprep.mubr.msk.bf16.mxu0 %vm6674_vm0, %v6673_v1  ;;  %6444 = vmatprep.mubr.msk.bf16.mxu1 %vm6674_vm0, %v6673_v1 }
 0x1f0   : > { %v5089_v61 = vpack.c.bf16 %v2561_v59, %v2560_v58  ;;  %v5439_v62 = vpack.c.bf16 %v2701_v60, %v2700_v55 }
 0x1f1   : > { %v1637_v0 = vpop.f32.mrb[124].mxu0  ;;  %v2197_v2 = vpop.f32.mrb[124].mxu1 }
 0x1f2   : > { %5660 = vst [vmem:[%s6935_s11 + $0xf0] sm:$0xff] %v5089_v61   ;;  %5730 = vst [vmem:[%s6935_s11 + $0x320] sm:$0xff] %v5439_v62   ;;  %v1638_v3 = vadd.f32 %v7174_v63, %v1637_v0  ;;  %v6058_v4 = vpop.f32.mrb[125].mxu0  ;;  %v2198_v6 = vadd.f32 %v7174_v63, %v2197_v2  ;;  %v6338_v7 = vpop.f32.mrb[125].mxu1 }
 0x1f3   : > { %v1640_v9 = vpop.f32.mrb[126].mxu0  ;;  %v2200_v10 = vpop.f32.mrb[126].mxu1 }
 0x1f4   : > { %v1641_v11 = vadd.f32 %v7174_v63, %v1640_v9  ;;  %v6059_v12 = vpop.f32.mrb[127].mxu0  ;;  %v2702_v13 = vmax.f32 %v2198_v6, 0.0  ;;  %v2201_v14 = vadd.f32 %v7174_v63, %v2200_v10  ;;  %v6339_v15 = vpop.f32.mrb[127].mxu1  ;;  %v2562_v16 = vmax.f32 %v1638_v3, 0.0  ;;  %v6645_v3 = vld [vmem:[%s6730_s23 + $0x1e8] sm:$0xff]   ;;  %v6646_v6 = vld [vmem:[%s6730_s23 + $0x418] sm:$0xff]  }
 0x1f6   : > { %v2563_v17 = vmax.f32 %v1641_v11, 0.0  ;;  %6165 = vmatmul.mubr.bf16.gmra.mrb[232].mxu0 %v6639_v5  ;;  %v2703_v18 = vmax.f32 %v2201_v14, 0.0  ;;  %6445 = vmatmul.mubr.bf16.gmra.mrb[232].mxu1 %v6640_v8 }
 0x1f7   : > { %6168 = vmatprep.mubr.msk.bf16.mxu0 %vm6674_vm0, %v6673_v1  ;;  %6448 = vmatprep.mubr.msk.bf16.mxu1 %vm6674_vm0, %v6673_v1 }
 0x1f8   : > { %v5094_v19 = vpack.c.bf16 %v2563_v17, %v2562_v16  ;;  %v5444_v20 = vpack.c.bf16 %v2703_v18, %v2702_v13 }
 0x1f9   : > { %v1645_v21 = vpop.f32.mrb[128].mxu0  ;;  %v2205_v22 = vpop.f32.mrb[128].mxu1 }
 0x1fa   : > { %5661 = vst [vmem:[%s6935_s11 + $0xf8] sm:$0xff] %v5094_v19   ;;  %5731 = vst [vmem:[%s6935_s11 + $0x328] sm:$0xff] %v5444_v20   ;;  %v1646_v23 = vadd.f32 %v7174_v63, %v1645_v21  ;;  %v6062_v24 = vpop.f32.mrb[129].mxu0  ;;  %v2206_v26 = vadd.f32 %v7174_v63, %v2205_v22  ;;  %v6342_v27 = vpop.f32.mrb[129].mxu1 }
 0x1fb   : > { %v1648_v29 = vpop.f32.mrb[130].mxu0  ;;  %v2208_v30 = vpop.f32.mrb[130].mxu1 }
 0x1fc   : > { %v1649_v31 = vadd.f32 %v7174_v63, %v1648_v29  ;;  %v6063_v32 = vpop.f32.mrb[131].mxu0  ;;  %v2704_v33 = vmax.f32 %v2206_v26, 0.0  ;;  %v2209_v34 = vadd.f32 %v7174_v63, %v2208_v30  ;;  %v6343_v35 = vpop.f32.mrb[131].mxu1  ;;  %v2564_v36 = vmax.f32 %v1646_v23, 0.0  ;;  %v6647_v23 = vld [vmem:[%s6730_s23 + $0x1f0] sm:$0xff]   ;;  %v6648_v26 = vld [vmem:[%s6730_s23 + $0x420] sm:$0xff]  }
 0x1fe   : > { %v2565_v37 = vmax.f32 %v1649_v31, 0.0  ;;  %6169 = vmatmul.mubr.bf16.gmra.mrb[236].mxu0 %v6641_v25  ;;  %v2705_v38 = vmax.f32 %v2209_v34, 0.0  ;;  %6449 = vmatmul.mubr.bf16.gmra.mrb[236].mxu1 %v6642_v28 }
 0x1ff   : > { %6172 = vmatprep.mubr.msk.bf16.mxu0 %vm6674_vm0, %v6673_v1  ;;  %6452 = vmatprep.mubr.msk.bf16.mxu1 %vm6674_vm0, %v6673_v1 }
 0x200   : > { %v5099_v39 = vpack.c.bf16 %v2565_v37, %v2564_v36  ;;  %v5449_v40 = vpack.c.bf16 %v2705_v38, %v2704_v33 }
 0x201   : > { %v1653_v41 = vpop.f32.mrb[132].mxu0  ;;  %v2213_v42 = vpop.f32.mrb[132].mxu1 }
 0x202   : > { %5662 = vst [vmem:[%s6935_s11 + $0x100] sm:$0xff] %v5099_v39   ;;  %5732 = vst [vmem:[%s6935_s11 + $0x330] sm:$0xff] %v5449_v40   ;;  %v1654_v43 = vadd.f32 %v7174_v63, %v1653_v41  ;;  %v6066_v44 = vpop.f32.mrb[133].mxu0  ;;  %v2214_v46 = vadd.f32 %v7174_v63, %v2213_v42  ;;  %v6346_v47 = vpop.f32.mrb[133].mxu1 }
 0x203   : > { %v1656_v49 = vpop.f32.mrb[134].mxu0  ;;  %v2216_v50 = vpop.f32.mrb[134].mxu1 }
 0x204   : > { %v1657_v51 = vadd.f32 %v7174_v63, %v1656_v49  ;;  %v6067_v52 = vpop.f32.mrb[135].mxu0  ;;  %v2706_v53 = vmax.f32 %v2214_v46, 0.0  ;;  %v2217_v54 = vadd.f32 %v7174_v63, %v2216_v50  ;;  %v6347_v55 = vpop.f32.mrb[135].mxu1  ;;  %v2566_v56 = vmax.f32 %v1654_v43, 0.0  ;;  %v6649_v43 = vld [vmem:[%s6730_s23 + $0x1f8] sm:$0xff]   ;;  %v6650_v46 = vld [vmem:[%s6730_s23 + $0x428] sm:$0xff]  }
 0x206   : > { %v2567_v57 = vmax.f32 %v1657_v51, 0.0  ;;  %6173 = vmatmul.mubr.bf16.gmra.mrb[240].mxu0 %v6643_v45  ;;  %v2707_v58 = vmax.f32 %v2217_v54, 0.0  ;;  %6453 = vmatmul.mubr.bf16.gmra.mrb[240].mxu1 %v6644_v48 }
 0x207   : > { %6176 = vmatprep.mubr.msk.bf16.mxu0 %vm6674_vm0, %v6673_v1  ;;  %6456 = vmatprep.mubr.msk.bf16.mxu1 %vm6674_vm0, %v6673_v1 }
 0x208   : > { %v5104_v59 = vpack.c.bf16 %v2567_v57, %v2566_v56  ;;  %v5454_v60 = vpack.c.bf16 %v2707_v58, %v2706_v53 }
 0x209   : > { %v1661_v61 = vpop.f32.mrb[136].mxu0  ;;  %v2221_v62 = vpop.f32.mrb[136].mxu1 }
 0x20a   : > { %5663 = vst [vmem:[%s6935_s11 + $0x108] sm:$0xff] %v5104_v59   ;;  %5733 = vst [vmem:[%s6935_s11 + $0x338] sm:$0xff] %v5454_v60   ;;  %v1662_v0 = vadd.f32 %v7174_v63, %v1661_v61  ;;  %v6070_v2 = vpop.f32.mrb[137].mxu0  ;;  %v2222_v4 = vadd.f32 %v7174_v63, %v2221_v62  ;;  %v6350_v5 = vpop.f32.mrb[137].mxu1 }
 0x20b   : > { %v1664_v7 = vpop.f32.mrb[138].mxu0  ;;  %v2224_v8 = vpop.f32.mrb[138].mxu1 }
 0x20c   : > { %v1665_v9 = vadd.f32 %v7174_v63, %v1664_v7  ;;  %v6071_v10 = vpop.f32.mrb[139].mxu0  ;;  %v2708_v11 = vmax.f32 %v2222_v4, 0.0  ;;  %v2225_v12 = vadd.f32 %v7174_v63, %v2224_v8  ;;  %v6351_v13 = vpop.f32.mrb[139].mxu1  ;;  %v2568_v14 = vmax.f32 %v1662_v0, 0.0  ;;  %v6651_v0 = vld [vmem:[%s6730_s23 + $0x200] sm:$0xff]   ;;  %v6652_v4 = vld [vmem:[%s6730_s23 + $0x430] sm:$0xff]  }
 0x20e   : > { %v2569_v15 = vmax.f32 %v1665_v9, 0.0  ;;  %6177 = vmatmul.mubr.bf16.gmra.mrb[244].mxu0 %v6645_v3  ;;  %v2709_v16 = vmax.f32 %v2225_v12, 0.0  ;;  %6457 = vmatmul.mubr.bf16.gmra.mrb[244].mxu1 %v6646_v6 }
 0x20f   : > { %6180 = vmatprep.mubr.msk.bf16.mxu0 %vm6674_vm0, %v6673_v1  ;;  %6460 = vmatprep.mubr.msk.bf16.mxu1 %vm6674_vm0, %v6673_v1 }
 0x210   : > { %v5109_v17 = vpack.c.bf16 %v2569_v15, %v2568_v14  ;;  %v5459_v18 = vpack.c.bf16 %v2709_v16, %v2708_v11 }
 0x211   : > { %v1669_v19 = vpop.f32.mrb[140].mxu0  ;;  %v2229_v20 = vpop.f32.mrb[140].mxu1 }
 0x212   : > { %5664 = vst [vmem:[%s6935_s11 + $0x110] sm:$0xff] %v5109_v17   ;;  %5734 = vst [vmem:[%s6935_s11 + $0x340] sm:$0xff] %v5459_v18   ;;  %v1670_v21 = vadd.f32 %v7174_v63, %v1669_v19  ;;  %v6074_v22 = vpop.f32.mrb[141].mxu0  ;;  %v2230_v24 = vadd.f32 %v7174_v63, %v2229_v20  ;;  %v6354_v25 = vpop.f32.mrb[141].mxu1 }
 0x213   : > { %v1672_v27 = vpop.f32.mrb[142].mxu0  ;;  %v2232_v28 = vpop.f32.mrb[142].mxu1 }
 0x214   : > { %v1673_v29 = vadd.f32 %v7174_v63, %v1672_v27  ;;  %v6075_v30 = vpop.f32.mrb[143].mxu0  ;;  %v2710_v31 = vmax.f32 %v2230_v24, 0.0  ;;  %v2233_v32 = vadd.f32 %v7174_v63, %v2232_v28  ;;  %v6355_v33 = vpop.f32.mrb[143].mxu1  ;;  %v2570_v34 = vmax.f32 %v1670_v21, 0.0  ;;  %v6653_v21 = vld [vmem:[%s6730_s23 + $0x208] sm:$0xff]   ;;  %v6654_v24 = vld [vmem:[%s6730_s23 + $0x438] sm:$0xff]  }
 0x216   : > { %v2571_v35 = vmax.f32 %v1673_v29, 0.0  ;;  %6181 = vmatmul.mubr.bf16.gmra.mrb[248].mxu0 %v6647_v23  ;;  %v2711_v36 = vmax.f32 %v2233_v32, 0.0  ;;  %6461 = vmatmul.mubr.bf16.gmra.mrb[248].mxu1 %v6648_v26 }
 0x217   : > { %6184 = vmatprep.mubr.msk.bf16.mxu0 %vm6674_vm0, %v6673_v1  ;;  %6464 = vmatprep.mubr.msk.bf16.mxu1 %vm6674_vm0, %v6673_v1 }
 0x218   : > { %v5114_v37 = vpack.c.bf16 %v2571_v35, %v2570_v34  ;;  %v5464_v38 = vpack.c.bf16 %v2711_v36, %v2710_v31 }
 0x219   : > { %v1677_v39 = vpop.f32.mrb[144].mxu0  ;;  %v2237_v40 = vpop.f32.mrb[144].mxu1 }
 0x21a   : > { %5665 = vst [vmem:[%s6935_s11 + $0x118] sm:$0xff] %v5114_v37   ;;  %5735 = vst [vmem:[%s6935_s11 + $0x348] sm:$0xff] %v5464_v38   ;;  %v1678_v41 = vadd.f32 %v7174_v63, %v1677_v39  ;;  %v6078_v42 = vpop.f32.mrb[145].mxu0  ;;  %v2238_v44 = vadd.f32 %v7174_v63, %v2237_v40  ;;  %v6358_v45 = vpop.f32.mrb[145].mxu1 }
 0x21b   : > { %v1680_v47 = vpop.f32.mrb[146].mxu0  ;;  %v2240_v48 = vpop.f32.mrb[146].mxu1 }
 0x21c   : > { %v1681_v49 = vadd.f32 %v7174_v63, %v1680_v47  ;;  %v6079_v50 = vpop.f32.mrb[147].mxu0  ;;  %v2712_v51 = vmax.f32 %v2238_v44, 0.0  ;;  %v2241_v52 = vadd.f32 %v7174_v63, %v2240_v48  ;;  %v6359_v53 = vpop.f32.mrb[147].mxu1  ;;  %v2572_v54 = vmax.f32 %v1678_v41, 0.0  ;;  %v6655_v41 = vld [vmem:[%s6730_s23 + $0x210] sm:$0xff]   ;;  %v6656_v44 = vld [vmem:[%s6730_s23 + $0x440] sm:$0xff]  }
 0x21e   : > { %v2573_v55 = vmax.f32 %v1681_v49, 0.0  ;;  %6185 = vmatmul.mubr.bf16.gmra.mrb[252].mxu0 %v6649_v43  ;;  %v2713_v56 = vmax.f32 %v2241_v52, 0.0  ;;  %6465 = vmatmul.mubr.bf16.gmra.mrb[252].mxu1 %v6650_v46 }
 0x21f   : > { %6188 = vmatprep.mubr.msk.bf16.mxu0 %vm6674_vm0, %v6673_v1  ;;  %6468 = vmatprep.mubr.msk.bf16.mxu1 %vm6674_vm0, %v6673_v1 }
 0x220   : > { %v5119_v57 = vpack.c.bf16 %v2573_v55, %v2572_v54  ;;  %v5469_v58 = vpack.c.bf16 %v2713_v56, %v2712_v51 }
 0x221   : > { %v1685_v59 = vpop.f32.mrb[148].mxu0  ;;  %v2245_v60 = vpop.f32.mrb[148].mxu1 }
 0x222   : > { %5666 = vst [vmem:[%s6935_s11 + $0x120] sm:$0xff] %v5119_v57   ;;  %5736 = vst [vmem:[%s6935_s11 + $0x350] sm:$0xff] %v5469_v58   ;;  %v1686_v61 = vadd.f32 %v7174_v63, %v1685_v59  ;;  %v6082_v62 = vpop.f32.mrb[149].mxu0  ;;  %v2246_v2 = vadd.f32 %v7174_v63, %v2245_v60  ;;  %v6362_v3 = vpop.f32.mrb[149].mxu1 }
 0x223   : > { %v1688_v5 = vpop.f32.mrb[150].mxu0  ;;  %v2248_v6 = vpop.f32.mrb[150].mxu1 }
 0x224   : > { %v1689_v7 = vadd.f32 %v7174_v63, %v1688_v5  ;;  %v6083_v8 = vpop.f32.mrb[151].mxu0  ;;  %v2714_v9 = vmax.f32 %v2246_v2, 0.0  ;;  %v2249_v10 = vadd.f32 %v7174_v63, %v2248_v6  ;;  %v6363_v11 = vpop.f32.mrb[151].mxu1  ;;  %v2574_v12 = vmax.f32 %v1686_v61, 0.0  ;;  %v6657_v61 = vld [vmem:[%s6730_s23 + $0x218] sm:$0xff]   ;;  %v6658_v2 = vld [vmem:[%s6730_s23 + $0x448] sm:$0xff]  }
 0x226   : > { %v2575_v13 = vmax.f32 %v1689_v7, 0.0  ;;  %6189 = vmatmul.mubr.bf16.gmra.mrb[0].mxu0 %v6651_v0  ;;  %v2715_v14 = vmax.f32 %v2249_v10, 0.0  ;;  %6469 = vmatmul.mubr.bf16.gmra.mrb[0].mxu1 %v6652_v4 }
 0x227   : > { %6192 = vmatprep.mubr.msk.bf16.mxu0 %vm6674_vm0, %v6673_v1  ;;  %6472 = vmatprep.mubr.msk.bf16.mxu1 %vm6674_vm0, %v6673_v1 }
 0x228   : > { %v5124_v15 = vpack.c.bf16 %v2575_v13, %v2574_v12  ;;  %v5474_v16 = vpack.c.bf16 %v2715_v14, %v2714_v9 }
 0x229   : > { %v1693_v17 = vpop.f32.mrb[152].mxu0  ;;  %v2253_v18 = vpop.f32.mrb[152].mxu1 }
 0x22a   : > { %5667 = vst [vmem:[%s6935_s11 + $0x128] sm:$0xff] %v5124_v15   ;;  %5737 = vst [vmem:[%s6935_s11 + $0x358] sm:$0xff] %v5474_v16   ;;  %v1694_v19 = vadd.f32 %v7174_v63, %v1693_v17  ;;  %v6086_v20 = vpop.f32.mrb[153].mxu0  ;;  %v2254_v22 = vadd.f32 %v7174_v63, %v2253_v18  ;;  %v6366_v23 = vpop.f32.mrb[153].mxu1 }
 0x22b   : > { %v1696_v25 = vpop.f32.mrb[154].mxu0  ;;  %v2256_v26 = vpop.f32.mrb[154].mxu1 }
 0x22c   : > { %v1697_v27 = vadd.f32 %v7174_v63, %v1696_v25  ;;  %v6087_v28 = vpop.f32.mrb[155].mxu0  ;;  %v2716_v29 = vmax.f32 %v2254_v22, 0.0  ;;  %v2257_v30 = vadd.f32 %v7174_v63, %v2256_v26  ;;  %v6367_v31 = vpop.f32.mrb[155].mxu1  ;;  %v2576_v32 = vmax.f32 %v1694_v19, 0.0  ;;  %v6659_v19 = vld [vmem:[%s6730_s23 + $0x220] sm:$0xff]   ;;  %v6660_v22 = vld [vmem:[%s6730_s23 + $0x450] sm:$0xff]  }
 0x22e   : > { %v2577_v33 = vmax.f32 %v1697_v27, 0.0  ;;  %6193 = vmatmul.mubr.bf16.gmra.mrb[4].mxu0 %v6653_v21  ;;  %v2717_v34 = vmax.f32 %v2257_v30, 0.0  ;;  %6473 = vmatmul.mubr.bf16.gmra.mrb[4].mxu1 %v6654_v24 }
 0x22f   : > { %6196 = vmatprep.mubr.msk.bf16.mxu0 %vm6674_vm0, %v6673_v1  ;;  %6476 = vmatprep.mubr.msk.bf16.mxu1 %vm6674_vm0, %v6673_v1 }
 0x230   : > { %v5129_v35 = vpack.c.bf16 %v2577_v33, %v2576_v32  ;;  %v5479_v36 = vpack.c.bf16 %v2717_v34, %v2716_v29 }
 0x231   : > { %v1701_v37 = vpop.f32.mrb[156].mxu0  ;;  %v2261_v38 = vpop.f32.mrb[156].mxu1 }
 0x232   : > { %5668 = vst [vmem:[%s6935_s11 + $0x130] sm:$0xff] %v5129_v35   ;;  %5738 = vst [vmem:[%s6935_s11 + $0x360] sm:$0xff] %v5479_v36   ;;  %v1702_v39 = vadd.f32 %v7174_v63, %v1701_v37  ;;  %v6090_v40 = vpop.f32.mrb[157].mxu0  ;;  %v2262_v42 = vadd.f32 %v7174_v63, %v2261_v38  ;;  %v6370_v43 = vpop.f32.mrb[157].mxu1 }
 0x233   : > { %v1704_v45 = vpop.f32.mrb[158].mxu0  ;;  %v2264_v46 = vpop.f32.mrb[158].mxu1 }
 0x234   : > { %v1705_v47 = vadd.f32 %v7174_v63, %v1704_v45  ;;  %v6091_v48 = vpop.f32.mrb[159].mxu0  ;;  %v2718_v49 = vmax.f32 %v2262_v42, 0.0  ;;  %v2265_v50 = vadd.f32 %v7174_v63, %v2264_v46  ;;  %v6371_v51 = vpop.f32.mrb[159].mxu1  ;;  %v2578_v52 = vmax.f32 %v1702_v39, 0.0  ;;  %v7419_v63 = vld [vmem:[%s7619_s2] ss:$0 sm:$0xff] }
 0x235   : > { %v6661_v39 = vld [vmem:[%s6730_s23 + $0x228] sm:$0xff]  }
 0x236   : > { %v2579_v53 = vmax.f32 %v1705_v47, 0.0  ;;  %6197 = vmatmul.mubr.bf16.gmra.mrb[8].mxu0 %v6655_v41  ;;  %v2719_v54 = vmax.f32 %v2265_v50, 0.0  ;;  %6477 = vmatmul.mubr.bf16.gmra.mrb[8].mxu1 %v6656_v44 }
 0x237   : > { %6200 = vmatprep.mubr.msk.bf16.mxu0 %vm6674_vm0, %v6673_v1  ;;  %6480 = vmatprep.mubr.msk.bf16.mxu1 %vm6674_vm0, %v6673_v1 }
 0x238   : > { %v5134_v55 = vpack.c.bf16 %v2579_v53, %v2578_v52  ;;  %v5484_v56 = vpack.c.bf16 %v2719_v54, %v2718_v49 }
 0x239   : > { %v1709_v57 = vpop.f32.mrb[160].mxu0  ;;  %v2269_v58 = vpop.f32.mrb[160].mxu1 }
 0x23a   : > { %5669 = vst [vmem:[%s6935_s11 + $0x138] sm:$0xff] %v5134_v55   ;;  %5739 = vst [vmem:[%s6935_s11 + $0x368] sm:$0xff] %v5484_v56   ;;  %v1710_v59 = vadd.f32 %v7419_v63, %v1709_v57  ;;  %v6094_v60 = vpop.f32.mrb[161].mxu0  ;;  %v2270_v62 = vadd.f32 %v7419_v63, %v2269_v58  ;;  %v6374_v0 = vpop.f32.mrb[161].mxu1 }
 0x23b   : > { %v1712_v3 = vpop.f32.mrb[162].mxu0  ;;  %v2272_v4 = vpop.f32.mrb[162].mxu1 }
 0x23c   : > { %v1713_v5 = vadd.f32 %v7419_v63, %v1712_v3  ;;  %v6095_v6 = vpop.f32.mrb[163].mxu0  ;;  %v2720_v7 = vmax.f32 %v2270_v62, 0.0  ;;  %v2273_v8 = vadd.f32 %v7419_v63, %v2272_v4  ;;  %v6375_v9 = vpop.f32.mrb[163].mxu1  ;;  %v2580_v10 = vmax.f32 %v1710_v59, 0.0 }
 0x23e   : > { %v2581_v11 = vmax.f32 %v1713_v5, 0.0  ;;  %6201 = vmatmul.mubr.bf16.gmra.mrb[12].mxu0 %v6657_v61  ;;  %v2721_v12 = vmax.f32 %v2273_v8, 0.0  ;;  %6481 = vmatmul.mubr.bf16.gmra.mrb[12].mxu1 %v6658_v2 }
 0x23f   : > { %6204 = vmatprep.mubr.msk.bf16.mxu0 %vm6674_vm0, %v6673_v1  ;;  %6484 = vmatprep.mubr.msk.bf16.mxu1 %vm6674_vm0, %v6673_v1 }
 0x240   : > { %v5139_v13 = vpack.c.bf16 %v2581_v11, %v2580_v10  ;;  %v5489_v14 = vpack.c.bf16 %v2721_v12, %v2720_v7 }
 0x241   : > { %v1717_v15 = vpop.f32.mrb[164].mxu0  ;;  %v2277_v16 = vpop.f32.mrb[164].mxu1 }
 0x242   : > { %5670 = vst [vmem:[%s6935_s11 + $0x140] sm:$0xff] %v5139_v13   ;;  %5740 = vst [vmem:[%s6935_s11 + $0x370] sm:$0xff] %v5489_v14   ;;  %v1718_v17 = vadd.f32 %v7419_v63, %v1717_v15  ;;  %v6098_v18 = vpop.f32.mrb[165].mxu0  ;;  %v2278_v20 = vadd.f32 %v7419_v63, %v2277_v16  ;;  %v6378_v21 = vpop.f32.mrb[165].mxu1 }
 0x243   : > { %v1720_v23 = vpop.f32.mrb[166].mxu0  ;;  %v2280_v24 = vpop.f32.mrb[166].mxu1 }
 0x244   : > { %v1721_v25 = vadd.f32 %v7419_v63, %v1720_v23  ;;  %v6099_v26 = vpop.f32.mrb[167].mxu0  ;;  %v2722_v27 = vmax.f32 %v2278_v20, 0.0  ;;  %v2281_v28 = vadd.f32 %v7419_v63, %v2280_v24  ;;  %v6379_v29 = vpop.f32.mrb[167].mxu1  ;;  %v2582_v30 = vmax.f32 %v1718_v17, 0.0 }
 0x246   : > { %v2583_v31 = vmax.f32 %v1721_v25, 0.0  ;;  %6205 = vmatmul.mubr.bf16.gmra.mrb[16].mxu0 %v6659_v19  ;;  %v2723_v32 = vmax.f32 %v2281_v28, 0.0  ;;  %6485 = vmatmul.mubr.bf16.gmra.mrb[16].mxu1 %v6660_v22 }
 0x247   : > { %6208 = vmatprep.mubr.msk.bf16.mxu0 %vm6674_vm0, %v6673_v1 }
 0x248   : > { %v5144_v33 = vpack.c.bf16 %v2583_v31, %v2582_v30  ;;  %v5494_v34 = vpack.c.bf16 %v2723_v32, %v2722_v27 }
 0x249   : > { %v1725_v35 = vpop.f32.mrb[168].mxu0  ;;  %v2285_v36 = vpop.f32.mrb[168].mxu1 }
 0x24a   : > { %5671 = vst [vmem:[%s6935_s11 + $0x148] sm:$0xff] %v5144_v33   ;;  %5741 = vst [vmem:[%s6935_s11 + $0x378] sm:$0xff] %v5494_v34   ;;  %v1726_v37 = vadd.f32 %v7419_v63, %v1725_v35  ;;  %v6102_v38 = vpop.f32.mrb[169].mxu0  ;;  %v2286_v40 = vadd.f32 %v7419_v63, %v2285_v36  ;;  %v6382_v41 = vpop.f32.mrb[169].mxu1 }
 0x24b   : > { %v1728_v42 = vpop.f32.mrb[170].mxu0  ;;  %v2288_v43 = vpop.f32.mrb[170].mxu1 }
 0x24c   : > { %v1729_v44 = vadd.f32 %v7419_v63, %v1728_v42  ;;  %v6103_v1 = vpop.f32.mrb[171].mxu0  ;;  %v2724_v45 = vmax.f32 %v2286_v40, 0.0  ;;  %v2289_v46 = vadd.f32 %v7419_v63, %v2288_v43  ;;  %v6383_v47 = vpop.f32.mrb[171].mxu1  ;;  %v2584_v48 = vmax.f32 %v1726_v37, 0.0 }
 0x24e   : > { %v2585_v49 = vmax.f32 %v1729_v44, 0.0  ;;  %6209 = vmatmul.mubr.bf16.gmra.mrb[20].mxu0 %v6661_v39  ;;  %v2725_v50 = vmax.f32 %v2289_v46, 0.0 }
 0x250   : > { %v5149_v51 = vpack.c.bf16 %v2585_v49, %v2584_v48  ;;  %v5499_v52 = vpack.c.bf16 %v2725_v50, %v2724_v45 }
 0x251   : > { %v1733_v53 = vpop.f32.mrb[172].mxu0  ;;  %v2293_v54 = vpop.f32.mrb[172].mxu1 }
 0x252   : > { %5672 = vst [vmem:[%s6935_s11 + $0x150] sm:$0xff] %v5149_v51   ;;  %5742 = vst [vmem:[%s6935_s11 + $0x380] sm:$0xff] %v5499_v52   ;;  %v1734_v55 = vadd.f32 %v7419_v63, %v1733_v53  ;;  %v6106_v56 = vpop.f32.mrb[173].mxu0  ;;  %v2294_v57 = vadd.f32 %v7419_v63, %v2293_v54  ;;  %v6386_v58 = vpop.f32.mrb[173].mxu1 }
 0x253   : > { %v1736_v59 = vpop.f32.mrb[174].mxu0  ;;  %v2296_v60 = vpop.f32.mrb[174].mxu1 }
 0x254   : > { %v1737_v61 = vadd.f32 %v7419_v63, %v1736_v59  ;;  %v6107_v62 = vpop.f32.mrb[175].mxu0  ;;  %v2726_v0 = vmax.f32 %v2294_v57, 0.0  ;;  %v2297_v2 = vadd.f32 %v7419_v63, %v2296_v60  ;;  %v6387_v3 = vpop.f32.mrb[175].mxu1  ;;  %v2586_v4 = vmax.f32 %v1734_v55, 0.0 }
 0x256   : > { %v2587_v5 = vmax.f32 %v1737_v61, 0.0  ;;  %v2727_v6 = vmax.f32 %v2297_v2, 0.0 }
 0x258   : > { %v5154_v7 = vpack.c.bf16 %v2587_v5, %v2586_v4  ;;  %v5504_v8 = vpack.c.bf16 %v2727_v6, %v2726_v0 }
 0x259   : > { %v1741_v9 = vpop.f32.mrb[176].mxu0  ;;  %v2301_v10 = vpop.f32.mrb[176].mxu1 }
 0x25a   : > { %5673 = vst [vmem:[%s6935_s11 + $0x158] sm:$0xff] %v5154_v7   ;;  %5743 = vst [vmem:[%s6935_s11 + $0x388] sm:$0xff] %v5504_v8   ;;  %v1742_v11 = vadd.f32 %v7419_v63, %v1741_v9  ;;  %v6110_v12 = vpop.f32.mrb[177].mxu0  ;;  %v2302_v13 = vadd.f32 %v7419_v63, %v2301_v10  ;;  %v6390_v14 = vpop.f32.mrb[177].mxu1 }
 0x25b   : > { %v1744_v15 = vpop.f32.mrb[178].mxu0  ;;  %v2304_v16 = vpop.f32.mrb[178].mxu1 }
 0x25c   : > { %v1745_v17 = vadd.f32 %v7419_v63, %v1744_v15  ;;  %v6111_v18 = vpop.f32.mrb[179].mxu0  ;;  %v2728_v19 = vmax.f32 %v2302_v13, 0.0  ;;  %v2305_v20 = vadd.f32 %v7419_v63, %v2304_v16  ;;  %v6391_v21 = vpop.f32.mrb[179].mxu1  ;;  %v2588_v22 = vmax.f32 %v1742_v11, 0.0 }
 0x25e   : > { %v2589_v23 = vmax.f32 %v1745_v17, 0.0  ;;  %v2729_v24 = vmax.f32 %v2305_v20, 0.0 }
 0x260   : > { %v5159_v25 = vpack.c.bf16 %v2589_v23, %v2588_v22  ;;  %v5509_v26 = vpack.c.bf16 %v2729_v24, %v2728_v19 }
 0x261   : > { %v1749_v27 = vpop.f32.mrb[180].mxu0  ;;  %v2309_v28 = vpop.f32.mrb[180].mxu1 }
 0x262   : > { %5674 = vst [vmem:[%s6935_s11 + $0x160] sm:$0xff] %v5159_v25   ;;  %5744 = vst [vmem:[%s6935_s11 + $0x390] sm:$0xff] %v5509_v26   ;;  %v1750_v29 = vadd.f32 %v7419_v63, %v1749_v27  ;;  %v6114_v30 = vpop.f32.mrb[181].mxu0  ;;  %v2310_v31 = vadd.f32 %v7419_v63, %v2309_v28  ;;  %v6394_v32 = vpop.f32.mrb[181].mxu1 }
 0x263   : > { %v1752_v33 = vpop.f32.mrb[182].mxu0  ;;  %v2312_v34 = vpop.f32.mrb[182].mxu1 }
 0x264   : > { %v1753_v35 = vadd.f32 %v7419_v63, %v1752_v33  ;;  %v6115_v36 = vpop.f32.mrb[183].mxu0  ;;  %v2730_v37 = vmax.f32 %v2310_v31, 0.0  ;;  %v2313_v38 = vadd.f32 %v7419_v63, %v2312_v34  ;;  %v6395_v39 = vpop.f32.mrb[183].mxu1  ;;  %v2590_v40 = vmax.f32 %v1750_v29, 0.0 }
 0x266   : > { %v2591_v41 = vmax.f32 %v1753_v35, 0.0  ;;  %v2731_v42 = vmax.f32 %v2313_v38, 0.0 }
 0x268   : > { %v5164_v43 = vpack.c.bf16 %v2591_v41, %v2590_v40  ;;  %v5514_v44 = vpack.c.bf16 %v2731_v42, %v2730_v37 }
 0x269   : > { %v1757_v1 = vpop.f32.mrb[184].mxu0  ;;  %v2317_v45 = vpop.f32.mrb[184].mxu1 }
 0x26a   : > { %5675 = vst [vmem:[%s6935_s11 + $0x168] sm:$0xff] %v5164_v43   ;;  %5745 = vst [vmem:[%s6935_s11 + $0x398] sm:$0xff] %v5514_v44   ;;  %v1758_v46 = vadd.f32 %v7419_v63, %v1757_v1  ;;  %v6118_v47 = vpop.f32.mrb[185].mxu0  ;;  %v2318_v48 = vadd.f32 %v7419_v63, %v2317_v45  ;;  %v6398_v49 = vpop.f32.mrb[185].mxu1 }
 0x26b   : > { %v1760_v50 = vpop.f32.mrb[186].mxu0  ;;  %v2320_v51 = vpop.f32.mrb[186].mxu1 }
 0x26c   : > { %v1761_v52 = vadd.f32 %v7419_v63, %v1760_v50  ;;  %v6119_v53 = vpop.f32.mrb[187].mxu0  ;;  %v2732_v54 = vmax.f32 %v2318_v48, 0.0  ;;  %v2321_v55 = vadd.f32 %v7419_v63, %v2320_v51  ;;  %v6399_v56 = vpop.f32.mrb[187].mxu1  ;;  %v2592_v57 = vmax.f32 %v1758_v46, 0.0 }
 0x26e   : > { %v2593_v58 = vmax.f32 %v1761_v52, 0.0  ;;  %v2733_v59 = vmax.f32 %v2321_v55, 0.0 }
 0x270   : > { %v5169_v60 = vpack.c.bf16 %v2593_v58, %v2592_v57  ;;  %v5519_v61 = vpack.c.bf16 %v2733_v59, %v2732_v54 }
 0x271   : > { %v1765_v62 = vpop.f32.mrb[188].mxu0  ;;  %v2325_v0 = vpop.f32.mrb[188].mxu1 }
 0x272   : > { %5676 = vst [vmem:[%s6935_s11 + $0x170] sm:$0xff] %v5169_v60   ;;  %5746 = vst [vmem:[%s6935_s11 + $0x3a0] sm:$0xff] %v5519_v61   ;;  %v1766_v2 = vadd.f32 %v7419_v63, %v1765_v62  ;;  %v6122_v3 = vpop.f32.mrb[189].mxu0  ;;  %v2326_v4 = vadd.f32 %v7419_v63, %v2325_v0  ;;  %v6402_v5 = vpop.f32.mrb[189].mxu1 }
 0x273   : > { %v1768_v6 = vpop.f32.mrb[190].mxu0  ;;  %v2328_v7 = vpop.f32.mrb[190].mxu1 }
 0x274   : > { %v1769_v8 = vadd.f32 %v7419_v63, %v1768_v6  ;;  %v6123_v9 = vpop.f32.mrb[191].mxu0  ;;  %v2734_v10 = vmax.f32 %v2326_v4, 0.0  ;;  %v2329_v11 = vadd.f32 %v7419_v63, %v2328_v7  ;;  %v6403_v12 = vpop.f32.mrb[191].mxu1  ;;  %v2594_v13 = vmax.f32 %v1766_v2, 0.0 }
 0x276   : > { %v2595_v14 = vmax.f32 %v1769_v8, 0.0  ;;  %v2735_v15 = vmax.f32 %v2329_v11, 0.0 }
 0x278   : > { %v5174_v16 = vpack.c.bf16 %v2595_v14, %v2594_v13  ;;  %v5524_v17 = vpack.c.bf16 %v2735_v15, %v2734_v10 }
 0x279   : > { %v1773_v18 = vpop.f32.mrb[192].mxu0  ;;  %v2333_v19 = vpop.f32.mrb[192].mxu1 }
 0x27a   : > { %5677 = vst [vmem:[%s6935_s11 + $0x178] sm:$0xff] %v5174_v16   ;;  %5747 = vst [vmem:[%s6935_s11 + $0x3a8] sm:$0xff] %v5524_v17   ;;  %v1774_v20 = vadd.f32 %v7419_v63, %v1773_v18  ;;  %v6126_v21 = vpop.f32.mrb[193].mxu0  ;;  %v2334_v22 = vadd.f32 %v7419_v63, %v2333_v19  ;;  %v6406_v23 = vpop.f32.mrb[193].mxu1 }
 0x27b   : > { %v1776_v24 = vpop.f32.mrb[194].mxu0  ;;  %v2336_v25 = vpop.f32.mrb[194].mxu1 }
 0x27c   : > { %v1777_v26 = vadd.f32 %v7419_v63, %v1776_v24  ;;  %v6127_v27 = vpop.f32.mrb[195].mxu0  ;;  %v2736_v28 = vmax.f32 %v2334_v22, 0.0  ;;  %v2337_v29 = vadd.f32 %v7419_v63, %v2336_v25  ;;  %v6407_v30 = vpop.f32.mrb[195].mxu1  ;;  %v2596_v31 = vmax.f32 %v1774_v20, 0.0 }
 0x27e   : > { %v2597_v32 = vmax.f32 %v1777_v26, 0.0  ;;  %v2737_v33 = vmax.f32 %v2337_v29, 0.0 }
 0x280   : > { %v5179_v34 = vpack.c.bf16 %v2597_v32, %v2596_v31  ;;  %v5529_v35 = vpack.c.bf16 %v2737_v33, %v2736_v28 }
 0x281   : > { %v1781_v36 = vpop.f32.mrb[196].mxu0  ;;  %v2341_v37 = vpop.f32.mrb[196].mxu1 }
 0x282   : > { %5678 = vst [vmem:[%s6935_s11 + $0x180] sm:$0xff] %v5179_v34   ;;  %5748 = vst [vmem:[%s6935_s11 + $0x3b0] sm:$0xff] %v5529_v35   ;;  %v1782_v38 = vadd.f32 %v7419_v63, %v1781_v36  ;;  %v6130_v39 = vpop.f32.mrb[197].mxu0  ;;  %v2342_v40 = vadd.f32 %v7419_v63, %v2341_v37  ;;  %v6410_v41 = vpop.f32.mrb[197].mxu1 }
 0x283   : > { %v1784_v42 = vpop.f32.mrb[198].mxu0  ;;  %v2344_v43 = vpop.f32.mrb[198].mxu1 }
 0x284   : > { %v1785_v44 = vadd.f32 %v7419_v63, %v1784_v42  ;;  %v6131_v1 = vpop.f32.mrb[199].mxu0  ;;  %v2738_v45 = vmax.f32 %v2342_v40, 0.0  ;;  %v2345_v46 = vadd.f32 %v7419_v63, %v2344_v43  ;;  %v6411_v47 = vpop.f32.mrb[199].mxu1  ;;  %v2598_v48 = vmax.f32 %v1782_v38, 0.0 }
 0x286   : > { %v2599_v49 = vmax.f32 %v1785_v44, 0.0  ;;  %v2739_v50 = vmax.f32 %v2345_v46, 0.0 }
 0x288   : > { %v5184_v51 = vpack.c.bf16 %v2599_v49, %v2598_v48  ;;  %v5534_v52 = vpack.c.bf16 %v2739_v50, %v2738_v45 }
 0x289   : > { %v1789_v53 = vpop.f32.mrb[200].mxu0  ;;  %v2349_v54 = vpop.f32.mrb[200].mxu1 }
 0x28a   : > { %5679 = vst [vmem:[%s6935_s11 + $0x188] sm:$0xff] %v5184_v51   ;;  %5749 = vst [vmem:[%s6935_s11 + $0x3b8] sm:$0xff] %v5534_v52   ;;  %v1790_v55 = vadd.f32 %v7419_v63, %v1789_v53  ;;  %v6134_v56 = vpop.f32.mrb[201].mxu0  ;;  %v2350_v57 = vadd.f32 %v7419_v63, %v2349_v54  ;;  %v6414_v58 = vpop.f32.mrb[201].mxu1 }
 0x28b   : > { %v1792_v59 = vpop.f32.mrb[202].mxu0  ;;  %v2352_v60 = vpop.f32.mrb[202].mxu1 }
 0x28c   : > { %v1793_v61 = vadd.f32 %v7419_v63, %v1792_v59  ;;  %v6135_v62 = vpop.f32.mrb[203].mxu0  ;;  %v2740_v0 = vmax.f32 %v2350_v57, 0.0  ;;  %v2353_v2 = vadd.f32 %v7419_v63, %v2352_v60  ;;  %v6415_v3 = vpop.f32.mrb[203].mxu1  ;;  %v2600_v4 = vmax.f32 %v1790_v55, 0.0 }
 0x28e   : > { %v2601_v5 = vmax.f32 %v1793_v61, 0.0  ;;  %v2741_v6 = vmax.f32 %v2353_v2, 0.0 }
 0x290   : > { %v5189_v7 = vpack.c.bf16 %v2601_v5, %v2600_v4  ;;  %v5539_v8 = vpack.c.bf16 %v2741_v6, %v2740_v0 }
 0x291   : > { %v1797_v9 = vpop.f32.mrb[204].mxu0  ;;  %v2357_v10 = vpop.f32.mrb[204].mxu1 }
 0x292   : > { %5680 = vst [vmem:[%s6935_s11 + $0x190] sm:$0xff] %v5189_v7   ;;  %5750 = vst [vmem:[%s6935_s11 + $0x3c0] sm:$0xff] %v5539_v8   ;;  %v1798_v11 = vadd.f32 %v7419_v63, %v1797_v9  ;;  %v6138_v12 = vpop.f32.mrb[205].mxu0  ;;  %v2358_v13 = vadd.f32 %v7419_v63, %v2357_v10  ;;  %v6418_v14 = vpop.f32.mrb[205].mxu1 }
 0x293   : > { %v1800_v15 = vpop.f32.mrb[206].mxu0  ;;  %v2360_v16 = vpop.f32.mrb[206].mxu1 }
 0x294   : > { %v1801_v17 = vadd.f32 %v7419_v63, %v1800_v15  ;;  %v6139_v18 = vpop.f32.mrb[207].mxu0  ;;  %v2742_v19 = vmax.f32 %v2358_v13, 0.0  ;;  %v2361_v20 = vadd.f32 %v7419_v63, %v2360_v16  ;;  %v6419_v21 = vpop.f32.mrb[207].mxu1  ;;  %v2602_v22 = vmax.f32 %v1798_v11, 0.0 }
 0x296   : > { %v2603_v23 = vmax.f32 %v1801_v17, 0.0  ;;  %v2743_v24 = vmax.f32 %v2361_v20, 0.0 }
 0x298   : > { %v5194_v25 = vpack.c.bf16 %v2603_v23, %v2602_v22  ;;  %v5544_v26 = vpack.c.bf16 %v2743_v24, %v2742_v19 }
 0x299   : > { %v1805_v27 = vpop.f32.mrb[208].mxu0  ;;  %v2365_v28 = vpop.f32.mrb[208].mxu1 }
 0x29a   : > { %5681 = vst [vmem:[%s6935_s11 + $0x198] sm:$0xff] %v5194_v25   ;;  %5751 = vst [vmem:[%s6935_s11 + $0x3c8] sm:$0xff] %v5544_v26   ;;  %v1806_v29 = vadd.f32 %v7419_v63, %v1805_v27  ;;  %v6142_v30 = vpop.f32.mrb[209].mxu0  ;;  %v2366_v31 = vadd.f32 %v7419_v63, %v2365_v28  ;;  %v6422_v32 = vpop.f32.mrb[209].mxu1 }
 0x29b   : > { %v1808_v33 = vpop.f32.mrb[210].mxu0  ;;  %v2368_v34 = vpop.f32.mrb[210].mxu1 }
 0x29c   : > { %v1809_v35 = vadd.f32 %v7419_v63, %v1808_v33  ;;  %v6143_v36 = vpop.f32.mrb[211].mxu0  ;;  %v2744_v37 = vmax.f32 %v2366_v31, 0.0  ;;  %v2369_v38 = vadd.f32 %v7419_v63, %v2368_v34  ;;  %v6423_v39 = vpop.f32.mrb[211].mxu1  ;;  %v2604_v40 = vmax.f32 %v1806_v29, 0.0 }
 0x29e   : > { %v2605_v41 = vmax.f32 %v1809_v35, 0.0  ;;  %v2745_v42 = vmax.f32 %v2369_v38, 0.0 }
 0x2a0   : > { %v5199_v43 = vpack.c.bf16 %v2605_v41, %v2604_v40  ;;  %v5549_v44 = vpack.c.bf16 %v2745_v42, %v2744_v37 }
 0x2a1   : > { %v1813_v1 = vpop.f32.mrb[212].mxu0  ;;  %v2373_v45 = vpop.f32.mrb[212].mxu1 }
 0x2a2   : > { %5682 = vst [vmem:[%s6935_s11 + $0x1a0] sm:$0xff] %v5199_v43   ;;  %5752 = vst [vmem:[%s6935_s11 + $0x3d0] sm:$0xff] %v5549_v44   ;;  %v1814_v46 = vadd.f32 %v7419_v63, %v1813_v1  ;;  %v6146_v47 = vpop.f32.mrb[213].mxu0  ;;  %v2374_v48 = vadd.f32 %v7419_v63, %v2373_v45  ;;  %v6426_v49 = vpop.f32.mrb[213].mxu1 }
 0x2a3   : > { %v1816_v50 = vpop.f32.mrb[214].mxu0  ;;  %v2376_v51 = vpop.f32.mrb[214].mxu1 }
 0x2a4   : > { %v1817_v52 = vadd.f32 %v7419_v63, %v1816_v50  ;;  %v6147_v53 = vpop.f32.mrb[215].mxu0  ;;  %v2746_v54 = vmax.f32 %v2374_v48, 0.0  ;;  %v2377_v55 = vadd.f32 %v7419_v63, %v2376_v51  ;;  %v6427_v56 = vpop.f32.mrb[215].mxu1  ;;  %v2606_v57 = vmax.f32 %v1814_v46, 0.0 }
 0x2a6   : > { %v2607_v58 = vmax.f32 %v1817_v52, 0.0  ;;  %v2747_v59 = vmax.f32 %v2377_v55, 0.0 }
 0x2a8   : > { %v5204_v60 = vpack.c.bf16 %v2607_v58, %v2606_v57  ;;  %v5554_v61 = vpack.c.bf16 %v2747_v59, %v2746_v54 }
 0x2a9   : > { %v1821_v62 = vpop.f32.mrb[216].mxu0  ;;  %v2381_v0 = vpop.f32.mrb[216].mxu1 }
 0x2aa   : > { %5683 = vst [vmem:[%s6935_s11 + $0x1a8] sm:$0xff] %v5204_v60   ;;  %5753 = vst [vmem:[%s6935_s11 + $0x3d8] sm:$0xff] %v5554_v61   ;;  %v1822_v2 = vadd.f32 %v7419_v63, %v1821_v62  ;;  %v6150_v3 = vpop.f32.mrb[217].mxu0  ;;  %v2382_v4 = vadd.f32 %v7419_v63, %v2381_v0  ;;  %v6430_v5 = vpop.f32.mrb[217].mxu1 }
 0x2ab   : > { %v1824_v6 = vpop.f32.mrb[218].mxu0  ;;  %v2384_v7 = vpop.f32.mrb[218].mxu1 }
 0x2ac   : > { %v1825_v8 = vadd.f32 %v7419_v63, %v1824_v6  ;;  %v6151_v9 = vpop.f32.mrb[219].mxu0  ;;  %v2748_v10 = vmax.f32 %v2382_v4, 0.0  ;;  %v2385_v11 = vadd.f32 %v7419_v63, %v2384_v7  ;;  %v6431_v12 = vpop.f32.mrb[219].mxu1  ;;  %v2608_v13 = vmax.f32 %v1822_v2, 0.0 }
 0x2ae   : > { %v2609_v14 = vmax.f32 %v1825_v8, 0.0  ;;  %v2749_v15 = vmax.f32 %v2385_v11, 0.0 }
 0x2b0   : > { %v5209_v16 = vpack.c.bf16 %v2609_v14, %v2608_v13  ;;  %v5559_v17 = vpack.c.bf16 %v2749_v15, %v2748_v10 }
 0x2b1   : > { %v1829_v18 = vpop.f32.mrb[220].mxu0  ;;  %v2389_v19 = vpop.f32.mrb[220].mxu1 }
 0x2b2   : > { %5684 = vst [vmem:[%s6935_s11 + $0x1b0] sm:$0xff] %v5209_v16   ;;  %5754 = vst [vmem:[%s6935_s11 + $0x3e0] sm:$0xff] %v5559_v17   ;;  %v1830_v20 = vadd.f32 %v7419_v63, %v1829_v18  ;;  %v6154_v21 = vpop.f32.mrb[221].mxu0  ;;  %v2390_v22 = vadd.f32 %v7419_v63, %v2389_v19  ;;  %v6434_v23 = vpop.f32.mrb[221].mxu1 }
 0x2b3   : > { %v1832_v24 = vpop.f32.mrb[222].mxu0  ;;  %v2392_v25 = vpop.f32.mrb[222].mxu1 }
 0x2b4   : > { %v1833_v26 = vadd.f32 %v7419_v63, %v1832_v24  ;;  %v6155_v27 = vpop.f32.mrb[223].mxu0  ;;  %v2750_v28 = vmax.f32 %v2390_v22, 0.0  ;;  %v2393_v29 = vadd.f32 %v7419_v63, %v2392_v25  ;;  %v6435_v30 = vpop.f32.mrb[223].mxu1  ;;  %v2610_v31 = vmax.f32 %v1830_v20, 0.0 }
 0x2b6   : > { %v2611_v32 = vmax.f32 %v1833_v26, 0.0  ;;  %v2751_v33 = vmax.f32 %v2393_v29, 0.0 }
 0x2b8   : > { %v5214_v34 = vpack.c.bf16 %v2611_v32, %v2610_v31  ;;  %v5564_v35 = vpack.c.bf16 %v2751_v33, %v2750_v28 }
 0x2b9   : > { %v1837_v36 = vpop.f32.mrb[224].mxu0  ;;  %v2397_v37 = vpop.f32.mrb[224].mxu1 }
 0x2ba   : > { %5685 = vst [vmem:[%s6935_s11 + $0x1b8] sm:$0xff] %v5214_v34   ;;  %5755 = vst [vmem:[%s6935_s11 + $0x3e8] sm:$0xff] %v5564_v35   ;;  %v1838_v38 = vadd.f32 %v7419_v63, %v1837_v36  ;;  %v6158_v39 = vpop.f32.mrb[225].mxu0  ;;  %v2398_v40 = vadd.f32 %v7419_v63, %v2397_v37  ;;  %v6438_v41 = vpop.f32.mrb[225].mxu1 }
 0x2bb   : > { %v1840_v42 = vpop.f32.mrb[226].mxu0  ;;  %v2400_v43 = vpop.f32.mrb[226].mxu1 }
 0x2bc   : > { %v1841_v44 = vadd.f32 %v7419_v63, %v1840_v42  ;;  %v6159_v1 = vpop.f32.mrb[227].mxu0  ;;  %v2752_v45 = vmax.f32 %v2398_v40, 0.0  ;;  %v2401_v46 = vadd.f32 %v7419_v63, %v2400_v43  ;;  %v6439_v47 = vpop.f32.mrb[227].mxu1  ;;  %v2612_v48 = vmax.f32 %v1838_v38, 0.0 }
 0x2be   : > { %v2613_v49 = vmax.f32 %v1841_v44, 0.0  ;;  %v2753_v50 = vmax.f32 %v2401_v46, 0.0 }
 0x2c0   : > { %v5219_v51 = vpack.c.bf16 %v2613_v49, %v2612_v48  ;;  %v5569_v52 = vpack.c.bf16 %v2753_v50, %v2752_v45 }
 0x2c1   : > { %v1845_v53 = vpop.f32.mrb[228].mxu0  ;;  %v2405_v54 = vpop.f32.mrb[228].mxu1 }
 0x2c2   : > { %5686 = vst [vmem:[%s6935_s11 + $0x1c0] sm:$0xff] %v5219_v51   ;;  %5756 = vst [vmem:[%s6935_s11 + $0x3f0] sm:$0xff] %v5569_v52   ;;  %v1846_v55 = vadd.f32 %v7419_v63, %v1845_v53  ;;  %v6162_v56 = vpop.f32.mrb[229].mxu0  ;;  %v2406_v57 = vadd.f32 %v7419_v63, %v2405_v54  ;;  %v6442_v58 = vpop.f32.mrb[229].mxu1 }
 0x2c3   : > { %v1848_v59 = vpop.f32.mrb[230].mxu0  ;;  %v2408_v60 = vpop.f32.mrb[230].mxu1 }
 0x2c4   : > { %v1849_v61 = vadd.f32 %v7419_v63, %v1848_v59  ;;  %v6163_v62 = vpop.f32.mrb[231].mxu0  ;;  %v2754_v0 = vmax.f32 %v2406_v57, 0.0  ;;  %v2409_v2 = vadd.f32 %v7419_v63, %v2408_v60  ;;  %v6443_v3 = vpop.f32.mrb[231].mxu1  ;;  %v2614_v4 = vmax.f32 %v1846_v55, 0.0 }
 0x2c6   : > { %v2615_v5 = vmax.f32 %v1849_v61, 0.0  ;;  %v2755_v6 = vmax.f32 %v2409_v2, 0.0 }
 0x2c8   : > { %v5224_v7 = vpack.c.bf16 %v2615_v5, %v2614_v4  ;;  %v5574_v8 = vpack.c.bf16 %v2755_v6, %v2754_v0 }
 0x2c9   : > { %v1853_v9 = vpop.f32.mrb[232].mxu0  ;;  %v2413_v10 = vpop.f32.mrb[232].mxu1 }
 0x2ca   : > { %5687 = vst [vmem:[%s6935_s11 + $0x1c8] sm:$0xff] %v5224_v7   ;;  %5757 = vst [vmem:[%s6935_s11 + $0x3f8] sm:$0xff] %v5574_v8   ;;  %v1854_v11 = vadd.f32 %v7419_v63, %v1853_v9  ;;  %v6166_v12 = vpop.f32.mrb[233].mxu0  ;;  %v2414_v13 = vadd.f32 %v7419_v63, %v2413_v10  ;;  %v6446_v14 = vpop.f32.mrb[233].mxu1 }
 0x2cb   : > { %v1856_v15 = vpop.f32.mrb[234].mxu0  ;;  %v2416_v16 = vpop.f32.mrb[234].mxu1 }
 0x2cc   : > { %v1857_v17 = vadd.f32 %v7419_v63, %v1856_v15  ;;  %v6167_v18 = vpop.f32.mrb[235].mxu0  ;;  %v2756_v19 = vmax.f32 %v2414_v13, 0.0  ;;  %v2417_v20 = vadd.f32 %v7419_v63, %v2416_v16  ;;  %v6447_v21 = vpop.f32.mrb[235].mxu1  ;;  %v2616_v22 = vmax.f32 %v1854_v11, 0.0 }
 0x2ce   : > { %v2617_v23 = vmax.f32 %v1857_v17, 0.0  ;;  %v2757_v24 = vmax.f32 %v2417_v20, 0.0 }
 0x2d0   : > { %v5229_v25 = vpack.c.bf16 %v2617_v23, %v2616_v22  ;;  %v5579_v26 = vpack.c.bf16 %v2757_v24, %v2756_v19 }
 0x2d1   : > { %v1861_v27 = vpop.f32.mrb[236].mxu0  ;;  %v2421_v28 = vpop.f32.mrb[236].mxu1 }
 0x2d2   : > { %5688 = vst [vmem:[%s6935_s11 + $0x1d0] sm:$0xff] %v5229_v25   ;;  %5758 = vst [vmem:[%s6935_s11 + $0x400] sm:$0xff] %v5579_v26   ;;  %v1862_v29 = vadd.f32 %v7419_v63, %v1861_v27  ;;  %v6170_v30 = vpop.f32.mrb[237].mxu0  ;;  %v2422_v31 = vadd.f32 %v7419_v63, %v2421_v28  ;;  %v6450_v32 = vpop.f32.mrb[237].mxu1 }
 0x2d3   : > { %v1864_v33 = vpop.f32.mrb[238].mxu0  ;;  %v2424_v34 = vpop.f32.mrb[238].mxu1 }
 0x2d4   : > { %v1865_v35 = vadd.f32 %v7419_v63, %v1864_v33  ;;  %v6171_v36 = vpop.f32.mrb[239].mxu0  ;;  %v2758_v37 = vmax.f32 %v2422_v31, 0.0  ;;  %v2425_v38 = vadd.f32 %v7419_v63, %v2424_v34  ;;  %v6451_v39 = vpop.f32.mrb[239].mxu1  ;;  %v2618_v40 = vmax.f32 %v1862_v29, 0.0 }
 0x2d6   : > { %v2619_v41 = vmax.f32 %v1865_v35, 0.0  ;;  %v2759_v42 = vmax.f32 %v2425_v38, 0.0 }
 0x2d8   : > { %v5234_v43 = vpack.c.bf16 %v2619_v41, %v2618_v40  ;;  %v5584_v44 = vpack.c.bf16 %v2759_v42, %v2758_v37 }
 0x2d9   : > { %v1869_v1 = vpop.f32.mrb[240].mxu0  ;;  %v2429_v45 = vpop.f32.mrb[240].mxu1 }
 0x2da   : > { %5689 = vst [vmem:[%s6935_s11 + $0x1d8] sm:$0xff] %v5234_v43   ;;  %5759 = vst [vmem:[%s6935_s11 + $0x408] sm:$0xff] %v5584_v44   ;;  %v1870_v46 = vadd.f32 %v7419_v63, %v1869_v1  ;;  %v6174_v47 = vpop.f32.mrb[241].mxu0  ;;  %v2430_v48 = vadd.f32 %v7419_v63, %v2429_v45  ;;  %v6454_v49 = vpop.f32.mrb[241].mxu1 }
 0x2db   : > { %v1872_v50 = vpop.f32.mrb[242].mxu0  ;;  %v2432_v51 = vpop.f32.mrb[242].mxu1 }
 0x2dc   : > { %v1873_v52 = vadd.f32 %v7419_v63, %v1872_v50  ;;  %v6175_v53 = vpop.f32.mrb[243].mxu0  ;;  %v2760_v54 = vmax.f32 %v2430_v48, 0.0  ;;  %v2433_v55 = vadd.f32 %v7419_v63, %v2432_v51  ;;  %v6455_v56 = vpop.f32.mrb[243].mxu1  ;;  %v2620_v57 = vmax.f32 %v1870_v46, 0.0 }
 0x2de   : > { %v2621_v58 = vmax.f32 %v1873_v52, 0.0  ;;  %v2761_v59 = vmax.f32 %v2433_v55, 0.0 }
 0x2e0   : > { %v5239_v60 = vpack.c.bf16 %v2621_v58, %v2620_v57  ;;  %v5589_v61 = vpack.c.bf16 %v2761_v59, %v2760_v54 }
 0x2e1   : > { %v1877_v62 = vpop.f32.mrb[244].mxu0  ;;  %v2437_v0 = vpop.f32.mrb[244].mxu1 }
 0x2e2   : > { %5690 = vst [vmem:[%s6935_s11 + $0x1e0] sm:$0xff] %v5239_v60   ;;  %5760 = vst [vmem:[%s6935_s11 + $0x410] sm:$0xff] %v5589_v61   ;;  %v1878_v2 = vadd.f32 %v7419_v63, %v1877_v62  ;;  %v6178_v3 = vpop.f32.mrb[245].mxu0  ;;  %v2438_v4 = vadd.f32 %v7419_v63, %v2437_v0  ;;  %v6458_v5 = vpop.f32.mrb[245].mxu1 }
 0x2e3   : > { %v1880_v6 = vpop.f32.mrb[246].mxu0  ;;  %v2440_v7 = vpop.f32.mrb[246].mxu1 }
 0x2e4   : > { %v1881_v8 = vadd.f32 %v7419_v63, %v1880_v6  ;;  %v6179_v9 = vpop.f32.mrb[247].mxu0  ;;  %v2762_v10 = vmax.f32 %v2438_v4, 0.0  ;;  %v2441_v11 = vadd.f32 %v7419_v63, %v2440_v7  ;;  %v6459_v12 = vpop.f32.mrb[247].mxu1  ;;  %v2622_v13 = vmax.f32 %v1878_v2, 0.0 }
 0x2e6   : > { %v2623_v14 = vmax.f32 %v1881_v8, 0.0  ;;  %v2763_v15 = vmax.f32 %v2441_v11, 0.0  ;;  %v7585_v11 = vld [vmem:[%s7619_s2] ss:$0 sm:$0xff] }
 0x2e8   : > { %v5244_v16 = vpack.c.bf16 %v2623_v14, %v2622_v13  ;;  %v5594_v17 = vpack.c.bf16 %v2763_v15, %v2762_v10 }
 0x2e9   : > { %v1885_v18 = vpop.f32.mrb[248].mxu0  ;;  %v2445_v19 = vpop.f32.mrb[248].mxu1 }
 0x2ea   : > { %5691 = vst [vmem:[%s6935_s11 + $0x1e8] sm:$0xff] %v5244_v16   ;;  %5761 = vst [vmem:[%s6935_s11 + $0x418] sm:$0xff] %v5594_v17   ;;  %v1886_v20 = vadd.f32 %v7419_v63, %v1885_v18  ;;  %v6182_v21 = vpop.f32.mrb[249].mxu0  ;;  %v2446_v22 = vadd.f32 %v7419_v63, %v2445_v19  ;;  %v6462_v23 = vpop.f32.mrb[249].mxu1 }
 0x2eb   : > { %v1888_v24 = vpop.f32.mrb[250].mxu0  ;;  %v2448_v25 = vpop.f32.mrb[250].mxu1 }
 0x2ec   : > { %v1889_v26 = vadd.f32 %v7419_v63, %v1888_v24  ;;  %v6183_v27 = vpop.f32.mrb[251].mxu0  ;;  %v2764_v28 = vmax.f32 %v2446_v22, 0.0  ;;  %v2449_v29 = vadd.f32 %v7419_v63, %v2448_v25  ;;  %v6463_v30 = vpop.f32.mrb[251].mxu1  ;;  %v2624_v31 = vmax.f32 %v1886_v20, 0.0 }
 0x2ee   : > { %v2625_v32 = vmax.f32 %v1889_v26, 0.0  ;;  %v2765_v33 = vmax.f32 %v2449_v29, 0.0 }
 0x2f0   : > { %v5249_v34 = vpack.c.bf16 %v2625_v32, %v2624_v31  ;;  %v5599_v35 = vpack.c.bf16 %v2765_v33, %v2764_v28 }
 0x2f1   : > { %v1893_v36 = vpop.f32.mrb[252].mxu0  ;;  %v2453_v37 = vpop.f32.mrb[252].mxu1 }
 0x2f2   : > { %5692 = vst [vmem:[%s6935_s11 + $0x1f0] sm:$0xff] %v5249_v34   ;;  %5762 = vst [vmem:[%s6935_s11 + $0x420] sm:$0xff] %v5599_v35   ;;  %v1894_v38 = vadd.f32 %v7419_v63, %v1893_v36  ;;  %v6186_v39 = vpop.f32.mrb[253].mxu0  ;;  %v2454_v40 = vadd.f32 %v7419_v63, %v2453_v37  ;;  %v6466_v41 = vpop.f32.mrb[253].mxu1 }
 0x2f3   : > { %v1896_v42 = vpop.f32.mrb[254].mxu0  ;;  %v2456_v43 = vpop.f32.mrb[254].mxu1 }
 0x2f4   : > { %v1897_v44 = vadd.f32 %v7419_v63, %v1896_v42  ;;  %v6187_v1 = vpop.f32.mrb[255].mxu0  ;;  %v2766_v45 = vmax.f32 %v2454_v40, 0.0  ;;  %v2457_v46 = vadd.f32 %v7419_v63, %v2456_v43  ;;  %v6467_v47 = vpop.f32.mrb[255].mxu1  ;;  %v2626_v48 = vmax.f32 %v1894_v38, 0.0 }
 0x2f6   : > { %v2627_v49 = vmax.f32 %v1897_v44, 0.0  ;;  %v2767_v50 = vmax.f32 %v2457_v46, 0.0 }
 0x2f8   : > { %v5254_v51 = vpack.c.bf16 %v2627_v49, %v2626_v48  ;;  %v5604_v52 = vpack.c.bf16 %v2767_v50, %v2766_v45 }
 0x2f9   : > { %v1901_v53 = vpop.f32.mrb[0].mxu0  ;;  %v2461_v54 = vpop.f32.mrb[0].mxu1 }
 0x2fa   : > { %5693 = vst [vmem:[%s6935_s11 + $0x1f8] sm:$0xff] %v5254_v51   ;;  %5763 = vst [vmem:[%s6935_s11 + $0x428] sm:$0xff] %v5604_v52   ;;  %v1902_v55 = vadd.f32 %v7419_v63, %v1901_v53  ;;  %v6190_v56 = vpop.f32.mrb[1].mxu0  ;;  %v2462_v57 = vadd.f32 %v7419_v63, %v2461_v54  ;;  %v6470_v58 = vpop.f32.mrb[1].mxu1 }
 0x2fb   : > { %v1904_v59 = vpop.f32.mrb[2].mxu0  ;;  %v2464_v60 = vpop.f32.mrb[2].mxu1 }
 0x2fc   : > { %v1905_v61 = vadd.f32 %v7419_v63, %v1904_v59  ;;  %v6191_v62 = vpop.f32.mrb[3].mxu0  ;;  %v2768_v0 = vmax.f32 %v2462_v57, 0.0  ;;  %v2465_v2 = vadd.f32 %v7419_v63, %v2464_v60  ;;  %v6471_v3 = vpop.f32.mrb[3].mxu1  ;;  %v2628_v4 = vmax.f32 %v1902_v55, 0.0 }
 0x2fe   : > { %v2629_v5 = vmax.f32 %v1905_v61, 0.0  ;;  %v2769_v6 = vmax.f32 %v2465_v2, 0.0 }
 0x300   : > { %v5259_v7 = vpack.c.bf16 %v2629_v5, %v2628_v4  ;;  %v5609_v8 = vpack.c.bf16 %v2769_v6, %v2768_v0 }
 0x301   : > { %v1909_v9 = vpop.f32.mrb[4].mxu0  ;;  %v2469_v10 = vpop.f32.mrb[4].mxu1 }
 0x302   : > { %5694 = vst [vmem:[%s6935_s11 + $0x200] sm:$0xff] %v5259_v7   ;;  %5764 = vst [vmem:[%s6935_s11 + $0x430] sm:$0xff] %v5609_v8   ;;  %v1910_v12 = vadd.f32 %v7585_v11, %v1909_v9  ;;  %v6194_v13 = vpop.f32.mrb[5].mxu0  ;;  %v2470_v63 = vadd.f32 %v7585_v11, %v2469_v10  ;;  %v6474_v14 = vpop.f32.mrb[5].mxu1 }
 0x303   : > { %v1912_v15 = vpop.f32.mrb[6].mxu0  ;;  %v2472_v16 = vpop.f32.mrb[6].mxu1 }
 0x304   : > { %v1913_v17 = vadd.f32 %v7585_v11, %v1912_v15  ;;  %v6195_v18 = vpop.f32.mrb[7].mxu0  ;;  %v2770_v19 = vmax.f32 %v2470_v63, 0.0  ;;  %v2473_v20 = vadd.f32 %v7585_v11, %v2472_v16  ;;  %v6475_v21 = vpop.f32.mrb[7].mxu1  ;;  %v2630_v22 = vmax.f32 %v1910_v12, 0.0 }
 0x306   : > { %v2631_v23 = vmax.f32 %v1913_v17, 0.0  ;;  %v2771_v24 = vmax.f32 %v2473_v20, 0.0 }
 0x308   : > { %v5264_v25 = vpack.c.bf16 %v2631_v23, %v2630_v22  ;;  %v5614_v26 = vpack.c.bf16 %v2771_v24, %v2770_v19 }
 0x309   : > { %v1917_v27 = vpop.f32.mrb[8].mxu0  ;;  %v2477_v28 = vpop.f32.mrb[8].mxu1 }
 0x30a   : > { %5695 = vst [vmem:[%s6935_s11 + $0x208] sm:$0xff] %v5264_v25   ;;  %5765 = vst [vmem:[%s6935_s11 + $0x438] sm:$0xff] %v5614_v26   ;;  %v1918_v29 = vadd.f32 %v7585_v11, %v1917_v27  ;;  %v6198_v30 = vpop.f32.mrb[9].mxu0  ;;  %v2478_v31 = vadd.f32 %v7585_v11, %v2477_v28  ;;  %v6478_v32 = vpop.f32.mrb[9].mxu1 }
 0x30b   : > { %v1920_v33 = vpop.f32.mrb[10].mxu0  ;;  %v2480_v34 = vpop.f32.mrb[10].mxu1 }
 0x30c   : > { %v1921_v35 = vadd.f32 %v7585_v11, %v1920_v33  ;;  %v6199_v36 = vpop.f32.mrb[11].mxu0  ;;  %v2772_v37 = vmax.f32 %v2478_v31, 0.0  ;;  %v2481_v38 = vadd.f32 %v7585_v11, %v2480_v34  ;;  %v6479_v39 = vpop.f32.mrb[11].mxu1  ;;  %v2632_v40 = vmax.f32 %v1918_v29, 0.0 }
 0x30e   : > { %v2633_v41 = vmax.f32 %v1921_v35, 0.0  ;;  %v2773_v42 = vmax.f32 %v2481_v38, 0.0 }
 0x310   : > { %v5269_v43 = vpack.c.bf16 %v2633_v41, %v2632_v40  ;;  %v5619_v44 = vpack.c.bf16 %v2773_v42, %v2772_v37 }
 0x311   : > { %v1925_v1 = vpop.f32.mrb[12].mxu0  ;;  %v2485_v45 = vpop.f32.mrb[12].mxu1 }
 0x312   : > { %5696 = vst [vmem:[%s6935_s11 + $0x210] sm:$0xff] %v5269_v43   ;;  %5766 = vst [vmem:[%s6935_s11 + $0x440] sm:$0xff] %v5619_v44   ;;  %v1926_v46 = vadd.f32 %v7585_v11, %v1925_v1  ;;  %v6202_v47 = vpop.f32.mrb[13].mxu0  ;;  %v2486_v48 = vadd.f32 %v7585_v11, %v2485_v45  ;;  %v6482_v49 = vpop.f32.mrb[13].mxu1 }
 0x313   : > { %v1928_v50 = vpop.f32.mrb[14].mxu0  ;;  %v2488_v51 = vpop.f32.mrb[14].mxu1 }
 0x314   : > { %v1929_v52 = vadd.f32 %v7585_v11, %v1928_v50  ;;  %v6203_v53 = vpop.f32.mrb[15].mxu0  ;;  %v2774_v54 = vmax.f32 %v2486_v48, 0.0  ;;  %v2489_v55 = vadd.f32 %v7585_v11, %v2488_v51  ;;  %v6483_v56 = vpop.f32.mrb[15].mxu1  ;;  %v2634_v57 = vmax.f32 %v1926_v46, 0.0 }
 0x316   : > { %v2635_v58 = vmax.f32 %v1929_v52, 0.0  ;;  %v2775_v59 = vmax.f32 %v2489_v55, 0.0 }
 0x318   : > { %v5274_v60 = vpack.c.bf16 %v2635_v58, %v2634_v57  ;;  %v5624_v61 = vpack.c.bf16 %v2775_v59, %v2774_v54 }
 0x319   : > { %v1933_v62 = vpop.f32.mrb[16].mxu0  ;;  %v2493_v0 = vpop.f32.mrb[16].mxu1 }
 0x31a   : > { %5697 = vst [vmem:[%s6935_s11 + $0x218] sm:$0xff] %v5274_v60   ;;  %5767 = vst [vmem:[%s6935_s11 + $0x448] sm:$0xff] %v5624_v61   ;;  %v1934_v2 = vadd.f32 %v7585_v11, %v1933_v62  ;;  %v6206_v3 = vpop.f32.mrb[17].mxu0  ;;  %v2494_v4 = vadd.f32 %v7585_v11, %v2493_v0  ;;  %v6486_v5 = vpop.f32.mrb[17].mxu1 }
 0x31b   : > { %v1936_v6 = vpop.f32.mrb[18].mxu0  ;;  %v2496_v7 = vpop.f32.mrb[18].mxu1 }
 0x31c   : > { %v1937_v8 = vadd.f32 %v7585_v11, %v1936_v6  ;;  %v6207_v9 = vpop.f32.mrb[19].mxu0  ;;  %v2776_v10 = vmax.f32 %v2494_v4, 0.0  ;;  %v2497_v12 = vadd.f32 %v7585_v11, %v2496_v7  ;;  %v6487_v13 = vpop.f32.mrb[19].mxu1  ;;  %v2636_v63 = vmax.f32 %v1934_v2, 0.0 }
 0x31e   : > { %v2637_v14 = vmax.f32 %v1937_v8, 0.0  ;;  %v2777_v15 = vmax.f32 %v2497_v12, 0.0 }
 0x320   : > { %v5279_v16 = vpack.c.bf16 %v2637_v14, %v2636_v63  ;;  %v5629_v17 = vpack.c.bf16 %v2777_v15, %v2776_v10 }
 0x321   : > { %v1941_v18 = vpop.f32.mrb[20].mxu0 }
 0x322   : > { %5698 = vst [vmem:[%s6935_s11 + $0x220] sm:$0xff] %v5279_v16   ;;  %5768 = vst [vmem:[%s6935_s11 + $0x450] sm:$0xff] %v5629_v17   ;;  %v1942_v19 = vadd.f32 %v7585_v11, %v1941_v18  ;;  %v6210_v20 = vpop.f32.mrb[21].mxu0 }
 0x323   : > { %v1944_v21 = vpop.f32.mrb[22].mxu0 }
 0x324   : > { %v1945_v22 = vadd.f32 %v7585_v11, %v1944_v21  ;;  %v6211_v23 = vpop.f32.mrb[23].mxu0  ;;  %v2638_v24 = vmax.f32 %v1942_v19, 0.0 }
 0x326   : > { %v2639_v25 = vmax.f32 %v1945_v22, 0.0 }
 0x328   : > { %v5284_v26 = vpack.c.bf16 %v2639_v25, %v2638_v24 }
 0x32a   : > { %5699 = vst [vmem:[%s6935_s11 + $0x228] sm:$0xff] %v5284_v26  }
 0x32b PF: > { %s13_s12 = sadd.s32 1, %s6671_s12  }
 0x32c   : > { %p10_p4 = scmp.ge.s32.totalorder %s13_s12, 4  }
 0x32e   :  { %12 = sbr.rel (!%p10_p4) target bundleno = 1 (0x1), region = 62 }

// kernel: net_forward.7
= control target key start
LH: loop header
LB: loop body
LE: loop exit
PB: predicated region body
PF: predicated region fallthrough
CT: control target
= control target key end

     0   :  { %s1895_s12 = smov 0   ;;  %s2088_s0 = inlined_call_operand.vmem [shape: bf16[2,544,128], index: 0, kind: input, shape index: {}]   ;;  %s2089_s1 = inlined_call_operand.vmem [shape: bf16[128,128], index: 1, kind: input, shape index: {}]   ;;  %s2090_s2 = inlined_call_operand.vmem [shape: f32[1,128], index: 2, kind: input, shape index: {}]   ;;  %s2091_s3 = inlined_call_operand.vmem [shape: bf16[2,544,128], index: 3, kind: output, shape index: {}]  }
   0x1 LB: > { %s1283_s13 = sadd.s32 4294967295, %s1873_s12   ;;  %p1287_p0 = scmp.ge.s32.totalorder %s1873_s12, 1  ;;  %s1873_s12 = sphi %s1895_s12, %s13_s12  }
   0x2   : > { %p137_p1 = scmp.lt.s32.totalorder %s1873_s12, 3 }
   0x4   : > { %p138_p2 = pnand %p1287_p0, %p137_p1 }
   0x5   : > { %v1825_v0 = vld [vmem:[%s2089_s1] sm:$0xff] (!%p138_p2)   ;;  %p161_p3 = scmp.lt.s32.totalorder (!%p138_p2), %s1283_s13, 1  ;;  %v1826_v1 = vld [vmem:[%s2089_s1 + $0x8] sm:$0xff] (!%p138_p2)   ;;  %v1827_v2 = vld [vmem:[%s2089_s1 + $0x10] sm:$0xff] (!%p138_p2)  }
   0x6   : > { %141 = sbr.rel (%p138_p2) target bundleno = 324 (0x144), region = 32  ;;  %1716 = vmatprep.subr.bf16.mxu0 (!%p138_p2), %v1825_v0  ;;  %1800 = vmatprep.subr.bf16.mxu1 (!%p138_p2), %v1825_v0  ;;  %v1828_v3 = vld [vmem:[%s2089_s1 + $0x18] sm:$0xff] (!%p138_p2)   ;;  %v1829_v6 = vld [vmem:[%s2089_s1 + $0x20] sm:$0xff] (!%p138_p2)   ;;  %v1830_v7 = vld [vmem:[%s2089_s1 + $0x28] sm:$0xff] (!%p138_p2)  }
   0x7   : > { %1717 = vmatpush3.bf16.msra.mxu0 (!%p138_p2), %v1825_v0  ;;  %1808 = vmatpush3.bf16.msra.mxu1 (!%p138_p2), %v1825_v0  ;;  %v1831_v8 = vld [vmem:[%s2089_s1 + $0x30] sm:$0xff] (!%p138_p2)   ;;  %v1832_v9 = vld [vmem:[%s2089_s1 + $0x38] sm:$0xff] (!%p138_p2)   ;;  %v1974_v42 = vld [vmem:[%s2090_s2] ss:$0 sm:$0xff] (!%p138_p2) }
   0x8   : > { %1718 = vmatprep.subr.bf16.mxu0 (!%p138_p2), %v1826_v1  ;;  %1801 = vmatprep.subr.bf16.mxu1 (!%p138_p2), %v1826_v1 }
   0xb   : > { %1719 = vmatpush3.bf16.msra.mxu0 (!%p138_p2), %v1826_v1  ;;  %1809 = vmatpush3.bf16.msra.mxu1 (!%p138_p2), %v1826_v1 }
   0xc   : > { %1720 = vmatprep.subr.bf16.mxu0 (!%p138_p2), %v1827_v2  ;;  %1802 = vmatprep.subr.bf16.mxu1 (!%p138_p2), %v1827_v2 }
   0xd   : > { %s2093_s13 = smov (!%p161_p3, %s1283_s13), 1 }
   0xe   : > { %s1816_s20 = smul.u32 272, %s2093_s13 }
   0xf   : > { %1721 = vmatpush3.bf16.msra.mxu0 %v1827_v2  ;;  %1810 = vmatpush3.bf16.msra.mxu1 %v1827_v2 }
  0x10   : > { %s1920_s23 = scalar_lea.vmem %s2088_s0, %s1816_s20  ;;  %1722 = vmatprep.subr.bf16.mxu0 %v1828_v3  ;;  %1803 = vmatprep.subr.bf16.mxu1 %v1828_v3  ;;  %s1989_s11 = scalar_lea.vmem %s2091_s3, %s1816_s20 }
  0x11   : > { %v1833_v4 = vld [vmem:[%s1920_s23] sm:$0xff]   ;;  %v1835_v5 = vld [vmem:[%s1920_s23 + $0x90] sm:$0xff]   ;;  %v1834_v10 = vld [vmem:[%s1920_s23 + $0x8] sm:$0xff]  }
  0x12   : > { %1732 = vmatprep.mubr.bf16.mxu0 %v1833_v4  ;;  %1768 = vmatprep.mubr.bf16.mxu1 %v1835_v5  ;;  %v1836_v11 = vld [vmem:[%s1920_s23 + $0x98] sm:$0xff]   ;;  %v1837_v12 = vld [vmem:[%s1920_s23 + $0x10] sm:$0xff]   ;;  %v1839_v13 = vld [vmem:[%s1920_s23 + $0xa0] sm:$0xff]  }
  0x13   : > { %1723 = vmatpush3.bf16.msra.mxu0 %v1828_v3  ;;  %1811 = vmatpush3.bf16.msra.mxu1 %v1828_v3  ;;  %v1838_v14 = vld [vmem:[%s1920_s23 + $0x18] sm:$0xff]   ;;  %v1840_v15 = vld [vmem:[%s1920_s23 + $0xa8] sm:$0xff]   ;;  %v1841_v16 = vld [vmem:[%s1920_s23 + $0x20] sm:$0xff]  }
  0x14   : > { %1724 = vmatprep.subr.bf16.mxu0 %v1829_v6  ;;  %1804 = vmatprep.subr.bf16.mxu1 %v1829_v6  ;;  %v1843_v17 = vld [vmem:[%s1920_s23 + $0xb0] sm:$0xff]   ;;  %v1842_v18 = vld [vmem:[%s1920_s23 + $0x28] sm:$0xff]   ;;  %v1844_v19 = vld [vmem:[%s1920_s23 + $0xb8] sm:$0xff]  }
  0x15   : > { %v1845_v20 = vld [vmem:[%s1920_s23 + $0x30] sm:$0xff]   ;;  %v1847_v21 = vld [vmem:[%s1920_s23 + $0xc0] sm:$0xff]   ;;  %v1846_v22 = vld [vmem:[%s1920_s23 + $0x38] sm:$0xff]  }
  0x16   : > { %v1848_v23 = vld [vmem:[%s1920_s23 + $0xc8] sm:$0xff]   ;;  %v1849_v24 = vld [vmem:[%s1920_s23 + $0x40] sm:$0xff]   ;;  %v1851_v25 = vld [vmem:[%s1920_s23 + $0xd0] sm:$0xff]  }
  0x17   : > { %1725 = vmatpush3.bf16.msra.mxu0 %v1829_v6  ;;  %1812 = vmatpush3.bf16.msra.mxu1 %v1829_v6  ;;  %v1850_v26 = vld [vmem:[%s1920_s23 + $0x48] sm:$0xff]   ;;  %v1852_v27 = vld [vmem:[%s1920_s23 + $0xd8] sm:$0xff]   ;;  %v1853_v28 = vld [vmem:[%s1920_s23 + $0x50] sm:$0xff]  }
  0x18   : > { %1726 = vmatprep.subr.bf16.mxu0 %v1830_v7  ;;  %1805 = vmatprep.subr.bf16.mxu1 %v1830_v7  ;;  %v1855_v29 = vld [vmem:[%s1920_s23 + $0xe0] sm:$0xff]   ;;  %v1854_v30 = vld [vmem:[%s1920_s23 + $0x58] sm:$0xff]   ;;  %v1856_v31 = vld [vmem:[%s1920_s23 + $0xe8] sm:$0xff]  }
  0x19   : > { %v1857_v32 = vld [vmem:[%s1920_s23 + $0x60] sm:$0xff]   ;;  %v1859_v33 = vld [vmem:[%s1920_s23 + $0xf0] sm:$0xff]   ;;  %v1858_v34 = vld [vmem:[%s1920_s23 + $0x68] sm:$0xff]  }
  0x1a   : > { %v1860_v35 = vld [vmem:[%s1920_s23 + $0xf8] sm:$0xff]   ;;  %v1861_v36 = vld [vmem:[%s1920_s23 + $0x70] sm:$0xff]   ;;  %v1863_v37 = vld [vmem:[%s1920_s23 + $0x100] sm:$0xff]  }
  0x1b   : > { %1727 = vmatpush3.bf16.msra.mxu0 %v1830_v7  ;;  %1813 = vmatpush3.bf16.msra.mxu1 %v1830_v7  ;;  %v1862_v38 = vld [vmem:[%s1920_s23 + $0x78] sm:$0xff]   ;;  %v1864_v39 = vld [vmem:[%s1920_s23 + $0x108] sm:$0xff]   ;;  %v1865_v40 = vld [vmem:[%s1920_s23 + $0x80] sm:$0xff]  }
  0x1c   : > { %1728 = vmatprep.subr.bf16.mxu0 %v1831_v8  ;;  %1806 = vmatprep.subr.bf16.mxu1 %v1831_v8  ;;  %v1866_v41 = vld [vmem:[%s1920_s23 + $0x88] sm:$0xff]  }
  0x1f   : > { %1729 = vmatpush3.bf16.msra.mxu0 %v1831_v8  ;;  %1814 = vmatpush3.bf16.msra.mxu1 %v1831_v8 }
  0x20   : > { %1730 = vmatprep.subr.bf16.mxu0 %v1832_v9  ;;  %1807 = vmatprep.subr.bf16.mxu1 %v1832_v9 }
  0x23   : > { %1731 = vmatpush3.bf16.msra.mxu0 %v1832_v9  ;;  %1815 = vmatpush3.bf16.msra.mxu1 %v1832_v9 }
  0x26   : > { %1733 = vmatmul.mubr.bf16.vlgmr.msra.gmra.mrb[0].mxu0 %v1834_v10  ;;  %1769 = vmatmul.mubr.bf16.vlgmr.msra.gmra.mrb[0].mxu1 %v1836_v11 }
  0x27   : > { %1736 = vmatprep.mubr.bf16.mxu0 %v1837_v12  ;;  %1772 = vmatprep.mubr.bf16.mxu1 %v1839_v13 }
  0x2e   : > { %1737 = vmatmul.mubr.bf16.gmra.mrb[4].mxu0 %v1838_v14  ;;  %1773 = vmatmul.mubr.bf16.gmra.mrb[4].mxu1 %v1840_v15 }
  0x2f   : > { %1740 = vmatprep.mubr.bf16.mxu0 %v1841_v16  ;;  %1776 = vmatprep.mubr.bf16.mxu1 %v1843_v17 }
  0x36   : > { %1741 = vmatmul.mubr.bf16.gmra.mrb[8].mxu0 %v1842_v18  ;;  %1777 = vmatmul.mubr.bf16.gmra.mrb[8].mxu1 %v1844_v19 }
  0x37   : > { %1744 = vmatprep.mubr.bf16.mxu0 %v1845_v20  ;;  %1780 = vmatprep.mubr.bf16.mxu1 %v1847_v21 }
  0x3e   : > { %1745 = vmatmul.mubr.bf16.gmra.mrb[12].mxu0 %v1846_v22  ;;  %1781 = vmatmul.mubr.bf16.gmra.mrb[12].mxu1 %v1848_v23 }
  0x3f   : > { %1748 = vmatprep.mubr.bf16.mxu0 %v1849_v24  ;;  %1784 = vmatprep.mubr.bf16.mxu1 %v1851_v25 }
  0x46   : > { %1749 = vmatmul.mubr.bf16.gmra.mrb[16].mxu0 %v1850_v26  ;;  %1785 = vmatmul.mubr.bf16.gmra.mrb[16].mxu1 %v1852_v27 }
  0x47   : > { %1752 = vmatprep.mubr.bf16.mxu0 %v1853_v28  ;;  %1788 = vmatprep.mubr.bf16.mxu1 %v1855_v29 }
  0x4e   : > { %1753 = vmatmul.mubr.bf16.gmra.mrb[20].mxu0 %v1854_v30  ;;  %1789 = vmatmul.mubr.bf16.gmra.mrb[20].mxu1 %v1856_v31 }
  0x4f   : > { %1756 = vmatprep.mubr.bf16.mxu0 %v1857_v32  ;;  %1792 = vmatprep.mubr.bf16.mxu1 %v1859_v33 }
  0x56   : > { %1757 = vmatmul.mubr.bf16.gmra.mrb[24].mxu0 %v1858_v34  ;;  %1793 = vmatmul.mubr.bf16.gmra.mrb[24].mxu1 %v1860_v35 }
  0x57   : > { %1760 = vmatprep.mubr.bf16.mxu0 %v1861_v36  ;;  %1796 = vmatprep.mubr.bf16.mxu1 %v1863_v37 }
  0x5e   : > { %1761 = vmatmul.mubr.bf16.gmra.mrb[28].mxu0 %v1862_v38  ;;  %1797 = vmatmul.mubr.bf16.gmra.mrb[28].mxu1 %v1864_v39 }
  0x5f   : > { %1764 = vmatprep.mubr.bf16.mxu0 %v1865_v40 }
  0x66   : > { %1765 = vmatmul.mubr.bf16.gmra.mrb[32].mxu0 %v1866_v41 }
  0xf9   : > { %v1734_v43 = vpop.f32.mrb[0].mxu0  ;;  %v1770_v44 = vpop.f32.mrb[0].mxu1 }
  0xfa   : > { %v558_v45 = vadd.f32 %v1734_v43, %v1974_v42  ;;  %v549_v46 = vpop.f32.mrb[1].mxu0  ;;  %v702_v47 = vadd.f32 %v1770_v44, %v1974_v42  ;;  %v693_v48 = vpop.f32.mrb[1].mxu1 }
  0xfb   : > { %v550_v49 = vadd.f32 %v1974_v42, %v549_v46  ;;  %v1735_v50 = vpop.f32.mrb[2].mxu0  ;;  %v694_v51 = vadd.f32 %v1974_v42, %v693_v48  ;;  %v1771_v52 = vpop.f32.mrb[2].mxu1 }
  0xfc   : > { %v561_v53 = vadd.f32 %v1735_v50, %v1974_v42  ;;  %v552_v54 = vpop.f32.mrb[3].mxu0  ;;  %v858_v55 = vmax.f32 %v702_v47, 0.0  ;;  %v705_v56 = vadd.f32 %v1771_v52, %v1974_v42  ;;  %v696_v57 = vpop.f32.mrb[3].mxu1  ;;  %v822_v61 = vmax.f32 %v558_v45, 0.0 }
  0xfd   : > { %v553_v58 = vadd.f32 %v1974_v42, %v552_v54  ;;  %v856_v59 = vmax.f32 %v694_v51, 0.0  ;;  %v697_v60 = vadd.f32 %v1974_v42, %v696_v57  ;;  %v820_v0 = vmax.f32 %v550_v49, 0.0 }
  0xfe   : > { %v823_v62 = vmax.f32 %v561_v53, 0.0  ;;  %v859_v63 = vmax.f32 %v705_v56, 0.0 }
  0xff   : > { %v821_v1 = vmax.f32 %v553_v58, 0.0  ;;  %v857_v2 = vmax.f32 %v697_v60, 0.0 }
 0x100   : > { %v1479_v3 = vpack.c.bf16 %v823_v62, %v822_v61  ;;  %v1569_v4 = vpack.c.bf16 %v859_v63, %v858_v55 }
 0x101   : > { %v1474_v5 = vpack.c.bf16 %v821_v1, %v820_v0  ;;  %v1738_v6 = vpop.f32.mrb[4].mxu0  ;;  %v1564_v7 = vpack.c.bf16 %v857_v2, %v856_v59  ;;  %v1774_v8 = vpop.f32.mrb[4].mxu1 }
 0x102   : > { %1641 = vst [vmem:[%s1989_s11 + $0x8] sm:$0xff] %v1479_v3   ;;  %1659 = vst [vmem:[%s1989_s11 + $0x98] sm:$0xff] %v1569_v4   ;;  %v574_v9 = vadd.f32 %v1738_v6, %v1974_v42  ;;  %v565_v10 = vpop.f32.mrb[5].mxu0  ;;  %v718_v11 = vadd.f32 %v1774_v8, %v1974_v42  ;;  %v709_v12 = vpop.f32.mrb[5].mxu1 }
 0x103   : > { %1475 = vst [vmem:[%s1989_s11] sm:$0xff] %v1474_v5   ;;  %1658 = vst [vmem:[%s1989_s11 + $0x90] sm:$0xff] %v1564_v7   ;;  %v566_v13 = vadd.f32 %v1974_v42, %v565_v10  ;;  %v1739_v14 = vpop.f32.mrb[6].mxu0  ;;  %v710_v15 = vadd.f32 %v1974_v42, %v709_v12  ;;  %v1775_v16 = vpop.f32.mrb[6].mxu1 }
 0x104   : > { %v577_v17 = vadd.f32 %v1739_v14, %v1974_v42  ;;  %v568_v18 = vpop.f32.mrb[7].mxu0  ;;  %v862_v19 = vmax.f32 %v718_v11, 0.0  ;;  %v721_v20 = vadd.f32 %v1775_v16, %v1974_v42  ;;  %v712_v21 = vpop.f32.mrb[7].mxu1  ;;  %v826_v25 = vmax.f32 %v574_v9, 0.0 }
 0x105   : > { %v569_v22 = vadd.f32 %v1974_v42, %v568_v18  ;;  %v860_v23 = vmax.f32 %v710_v15, 0.0  ;;  %v713_v24 = vadd.f32 %v1974_v42, %v712_v21  ;;  %v824_v28 = vmax.f32 %v566_v13, 0.0 }
 0x106   : > { %v827_v26 = vmax.f32 %v577_v17, 0.0  ;;  %v863_v27 = vmax.f32 %v721_v20, 0.0 }
 0x107   : > { %v825_v29 = vmax.f32 %v569_v22, 0.0  ;;  %v861_v30 = vmax.f32 %v713_v24, 0.0 }
 0x108   : > { %v1489_v31 = vpack.c.bf16 %v827_v26, %v826_v25  ;;  %v1579_v32 = vpack.c.bf16 %v863_v27, %v862_v19 }
 0x109   : > { %v1484_v33 = vpack.c.bf16 %v825_v29, %v824_v28  ;;  %v1742_v34 = vpop.f32.mrb[8].mxu0  ;;  %v1574_v35 = vpack.c.bf16 %v861_v30, %v860_v23  ;;  %v1778_v36 = vpop.f32.mrb[8].mxu1 }
 0x10a   : > { %1643 = vst [vmem:[%s1989_s11 + $0x18] sm:$0xff] %v1489_v31   ;;  %1661 = vst [vmem:[%s1989_s11 + $0xa8] sm:$0xff] %v1579_v32   ;;  %v590_v37 = vadd.f32 %v1742_v34, %v1974_v42  ;;  %v581_v38 = vpop.f32.mrb[9].mxu0  ;;  %v734_v39 = vadd.f32 %v1778_v36, %v1974_v42  ;;  %v725_v40 = vpop.f32.mrb[9].mxu1 }
 0x10b   : > { %1642 = vst [vmem:[%s1989_s11 + $0x10] sm:$0xff] %v1484_v33   ;;  %1660 = vst [vmem:[%s1989_s11 + $0xa0] sm:$0xff] %v1574_v35   ;;  %v582_v41 = vadd.f32 %v1974_v42, %v581_v38  ;;  %v1743_v43 = vpop.f32.mrb[10].mxu0  ;;  %v726_v44 = vadd.f32 %v1974_v42, %v725_v40  ;;  %v1779_v45 = vpop.f32.mrb[10].mxu1 }
 0x10c   : > { %v593_v46 = vadd.f32 %v1743_v43, %v1974_v42  ;;  %v584_v47 = vpop.f32.mrb[11].mxu0  ;;  %v866_v48 = vmax.f32 %v734_v39, 0.0  ;;  %v737_v49 = vadd.f32 %v1779_v45, %v1974_v42  ;;  %v728_v50 = vpop.f32.mrb[11].mxu1  ;;  %v830_v54 = vmax.f32 %v590_v37, 0.0 }
 0x10d   : > { %v585_v51 = vadd.f32 %v1974_v42, %v584_v47  ;;  %v864_v52 = vmax.f32 %v726_v44, 0.0  ;;  %v729_v53 = vadd.f32 %v1974_v42, %v728_v50  ;;  %v828_v57 = vmax.f32 %v582_v41, 0.0 }
 0x10e   : > { %v831_v55 = vmax.f32 %v593_v46, 0.0  ;;  %v867_v56 = vmax.f32 %v737_v49, 0.0 }
 0x10f   : > { %v829_v58 = vmax.f32 %v585_v51, 0.0  ;;  %v865_v59 = vmax.f32 %v729_v53, 0.0 }
 0x110   : > { %v1499_v60 = vpack.c.bf16 %v831_v55, %v830_v54  ;;  %v1589_v61 = vpack.c.bf16 %v867_v56, %v866_v48 }
 0x111   : > { %v1494_v62 = vpack.c.bf16 %v829_v58, %v828_v57  ;;  %v1746_v63 = vpop.f32.mrb[12].mxu0  ;;  %v1584_v0 = vpack.c.bf16 %v865_v59, %v864_v52  ;;  %v1782_v1 = vpop.f32.mrb[12].mxu1 }
 0x112   : > { %1645 = vst [vmem:[%s1989_s11 + $0x28] sm:$0xff] %v1499_v60   ;;  %1663 = vst [vmem:[%s1989_s11 + $0xb8] sm:$0xff] %v1589_v61   ;;  %v606_v2 = vadd.f32 %v1746_v63, %v1974_v42  ;;  %v597_v3 = vpop.f32.mrb[13].mxu0  ;;  %v750_v4 = vadd.f32 %v1782_v1, %v1974_v42  ;;  %v741_v5 = vpop.f32.mrb[13].mxu1 }
 0x113   : > { %1644 = vst [vmem:[%s1989_s11 + $0x20] sm:$0xff] %v1494_v62   ;;  %1662 = vst [vmem:[%s1989_s11 + $0xb0] sm:$0xff] %v1584_v0   ;;  %v598_v6 = vadd.f32 %v1974_v42, %v597_v3  ;;  %v1747_v7 = vpop.f32.mrb[14].mxu0  ;;  %v742_v8 = vadd.f32 %v1974_v42, %v741_v5  ;;  %v1783_v9 = vpop.f32.mrb[14].mxu1 }
 0x114   : > { %v609_v10 = vadd.f32 %v1747_v7, %v1974_v42  ;;  %v600_v11 = vpop.f32.mrb[15].mxu0  ;;  %v870_v12 = vmax.f32 %v750_v4, 0.0  ;;  %v753_v13 = vadd.f32 %v1783_v9, %v1974_v42  ;;  %v744_v14 = vpop.f32.mrb[15].mxu1  ;;  %v834_v18 = vmax.f32 %v606_v2, 0.0 }
 0x115   : > { %v601_v15 = vadd.f32 %v1974_v42, %v600_v11  ;;  %v868_v16 = vmax.f32 %v742_v8, 0.0  ;;  %v745_v17 = vadd.f32 %v1974_v42, %v744_v14  ;;  %v832_v21 = vmax.f32 %v598_v6, 0.0 }
 0x116   : > { %v835_v19 = vmax.f32 %v609_v10, 0.0  ;;  %v871_v20 = vmax.f32 %v753_v13, 0.0 }
 0x117   : > { %v833_v22 = vmax.f32 %v601_v15, 0.0  ;;  %v869_v23 = vmax.f32 %v745_v17, 0.0 }
 0x118   : > { %v1509_v24 = vpack.c.bf16 %v835_v19, %v834_v18  ;;  %v1599_v25 = vpack.c.bf16 %v871_v20, %v870_v12 }
 0x119   : > { %v1504_v26 = vpack.c.bf16 %v833_v22, %v832_v21  ;;  %v1750_v27 = vpop.f32.mrb[16].mxu0  ;;  %v1594_v28 = vpack.c.bf16 %v869_v23, %v868_v16  ;;  %v1786_v29 = vpop.f32.mrb[16].mxu1 }
 0x11a   : > { %1647 = vst [vmem:[%s1989_s11 + $0x38] sm:$0xff] %v1509_v24   ;;  %1665 = vst [vmem:[%s1989_s11 + $0xc8] sm:$0xff] %v1599_v25   ;;  %v622_v30 = vadd.f32 %v1750_v27, %v1974_v42  ;;  %v613_v31 = vpop.f32.mrb[17].mxu0  ;;  %v766_v32 = vadd.f32 %v1786_v29, %v1974_v42  ;;  %v757_v33 = vpop.f32.mrb[17].mxu1 }
 0x11b   : > { %1646 = vst [vmem:[%s1989_s11 + $0x30] sm:$0xff] %v1504_v26   ;;  %1664 = vst [vmem:[%s1989_s11 + $0xc0] sm:$0xff] %v1594_v28   ;;  %v614_v34 = vadd.f32 %v1974_v42, %v613_v31  ;;  %v1751_v35 = vpop.f32.mrb[18].mxu0  ;;  %v758_v36 = vadd.f32 %v1974_v42, %v757_v33  ;;  %v1787_v37 = vpop.f32.mrb[18].mxu1 }
 0x11c   : > { %v625_v38 = vadd.f32 %v1751_v35, %v1974_v42  ;;  %v616_v39 = vpop.f32.mrb[19].mxu0  ;;  %v874_v40 = vmax.f32 %v766_v32, 0.0  ;;  %v769_v41 = vadd.f32 %v1787_v37, %v1974_v42  ;;  %v760_v43 = vpop.f32.mrb[19].mxu1  ;;  %v838_v47 = vmax.f32 %v622_v30, 0.0 }
 0x11d   : > { %v617_v44 = vadd.f32 %v1974_v42, %v616_v39  ;;  %v872_v45 = vmax.f32 %v758_v36, 0.0  ;;  %v761_v46 = vadd.f32 %v1974_v42, %v760_v43  ;;  %v836_v50 = vmax.f32 %v614_v34, 0.0 }
 0x11e   : > { %v839_v48 = vmax.f32 %v625_v38, 0.0  ;;  %v875_v49 = vmax.f32 %v769_v41, 0.0 }
 0x11f   : > { %v837_v51 = vmax.f32 %v617_v44, 0.0  ;;  %v873_v52 = vmax.f32 %v761_v46, 0.0 }
 0x120   : > { %v1519_v53 = vpack.c.bf16 %v839_v48, %v838_v47  ;;  %v1609_v54 = vpack.c.bf16 %v875_v49, %v874_v40 }
 0x121   : > { %v1514_v55 = vpack.c.bf16 %v837_v51, %v836_v50  ;;  %v1754_v56 = vpop.f32.mrb[20].mxu0  ;;  %v1604_v57 = vpack.c.bf16 %v873_v52, %v872_v45  ;;  %v1790_v58 = vpop.f32.mrb[20].mxu1 }
 0x122   : > { %1649 = vst [vmem:[%s1989_s11 + $0x48] sm:$0xff] %v1519_v53   ;;  %1667 = vst [vmem:[%s1989_s11 + $0xd8] sm:$0xff] %v1609_v54   ;;  %v638_v59 = vadd.f32 %v1754_v56, %v1974_v42  ;;  %v629_v60 = vpop.f32.mrb[21].mxu0  ;;  %v782_v61 = vadd.f32 %v1790_v58, %v1974_v42  ;;  %v773_v62 = vpop.f32.mrb[21].mxu1 }
 0x123   : > { %1648 = vst [vmem:[%s1989_s11 + $0x40] sm:$0xff] %v1514_v55   ;;  %1666 = vst [vmem:[%s1989_s11 + $0xd0] sm:$0xff] %v1604_v57   ;;  %v630_v63 = vadd.f32 %v1974_v42, %v629_v60  ;;  %v1755_v0 = vpop.f32.mrb[22].mxu0  ;;  %v774_v1 = vadd.f32 %v1974_v42, %v773_v62  ;;  %v1791_v2 = vpop.f32.mrb[22].mxu1 }
 0x124   : > { %v641_v3 = vadd.f32 %v1755_v0, %v1974_v42  ;;  %v632_v4 = vpop.f32.mrb[23].mxu0  ;;  %v878_v5 = vmax.f32 %v782_v61, 0.0  ;;  %v785_v6 = vadd.f32 %v1791_v2, %v1974_v42  ;;  %v776_v7 = vpop.f32.mrb[23].mxu1  ;;  %v842_v11 = vmax.f32 %v638_v59, 0.0 }
 0x125   : > { %v633_v8 = vadd.f32 %v1974_v42, %v632_v4  ;;  %v876_v9 = vmax.f32 %v774_v1, 0.0  ;;  %v777_v10 = vadd.f32 %v1974_v42, %v776_v7  ;;  %v840_v14 = vmax.f32 %v630_v63, 0.0 }
 0x126   : > { %v843_v12 = vmax.f32 %v641_v3, 0.0  ;;  %v879_v13 = vmax.f32 %v785_v6, 0.0 }
 0x127   : > { %v841_v15 = vmax.f32 %v633_v8, 0.0  ;;  %v877_v16 = vmax.f32 %v777_v10, 0.0 }
 0x128   : > { %v1529_v17 = vpack.c.bf16 %v843_v12, %v842_v11  ;;  %v1619_v18 = vpack.c.bf16 %v879_v13, %v878_v5 }
 0x129   : > { %v1524_v19 = vpack.c.bf16 %v841_v15, %v840_v14  ;;  %v1758_v20 = vpop.f32.mrb[24].mxu0  ;;  %v1614_v21 = vpack.c.bf16 %v877_v16, %v876_v9  ;;  %v1794_v22 = vpop.f32.mrb[24].mxu1 }
 0x12a   : > { %1651 = vst [vmem:[%s1989_s11 + $0x58] sm:$0xff] %v1529_v17   ;;  %1669 = vst [vmem:[%s1989_s11 + $0xe8] sm:$0xff] %v1619_v18   ;;  %v654_v23 = vadd.f32 %v1758_v20, %v1974_v42  ;;  %v645_v24 = vpop.f32.mrb[25].mxu0  ;;  %v798_v25 = vadd.f32 %v1794_v22, %v1974_v42  ;;  %v789_v26 = vpop.f32.mrb[25].mxu1 }
 0x12b   : > { %1650 = vst [vmem:[%s1989_s11 + $0x50] sm:$0xff] %v1524_v19   ;;  %1668 = vst [vmem:[%s1989_s11 + $0xe0] sm:$0xff] %v1614_v21   ;;  %v646_v27 = vadd.f32 %v1974_v42, %v645_v24  ;;  %v1759_v28 = vpop.f32.mrb[26].mxu0  ;;  %v790_v29 = vadd.f32 %v1974_v42, %v789_v26  ;;  %v1795_v30 = vpop.f32.mrb[26].mxu1 }
 0x12c   : > { %v657_v31 = vadd.f32 %v1759_v28, %v1974_v42  ;;  %v648_v32 = vpop.f32.mrb[27].mxu0  ;;  %v882_v33 = vmax.f32 %v798_v25, 0.0  ;;  %v801_v34 = vadd.f32 %v1795_v30, %v1974_v42  ;;  %v792_v35 = vpop.f32.mrb[27].mxu1  ;;  %v846_v39 = vmax.f32 %v654_v23, 0.0 }
 0x12d   : > { %v649_v36 = vadd.f32 %v1974_v42, %v648_v32  ;;  %v880_v37 = vmax.f32 %v790_v29, 0.0  ;;  %v793_v38 = vadd.f32 %v1974_v42, %v792_v35  ;;  %v844_v43 = vmax.f32 %v646_v27, 0.0 }
 0x12e   : > { %v847_v40 = vmax.f32 %v657_v31, 0.0  ;;  %v883_v41 = vmax.f32 %v801_v34, 0.0 }
 0x12f   : > { %v845_v44 = vmax.f32 %v649_v36, 0.0  ;;  %v881_v45 = vmax.f32 %v793_v38, 0.0 }
 0x130   : > { %v1539_v46 = vpack.c.bf16 %v847_v40, %v846_v39  ;;  %v1629_v47 = vpack.c.bf16 %v883_v41, %v882_v33 }
 0x131   : > { %v1534_v48 = vpack.c.bf16 %v845_v44, %v844_v43  ;;  %v1762_v49 = vpop.f32.mrb[28].mxu0  ;;  %v1624_v50 = vpack.c.bf16 %v881_v45, %v880_v37  ;;  %v1798_v51 = vpop.f32.mrb[28].mxu1 }
 0x132   : > { %1653 = vst [vmem:[%s1989_s11 + $0x68] sm:$0xff] %v1539_v46   ;;  %1671 = vst [vmem:[%s1989_s11 + $0xf8] sm:$0xff] %v1629_v47   ;;  %v670_v52 = vadd.f32 %v1762_v49, %v1974_v42  ;;  %v661_v53 = vpop.f32.mrb[29].mxu0  ;;  %v814_v54 = vadd.f32 %v1798_v51, %v1974_v42  ;;  %v805_v55 = vpop.f32.mrb[29].mxu1 }
 0x133   : > { %1652 = vst [vmem:[%s1989_s11 + $0x60] sm:$0xff] %v1534_v48   ;;  %1670 = vst [vmem:[%s1989_s11 + $0xf0] sm:$0xff] %v1624_v50   ;;  %v662_v56 = vadd.f32 %v1974_v42, %v661_v53  ;;  %v1763_v57 = vpop.f32.mrb[30].mxu0  ;;  %v806_v58 = vadd.f32 %v1974_v42, %v805_v55  ;;  %v1799_v59 = vpop.f32.mrb[30].mxu1 }
 0x134   : > { %v673_v60 = vadd.f32 %v1763_v57, %v1974_v42  ;;  %v664_v61 = vpop.f32.mrb[31].mxu0  ;;  %v886_v62 = vmax.f32 %v814_v54, 0.0  ;;  %v817_v63 = vadd.f32 %v1799_v59, %v1974_v42  ;;  %v808_v0 = vpop.f32.mrb[31].mxu1  ;;  %v850_v4 = vmax.f32 %v670_v52, 0.0 }
 0x135   : > { %v665_v1 = vadd.f32 %v1974_v42, %v664_v61  ;;  %v884_v2 = vmax.f32 %v806_v58, 0.0  ;;  %v809_v3 = vadd.f32 %v1974_v42, %v808_v0  ;;  %v848_v7 = vmax.f32 %v662_v56, 0.0 }
 0x136   : > { %v851_v5 = vmax.f32 %v673_v60, 0.0  ;;  %v887_v6 = vmax.f32 %v817_v63, 0.0 }
 0x137   : > { %v849_v8 = vmax.f32 %v665_v1, 0.0  ;;  %v885_v9 = vmax.f32 %v809_v3, 0.0 }
 0x138   : > { %v1549_v10 = vpack.c.bf16 %v851_v5, %v850_v4  ;;  %v1639_v11 = vpack.c.bf16 %v887_v6, %v886_v62 }
 0x139   : > { %v1544_v12 = vpack.c.bf16 %v849_v8, %v848_v7  ;;  %v1766_v13 = vpop.f32.mrb[32].mxu0  ;;  %v1634_v14 = vpack.c.bf16 %v885_v9, %v884_v2 }
 0x13a   : > { %1655 = vst [vmem:[%s1989_s11 + $0x78] sm:$0xff] %v1549_v10   ;;  %1673 = vst [vmem:[%s1989_s11 + $0x108] sm:$0xff] %v1639_v11   ;;  %v686_v15 = vadd.f32 %v1766_v13, %v1974_v42  ;;  %v677_v16 = vpop.f32.mrb[33].mxu0 }
 0x13b   : > { %1654 = vst [vmem:[%s1989_s11 + $0x70] sm:$0xff] %v1544_v12   ;;  %1672 = vst [vmem:[%s1989_s11 + $0x100] sm:$0xff] %v1634_v14   ;;  %v678_v17 = vadd.f32 %v1974_v42, %v677_v16  ;;  %v1767_v18 = vpop.f32.mrb[34].mxu0 }
 0x13c   : > { %v689_v19 = vadd.f32 %v1767_v18, %v1974_v42  ;;  %v680_v20 = vpop.f32.mrb[35].mxu0  ;;  %v854_v22 = vmax.f32 %v686_v15, 0.0 }
 0x13d   : > { %v681_v21 = vadd.f32 %v1974_v42, %v680_v20  ;;  %v852_v24 = vmax.f32 %v678_v17, 0.0 }
 0x13e   : > { %v855_v23 = vmax.f32 %v689_v19, 0.0 }
 0x13f   : > { %v853_v25 = vmax.f32 %v681_v21, 0.0 }
 0x140   : > { %v1559_v26 = vpack.c.bf16 %v855_v23, %v854_v22 }
 0x141   : > { %v1554_v27 = vpack.c.bf16 %v853_v25, %v852_v24 }
 0x142   : > { %1657 = vst [vmem:[%s1989_s11 + $0x88] sm:$0xff] %v1559_v26  }
 0x143   : > { %1656 = vst [vmem:[%s1989_s11 + $0x80] sm:$0xff] %v1554_v27  }
 0x144 PF: > { %s13_s12 = sadd.s32 1, %s1873_s12  }
 0x145   : > { %p10_p4 = scmp.ge.s32.totalorder %s13_s12, 4  }
 0x147   :  { %12 = sbr.rel (!%p10_p4) target bundleno = 1 (0x1), region = 62 }

// kernel: net_forward.8
= control target key start
LH: loop header
LB: loop body
LE: loop exit
PB: predicated region body
PF: predicated region fallthrough
CT: control target
= control target key end

     0   :  { %s1348_s1 = inlined_call_operand.vmem [shape: bf16[256,128], index: 1, kind: input, shape index: {}]   ;;  %s1349_s0 = inlined_call_operand.vmem [shape: bf16[256,256], index: 0, kind: input, shape index: {}]   ;;  %s1350_s2 = inlined_call_operand.vmem [shape: f32[1,128], index: 2, kind: input, shape index: {}]   ;;  %s1351_s3 = inlined_call_operand.vmem [shape: bf16[256,128], index: 3, kind: output, shape index: {}]  }
   0x1   :  { %v1035_v0 = vld [vmem:[%s1348_s1 + $0x40] sm:$0xff]   ;;  %v1037_v2 = vld [vmem:[%s1348_s1 + $0x48] sm:$0xff]   ;;  %v1039_v4 = vld [vmem:[%s1348_s1 + $0x50] sm:$0xff]  }
   0x2   :  { %v1036_v1 = vld [vmem:[%s1348_s1] sm:$0xff]   ;;  %907 = vmatprep.subr.bf16.mxu0 %v1035_v0  ;;  %1019 = vmatprep.subr.bf16.mxu1 %v1035_v0  ;;  %v1038_v3 = vld [vmem:[%s1348_s1 + $0x8] sm:$0xff]   ;;  %v1040_v5 = vld [vmem:[%s1348_s1 + $0x10] sm:$0xff]  }
   0x3   :  { %908 = vmatpush3.bf16.msra.mxu0 %v1036_v1  ;;  %1027 = vmatpush3.bf16.msra.mxu1 %v1036_v1  ;;  %v1041_v6 = vld [vmem:[%s1348_s1 + $0x58] sm:$0xff]   ;;  %v1043_v8 = vld [vmem:[%s1348_s1 + $0x60] sm:$0xff]   ;;  %v1045_v10 = vld [vmem:[%s1348_s1 + $0x68] sm:$0xff]  }
   0x4   :  { %909 = vmatprep.subr.bf16.mxu0 %v1037_v2  ;;  %1020 = vmatprep.subr.bf16.mxu1 %v1037_v2  ;;  %v1042_v7 = vld [vmem:[%s1348_s1 + $0x18] sm:$0xff]   ;;  %v1044_v9 = vld [vmem:[%s1348_s1 + $0x20] sm:$0xff]   ;;  %v1046_v13 = vld [vmem:[%s1348_s1 + $0x28] sm:$0xff]  }
   0x5   :  { %v1053_v11 = vld [vmem:[%s1349_s0 + $0x4] ss:$8 sps:$4 sm:$0xff]   ;;  %v1047_v14 = vld [vmem:[%s1348_s1 + $0x70] sm:$0xff]   ;;  %v1049_v16 = vld [vmem:[%s1348_s1 + $0x78] sm:$0xff]  }
   0x6   :  { %v1056_v12 = vld [vmem:[%s1349_s0 + $0x84] ss:$8 sps:$4 sm:$0xff]   ;;  %374 = vmatprep.mubr.bf16.mxu0 %v1053_v11  ;;  %v1048_v15 = vld [vmem:[%s1348_s1 + $0x30] sm:$0xff]   ;;  %v1050_v17 = vld [vmem:[%s1348_s1 + $0x38] sm:$0xff]  }
   0x7   :  { %910 = vmatpush3.bf16.msra.mxu0 %v1038_v3  ;;  %1028 = vmatpush3.bf16.msra.mxu1 %v1038_v3  ;;  %v1051_v18 = vld [vmem:[%s1349_s0] ss:$8 sps:$4 sm:$0xff]   ;;  %v1057_v20 = vld [vmem:[%s1349_s0 + $0x14] ss:$8 sps:$4 sm:$0xff]   ;;  %v1061_v22 = vld [vmem:[%s1349_s0 + $0x10] ss:$8 sps:$4 sm:$0xff]  }
   0x8   :  { %911 = vmatprep.subr.bf16.mxu0 %v1039_v4  ;;  %1021 = vmatprep.subr.bf16.mxu1 %v1039_v4  ;;  %v1054_v19 = vld [vmem:[%s1349_s0 + $0x80] ss:$8 sps:$4 sm:$0xff]   ;;  %v1059_v21 = vld [vmem:[%s1349_s0 + $0x94] ss:$8 sps:$4 sm:$0xff]   ;;  %v1062_v23 = vld [vmem:[%s1349_s0 + $0x90] ss:$8 sps:$4 sm:$0xff]  }
   0x9   :  { %438 = vmatprep.mubr.bf16.mxu1 %v1056_v12  ;;  %v1063_v24 = vld [vmem:[%s1349_s0 + $0x24] ss:$8 sps:$4 sm:$0xff]   ;;  %v1067_v26 = vld [vmem:[%s1349_s0 + $0x20] ss:$8 sps:$4 sm:$0xff]   ;;  %v1069_v28 = vld [vmem:[%s1349_s0 + $0x34] ss:$8 sps:$4 sm:$0xff]  }
   0xa   :  { %v1065_v25 = vld [vmem:[%s1349_s0 + $0xa4] ss:$8 sps:$4 sm:$0xff]   ;;  %v1068_v27 = vld [vmem:[%s1349_s0 + $0xa0] ss:$8 sps:$4 sm:$0xff]   ;;  %v1071_v29 = vld [vmem:[%s1349_s0 + $0xb4] ss:$8 sps:$4 sm:$0xff]  }
   0xb   :  { %912 = vmatpush3.bf16.msra.mxu0 %v1040_v5  ;;  %1029 = vmatpush3.bf16.msra.mxu1 %v1040_v5  ;;  %v1073_v30 = vld [vmem:[%s1349_s0 + $0x30] ss:$8 sps:$4 sm:$0xff]   ;;  %v1075_v32 = vld [vmem:[%s1349_s0 + $0x44] ss:$8 sps:$4 sm:$0xff]   ;;  %v1079_v34 = vld [vmem:[%s1349_s0 + $0x40] ss:$8 sps:$4 sm:$0xff]  }
   0xc   :  { %913 = vmatprep.subr.bf16.mxu0 %v1041_v6  ;;  %1022 = vmatprep.subr.bf16.mxu1 %v1041_v6  ;;  %v1074_v31 = vld [vmem:[%s1349_s0 + $0xb0] ss:$8 sps:$4 sm:$0xff]   ;;  %v1077_v33 = vld [vmem:[%s1349_s0 + $0xc4] ss:$8 sps:$4 sm:$0xff]   ;;  %v1080_v35 = vld [vmem:[%s1349_s0 + $0xc0] ss:$8 sps:$4 sm:$0xff]  }
   0xd   :  { %v1081_v36 = vld [vmem:[%s1349_s0 + $0x54] ss:$8 sps:$4 sm:$0xff]   ;;  %v1085_v38 = vld [vmem:[%s1349_s0 + $0x50] ss:$8 sps:$4 sm:$0xff]   ;;  %v1087_v40 = vld [vmem:[%s1349_s0 + $0x64] ss:$8 sps:$4 sm:$0xff]  }
   0xe   :  { %v1083_v37 = vld [vmem:[%s1349_s0 + $0xd4] ss:$8 sps:$4 sm:$0xff]   ;;  %v1086_v39 = vld [vmem:[%s1349_s0 + $0xd0] ss:$8 sps:$4 sm:$0xff]   ;;  %v1089_v41 = vld [vmem:[%s1349_s0 + $0xe4] ss:$8 sps:$4 sm:$0xff]  }
   0xf   :  { %914 = vmatpush3.bf16.msra.mxu0 %v1042_v7  ;;  %1030 = vmatpush3.bf16.msra.mxu1 %v1042_v7  ;;  %v1091_v42 = vld [vmem:[%s1349_s0 + $0x60] ss:$8 sps:$4 sm:$0xff]   ;;  %v1093_v44 = vld [vmem:[%s1349_s0 + $0x74] ss:$8 sps:$4 sm:$0xff]   ;;  %v1097_v46 = vld [vmem:[%s1349_s0 + $0x70] ss:$8 sps:$4 sm:$0xff]  }
  0x10   :  { %915 = vmatprep.subr.bf16.mxu0 %v1043_v8  ;;  %1023 = vmatprep.subr.bf16.mxu1 %v1043_v8  ;;  %v1092_v43 = vld [vmem:[%s1349_s0 + $0xe0] ss:$8 sps:$4 sm:$0xff]   ;;  %v1095_v45 = vld [vmem:[%s1349_s0 + $0xf4] ss:$8 sps:$4 sm:$0xff]   ;;  %v1098_v47 = vld [vmem:[%s1349_s0 + $0xf0] ss:$8 sps:$4 sm:$0xff]  }
  0x11   :  { %v1266_v50 = vld [vmem:[%s1350_s2] ss:$0 sm:$0xff] }
  0x13   :  { %916 = vmatpush3.bf16.msra.mxu0 %v1044_v9  ;;  %1031 = vmatpush3.bf16.msra.mxu1 %v1044_v9 }
  0x14   :  { %917 = vmatprep.subr.bf16.mxu0 %v1045_v10  ;;  %1024 = vmatprep.subr.bf16.mxu1 %v1045_v10 }
  0x17   :  { %918 = vmatpush3.bf16.msra.mxu0 %v1046_v13  ;;  %1032 = vmatpush3.bf16.msra.mxu1 %v1046_v13 }
  0x18   :  { %919 = vmatprep.subr.bf16.mxu0 %v1047_v14  ;;  %1025 = vmatprep.subr.bf16.mxu1 %v1047_v14 }
  0x1b   :  { %920 = vmatpush3.bf16.msra.mxu0 %v1048_v15  ;;  %1033 = vmatpush3.bf16.msra.mxu1 %v1048_v15 }
  0x1c   :  { %921 = vmatprep.subr.bf16.mxu0 %v1049_v16  ;;  %1026 = vmatprep.subr.bf16.mxu1 %v1049_v16 }
  0x1f   :  { %922 = vmatpush3.bf16.msra.mxu0 %v1050_v17  ;;  %1034 = vmatpush3.bf16.msra.mxu1 %v1050_v17 }
  0x22   :  { %375 = vmatmul.mubr.bf16.vlgmr.msra.gmra.mrb[0].mxu0 %v1051_v18  ;;  %439 = vmatmul.mubr.bf16.vlgmr.msra.gmra.mrb[0].mxu1 %v1054_v19 }
  0x23   :  { %382 = vmatprep.mubr.bf16.mxu0 %v1057_v20  ;;  %446 = vmatprep.mubr.bf16.mxu1 %v1059_v21 }
  0x2a   :  { %383 = vmatmul.mubr.bf16.gmra.mrb[4].mxu0 %v1061_v22  ;;  %447 = vmatmul.mubr.bf16.gmra.mrb[4].mxu1 %v1062_v23 }
  0x2b   :  { %390 = vmatprep.mubr.bf16.mxu0 %v1063_v24  ;;  %454 = vmatprep.mubr.bf16.mxu1 %v1065_v25 }
  0x32   :  { %391 = vmatmul.mubr.bf16.gmra.mrb[8].mxu0 %v1067_v26  ;;  %455 = vmatmul.mubr.bf16.gmra.mrb[8].mxu1 %v1068_v27 }
  0x33   :  { %398 = vmatprep.mubr.bf16.mxu0 %v1069_v28  ;;  %462 = vmatprep.mubr.bf16.mxu1 %v1071_v29 }
  0x3a   :  { %399 = vmatmul.mubr.bf16.gmra.mrb[12].mxu0 %v1073_v30  ;;  %463 = vmatmul.mubr.bf16.gmra.mrb[12].mxu1 %v1074_v31 }
  0x3b   :  { %406 = vmatprep.mubr.bf16.mxu0 %v1075_v32  ;;  %470 = vmatprep.mubr.bf16.mxu1 %v1077_v33 }
  0x42   :  { %407 = vmatmul.mubr.bf16.gmra.mrb[16].mxu0 %v1079_v34  ;;  %471 = vmatmul.mubr.bf16.gmra.mrb[16].mxu1 %v1080_v35 }
  0x43   :  { %414 = vmatprep.mubr.bf16.mxu0 %v1081_v36  ;;  %478 = vmatprep.mubr.bf16.mxu1 %v1083_v37 }
  0x4a   :  { %415 = vmatmul.mubr.bf16.gmra.mrb[20].mxu0 %v1085_v38  ;;  %479 = vmatmul.mubr.bf16.gmra.mrb[20].mxu1 %v1086_v39 }
  0x4b   :  { %422 = vmatprep.mubr.bf16.mxu0 %v1087_v40  ;;  %486 = vmatprep.mubr.bf16.mxu1 %v1089_v41 }
  0x52   :  { %423 = vmatmul.mubr.bf16.gmra.mrb[24].mxu0 %v1091_v42  ;;  %487 = vmatmul.mubr.bf16.gmra.mrb[24].mxu1 %v1092_v43 }
  0x53   :  { %430 = vmatprep.mubr.bf16.mxu0 %v1093_v44  ;;  %494 = vmatprep.mubr.bf16.mxu1 %v1095_v45 }
  0x5a   :  { %431 = vmatmul.mubr.bf16.gmra.mrb[28].mxu0 %v1097_v46  ;;  %495 = vmatmul.mubr.bf16.gmra.mrb[28].mxu1 %v1098_v47 }
  0xf5   :  { %v923_v48 = vpop.f32.mrb[0].mxu0  ;;  %v971_v49 = vpop.f32.mrb[0].mxu1 }
  0xf6   :  { %v924_v51 = vpop.f32.mrb[1].mxu0  ;;  %v972_v52 = vpop.f32.mrb[1].mxu1 }
  0xf7   :  { %v925_v53 = vadd.f32 %v924_v51, %v923_v48  ;;  %v973_v54 = vadd.f32 %v972_v52, %v971_v49  ;;  %v926_v55 = vpop.f32.mrb[2].mxu0  ;;  %v974_v56 = vpop.f32.mrb[2].mxu1 }
  0xf8   :  { %v927_v57 = vpop.f32.mrb[3].mxu0  ;;  %v975_v58 = vpop.f32.mrb[3].mxu1 }
  0xf9   :  { %v377_v59 = vadd.f32 %v925_v53, %v1266_v50  ;;  %v441_v60 = vadd.f32 %v973_v54, %v1266_v50  ;;  %v928_v61 = vadd.f32 %v927_v57, %v926_v55  ;;  %v976_v62 = vadd.f32 %v975_v58, %v974_v56 }
  0xfb   :  { %v380_v63 = vadd.f32 %v928_v61, %v1266_v50  ;;  %v444_v0 = vadd.f32 %v976_v62, %v1266_v50  ;;  %v503_v1 = vmax.f32 %v377_v59, 0.0  ;;  %v519_v2 = vmax.f32 %v441_v60, 0.0 }
  0xfd   :  { %v504_v3 = vmax.f32 %v380_v63, 0.0  ;;  %v520_v4 = vmax.f32 %v444_v0, 0.0  ;;  %v929_v5 = vpop.f32.mrb[4].mxu0  ;;  %v977_v6 = vpop.f32.mrb[4].mxu1 }
  0xfe   :  { %v930_v7 = vpop.f32.mrb[5].mxu0  ;;  %v978_v8 = vpop.f32.mrb[5].mxu1 }
  0xff   :  { %v815_v9 = vpack.c.bf16 %v504_v3, %v503_v1  ;;  %v855_v10 = vpack.c.bf16 %v520_v4, %v519_v2  ;;  %v931_v11 = vadd.f32 %v930_v7, %v929_v5  ;;  %v979_v12 = vadd.f32 %v978_v8, %v977_v6  ;;  %v932_v13 = vpop.f32.mrb[6].mxu0  ;;  %v980_v14 = vpop.f32.mrb[6].mxu1 }
 0x100   :  { %v933_v15 = vpop.f32.mrb[7].mxu0  ;;  %v981_v16 = vpop.f32.mrb[7].mxu1 }
 0x101   :  { %816 = vst [vmem:[%s1351_s3] sm:$0xff] %v815_v9   ;;  %899 = vst [vmem:[%s1351_s3 + $0x40] sm:$0xff] %v855_v10   ;;  %v385_v17 = vadd.f32 %v931_v11, %v1266_v50  ;;  %v449_v18 = vadd.f32 %v979_v12, %v1266_v50  ;;  %v934_v19 = vadd.f32 %v933_v15, %v932_v13 }
 0x102   :  { %v982_v20 = vadd.f32 %v981_v16, %v980_v14 }
 0x103   :  { %v388_v21 = vadd.f32 %v934_v19, %v1266_v50  ;;  %v505_v23 = vmax.f32 %v385_v17, 0.0  ;;  %v521_v24 = vmax.f32 %v449_v18, 0.0 }
 0x104   :  { %v452_v22 = vadd.f32 %v982_v20, %v1266_v50 }
 0x105   :  { %v506_v25 = vmax.f32 %v388_v21, 0.0  ;;  %v935_v27 = vpop.f32.mrb[8].mxu0  ;;  %v983_v28 = vpop.f32.mrb[8].mxu1 }
 0x106   :  { %v522_v26 = vmax.f32 %v452_v22, 0.0  ;;  %v936_v29 = vpop.f32.mrb[9].mxu0  ;;  %v984_v30 = vpop.f32.mrb[9].mxu1 }
 0x107   :  { %v820_v31 = vpack.c.bf16 %v506_v25, %v505_v23  ;;  %v937_v33 = vadd.f32 %v936_v29, %v935_v27  ;;  %v985_v34 = vadd.f32 %v984_v30, %v983_v28  ;;  %v938_v35 = vpop.f32.mrb[10].mxu0  ;;  %v986_v36 = vpop.f32.mrb[10].mxu1 }
 0x108   :  { %v860_v32 = vpack.c.bf16 %v522_v26, %v521_v24  ;;  %v939_v37 = vpop.f32.mrb[11].mxu0  ;;  %v987_v38 = vpop.f32.mrb[11].mxu1 }
 0x109   :  { %892 = vst [vmem:[%s1351_s3 + $0x8] sm:$0xff] %v820_v31   ;;  %v393_v39 = vadd.f32 %v937_v33, %v1266_v50  ;;  %v457_v40 = vadd.f32 %v985_v34, %v1266_v50  ;;  %v940_v41 = vadd.f32 %v939_v37, %v938_v35  ;;  %v988_v42 = vadd.f32 %v987_v38, %v986_v36 }
 0x10a   :  { %900 = vst [vmem:[%s1351_s3 + $0x48] sm:$0xff] %v860_v32  }
 0x10b   :  { %v396_v43 = vadd.f32 %v940_v41, %v1266_v50  ;;  %v460_v44 = vadd.f32 %v988_v42, %v1266_v50  ;;  %v507_v45 = vmax.f32 %v393_v39, 0.0  ;;  %v523_v46 = vmax.f32 %v457_v40, 0.0 }
 0x10d   :  { %v508_v47 = vmax.f32 %v396_v43, 0.0  ;;  %v524_v48 = vmax.f32 %v460_v44, 0.0  ;;  %v941_v49 = vpop.f32.mrb[12].mxu0  ;;  %v989_v51 = vpop.f32.mrb[12].mxu1 }
 0x10e   :  { %v942_v52 = vpop.f32.mrb[13].mxu0  ;;  %v990_v53 = vpop.f32.mrb[13].mxu1 }
 0x10f   :  { %v825_v54 = vpack.c.bf16 %v508_v47, %v507_v45  ;;  %v865_v55 = vpack.c.bf16 %v524_v48, %v523_v46  ;;  %v943_v56 = vadd.f32 %v942_v52, %v941_v49  ;;  %v991_v57 = vadd.f32 %v990_v53, %v989_v51  ;;  %v944_v58 = vpop.f32.mrb[14].mxu0  ;;  %v992_v59 = vpop.f32.mrb[14].mxu1 }
 0x110   :  { %v945_v60 = vpop.f32.mrb[15].mxu0  ;;  %v993_v61 = vpop.f32.mrb[15].mxu1 }
 0x111   :  { %893 = vst [vmem:[%s1351_s3 + $0x10] sm:$0xff] %v825_v54   ;;  %901 = vst [vmem:[%s1351_s3 + $0x50] sm:$0xff] %v865_v55   ;;  %v401_v62 = vadd.f32 %v943_v56, %v1266_v50  ;;  %v465_v63 = vadd.f32 %v991_v57, %v1266_v50  ;;  %v946_v0 = vadd.f32 %v945_v60, %v944_v58 }
 0x112   :  { %v994_v1 = vadd.f32 %v993_v61, %v992_v59 }
 0x113   :  { %v404_v2 = vadd.f32 %v946_v0, %v1266_v50  ;;  %v509_v4 = vmax.f32 %v401_v62, 0.0  ;;  %v525_v5 = vmax.f32 %v465_v63, 0.0 }
 0x114   :  { %v468_v3 = vadd.f32 %v994_v1, %v1266_v50 }
 0x115   :  { %v510_v6 = vmax.f32 %v404_v2, 0.0  ;;  %v947_v8 = vpop.f32.mrb[16].mxu0  ;;  %v995_v9 = vpop.f32.mrb[16].mxu1 }
 0x116   :  { %v526_v7 = vmax.f32 %v468_v3, 0.0  ;;  %v948_v10 = vpop.f32.mrb[17].mxu0  ;;  %v996_v11 = vpop.f32.mrb[17].mxu1 }
 0x117   :  { %v830_v12 = vpack.c.bf16 %v510_v6, %v509_v4  ;;  %v949_v14 = vadd.f32 %v948_v10, %v947_v8  ;;  %v997_v15 = vadd.f32 %v996_v11, %v995_v9  ;;  %v950_v16 = vpop.f32.mrb[18].mxu0  ;;  %v998_v17 = vpop.f32.mrb[18].mxu1 }
 0x118   :  { %v870_v13 = vpack.c.bf16 %v526_v7, %v525_v5  ;;  %v951_v18 = vpop.f32.mrb[19].mxu0  ;;  %v999_v19 = vpop.f32.mrb[19].mxu1 }
 0x119   :  { %894 = vst [vmem:[%s1351_s3 + $0x18] sm:$0xff] %v830_v12   ;;  %v409_v20 = vadd.f32 %v949_v14, %v1266_v50  ;;  %v473_v21 = vadd.f32 %v997_v15, %v1266_v50  ;;  %v952_v22 = vadd.f32 %v951_v18, %v950_v16  ;;  %v1000_v23 = vadd.f32 %v999_v19, %v998_v17 }
 0x11a   :  { %902 = vst [vmem:[%s1351_s3 + $0x58] sm:$0xff] %v870_v13  }
 0x11b   :  { %v412_v24 = vadd.f32 %v952_v22, %v1266_v50  ;;  %v476_v25 = vadd.f32 %v1000_v23, %v1266_v50  ;;  %v511_v26 = vmax.f32 %v409_v20, 0.0  ;;  %v527_v27 = vmax.f32 %v473_v21, 0.0 }
 0x11d   :  { %v512_v28 = vmax.f32 %v412_v24, 0.0  ;;  %v528_v29 = vmax.f32 %v476_v25, 0.0  ;;  %v953_v30 = vpop.f32.mrb[20].mxu0  ;;  %v1001_v31 = vpop.f32.mrb[20].mxu1 }
 0x11e   :  { %v954_v32 = vpop.f32.mrb[21].mxu0  ;;  %v1002_v33 = vpop.f32.mrb[21].mxu1 }
 0x11f   :  { %v835_v34 = vpack.c.bf16 %v512_v28, %v511_v26  ;;  %v875_v35 = vpack.c.bf16 %v528_v29, %v527_v27  ;;  %v955_v36 = vadd.f32 %v954_v32, %v953_v30  ;;  %v1003_v37 = vadd.f32 %v1002_v33, %v1001_v31  ;;  %v956_v38 = vpop.f32.mrb[22].mxu0  ;;  %v1004_v39 = vpop.f32.mrb[22].mxu1 }
 0x120   :  { %v957_v40 = vpop.f32.mrb[23].mxu0  ;;  %v1005_v41 = vpop.f32.mrb[23].mxu1 }
 0x121   :  { %895 = vst [vmem:[%s1351_s3 + $0x20] sm:$0xff] %v835_v34   ;;  %903 = vst [vmem:[%s1351_s3 + $0x60] sm:$0xff] %v875_v35   ;;  %v417_v42 = vadd.f32 %v955_v36, %v1266_v50  ;;  %v481_v43 = vadd.f32 %v1003_v37, %v1266_v50  ;;  %v958_v44 = vadd.f32 %v957_v40, %v956_v38 }
 0x122   :  { %v1006_v45 = vadd.f32 %v1005_v41, %v1004_v39 }
 0x123   :  { %v420_v46 = vadd.f32 %v958_v44, %v1266_v50  ;;  %v513_v48 = vmax.f32 %v417_v42, 0.0  ;;  %v529_v49 = vmax.f32 %v481_v43, 0.0 }
 0x124   :  { %v484_v47 = vadd.f32 %v1006_v45, %v1266_v50 }
 0x125   :  { %v514_v51 = vmax.f32 %v420_v46, 0.0  ;;  %v959_v53 = vpop.f32.mrb[24].mxu0  ;;  %v1007_v54 = vpop.f32.mrb[24].mxu1 }
 0x126   :  { %v530_v52 = vmax.f32 %v484_v47, 0.0  ;;  %v960_v55 = vpop.f32.mrb[25].mxu0  ;;  %v1008_v56 = vpop.f32.mrb[25].mxu1 }
 0x127   :  { %v840_v57 = vpack.c.bf16 %v514_v51, %v513_v48  ;;  %v961_v59 = vadd.f32 %v960_v55, %v959_v53  ;;  %v1009_v60 = vadd.f32 %v1008_v56, %v1007_v54  ;;  %v962_v61 = vpop.f32.mrb[26].mxu0  ;;  %v1010_v62 = vpop.f32.mrb[26].mxu1 }
 0x128   :  { %v880_v58 = vpack.c.bf16 %v530_v52, %v529_v49  ;;  %v963_v63 = vpop.f32.mrb[27].mxu0  ;;  %v1011_v0 = vpop.f32.mrb[27].mxu1 }
 0x129   :  { %896 = vst [vmem:[%s1351_s3 + $0x28] sm:$0xff] %v840_v57   ;;  %v425_v1 = vadd.f32 %v961_v59, %v1266_v50  ;;  %v489_v2 = vadd.f32 %v1009_v60, %v1266_v50  ;;  %v964_v3 = vadd.f32 %v963_v63, %v962_v61  ;;  %v1012_v4 = vadd.f32 %v1011_v0, %v1010_v62 }
 0x12a   :  { %904 = vst [vmem:[%s1351_s3 + $0x68] sm:$0xff] %v880_v58  }
 0x12b   :  { %v428_v5 = vadd.f32 %v964_v3, %v1266_v50  ;;  %v492_v6 = vadd.f32 %v1012_v4, %v1266_v50  ;;  %v515_v7 = vmax.f32 %v425_v1, 0.0  ;;  %v531_v8 = vmax.f32 %v489_v2, 0.0 }
 0x12d   :  { %v516_v9 = vmax.f32 %v428_v5, 0.0  ;;  %v532_v10 = vmax.f32 %v492_v6, 0.0  ;;  %v965_v11 = vpop.f32.mrb[28].mxu0  ;;  %v1013_v12 = vpop.f32.mrb[28].mxu1 }
 0x12e   :  { %v966_v13 = vpop.f32.mrb[29].mxu0  ;;  %v1014_v14 = vpop.f32.mrb[29].mxu1 }
 0x12f   :  { %v845_v15 = vpack.c.bf16 %v516_v9, %v515_v7  ;;  %v885_v16 = vpack.c.bf16 %v532_v10, %v531_v8  ;;  %v967_v17 = vadd.f32 %v966_v13, %v965_v11  ;;  %v1015_v18 = vadd.f32 %v1014_v14, %v1013_v12  ;;  %v968_v19 = vpop.f32.mrb[30].mxu0  ;;  %v1016_v20 = vpop.f32.mrb[30].mxu1 }
 0x130   :  { %v969_v21 = vpop.f32.mrb[31].mxu0  ;;  %v1017_v22 = vpop.f32.mrb[31].mxu1 }
 0x131   :  { %897 = vst [vmem:[%s1351_s3 + $0x30] sm:$0xff] %v845_v15   ;;  %905 = vst [vmem:[%s1351_s3 + $0x70] sm:$0xff] %v885_v16   ;;  %v433_v23 = vadd.f32 %v967_v17, %v1266_v50  ;;  %v497_v24 = vadd.f32 %v1015_v18, %v1266_v50  ;;  %v970_v25 = vadd.f32 %v969_v21, %v968_v19 }
 0x132   :  { %v1018_v26 = vadd.f32 %v1017_v22, %v1016_v20 }
 0x133   :  { %v436_v27 = vadd.f32 %v970_v25, %v1266_v50  ;;  %v517_v29 = vmax.f32 %v433_v23, 0.0  ;;  %v533_v30 = vmax.f32 %v497_v24, 0.0 }
 0x134   :  { %v500_v28 = vadd.f32 %v1018_v26, %v1266_v50 }
 0x135   :  { %v518_v31 = vmax.f32 %v436_v27, 0.0 }
 0x136   :  { %v534_v32 = vmax.f32 %v500_v28, 0.0 }
 0x137   :  { %v850_v33 = vpack.c.bf16 %v518_v31, %v517_v29 }
 0x138   :  { %v890_v34 = vpack.c.bf16 %v534_v32, %v533_v30 }
 0x139   :  { %898 = vst [vmem:[%s1351_s3 + $0x38] sm:$0xff] %v850_v33  }
 0x13a   :  { %906 = vst [vmem:[%s1351_s3 + $0x78] sm:$0xff] %v890_v34  }

// kernel: net_forward.9
= control target key start
LH: loop header
LB: loop body
LE: loop exit
PB: predicated region body
PF: predicated region fallthrough
CT: control target
= control target key end

     0   :  { %s811_s1 = inlined_call_operand.vmem [shape: bf16[384,128], index: 1, kind: input, shape index: {}]   ;;  %s812_s0 = inlined_call_operand.vmem [shape: bf16[64,384], index: 0, kind: input, shape index: {}]   ;;  %s813_s2 = inlined_call_operand.vmem [shape: f32[1,128], index: 2, kind: input, shape index: {}]   ;;  %s814_s3 = inlined_call_operand.vmem [shape: bf16[64,128], index: 3, kind: output, shape index: {}]  }
   0x1   :  { %v628_v0 = vld [vmem:[%s811_s1 + $0x40] sm:$0xff]   ;;  %v630_v2 = vld [vmem:[%s811_s1 + $0x48] sm:$0xff]   ;;  %v633_v5 = vld [vmem:[%s811_s1 + $0x50] sm:$0xff]  }
   0x2   :  { %v629_v1 = vld [vmem:[%s811_s1] sm:$0xff]   ;;  %552 = vmatprep.subr.bf16.mxu0 %v628_v0  ;;  %v632_v4 = vld [vmem:[%s811_s1 + $0x8] sm:$0xff]   ;;  %v635_v7 = vld [vmem:[%s811_s1 + $0x10] sm:$0xff]  }
   0x3   :  { %553 = vmatpush3.bf16.msra.mxu0 %v629_v1  ;;  %v631_v3 = vld [vmem:[%s811_s1 + $0x80] sm:$0xff]   ;;  %v634_v6 = vld [vmem:[%s811_s1 + $0x88] sm:$0xff]   ;;  %v636_v8 = vld [vmem:[%s811_s1 + $0x58] sm:$0xff]  }
   0x4   :  { %554 = vmatprep.subr.bf16.mxu0 %v630_v2  ;;  %604 = vmatprep.subr.bf16.mxu1 %v631_v3  ;;  %v637_v9 = vld [vmem:[%s811_s1 + $0x90] sm:$0xff]   ;;  %v638_v10 = vld [vmem:[%s811_s1 + $0x18] sm:$0xff]   ;;  %v639_v11 = vld [vmem:[%s811_s1 + $0x60] sm:$0xff]  }
   0x5   :  { %605 = vmatpush3.bf16.msra.mxu1 %v631_v3  ;;  %v640_v12 = vld [vmem:[%s811_s1 + $0x98] sm:$0xff]   ;;  %v641_v13 = vld [vmem:[%s811_s1 + $0x20] sm:$0xff]   ;;  %v642_v15 = vld [vmem:[%s811_s1 + $0x68] sm:$0xff]  }
   0x6   :  { %606 = vmatprep.subr.bf16.mxu1 %v634_v6  ;;  %v643_v14 = vld [vmem:[%s811_s1 + $0xa0] sm:$0xff]   ;;  %v644_v16 = vld [vmem:[%s811_s1 + $0x28] sm:$0xff]   ;;  %v645_v18 = vld [vmem:[%s811_s1 + $0x70] sm:$0xff]  }
   0x7   :  { %555 = vmatpush3.bf16.msra.mxu0 %v632_v4  ;;  %v646_v17 = vld [vmem:[%s811_s1 + $0xa8] sm:$0xff]   ;;  %v647_v19 = vld [vmem:[%s811_s1 + $0x30] sm:$0xff]   ;;  %v648_v20 = vld [vmem:[%s811_s1 + $0x78] sm:$0xff]  }
   0x8   :  { %556 = vmatprep.subr.bf16.mxu0 %v633_v5  ;;  %v649_v21 = vld [vmem:[%s811_s1 + $0xb0] sm:$0xff]   ;;  %v650_v23 = vld [vmem:[%s811_s1 + $0x38] sm:$0xff]   ;;  %v651_v26 = vld [vmem:[%s812_s0] ss:$12 sps:$4 sm:$0xff]  }
   0x9   :  { %607 = vmatpush3.bf16.msra.mxu1 %v634_v6  ;;  %v653_v22 = vld [vmem:[%s812_s0 + $0x4] ss:$12 sps:$4 sm:$0xff]   ;;  %v655_v24 = vld [vmem:[%s812_s0 + $0x8] ss:$12 sps:$4 sm:$0xff]   ;;  %v654_v25 = vld [vmem:[%s811_s1 + $0xb8] sm:$0xff]  }
   0xa   :  { %608 = vmatprep.subr.bf16.mxu1 %v637_v9  ;;  %326 = vmatprep.mubr.bf16.mxu0 %v653_v22  ;;  %v657_v27 = vld [vmem:[%s812_s0 + $0x1c] ss:$12 sps:$4 sm:$0xff]   ;;  %v656_v28 = vld [vmem:[%s812_s0 + $0x20] ss:$12 sps:$4 sm:$0xff]   ;;  %v663_v29 = vld [vmem:[%s812_s0 + $0x38] ss:$12 sps:$4 sm:$0xff]  }
   0xb   :  { %557 = vmatpush3.bf16.msra.mxu0 %v635_v7  ;;  %620 = vmatprep.mubr.bf16.mxu1 %v655_v24  ;;  %v659_v30 = vld [vmem:[%s812_s0 + $0x18] ss:$12 sps:$4 sm:$0xff]   ;;  %v660_v31 = vld [vmem:[%s812_s0 + $0x34] ss:$12 sps:$4 sm:$0xff]   ;;  %v664_v32 = vld [vmem:[%s812_s0 + $0x50] ss:$12 sps:$4 sm:$0xff]  }
   0xc   :  { %558 = vmatprep.subr.bf16.mxu0 %v636_v8  ;;  %v662_v33 = vld [vmem:[%s812_s0 + $0x30] ss:$12 sps:$4 sm:$0xff]   ;;  %v665_v34 = vld [vmem:[%s812_s0 + $0x4c] ss:$12 sps:$4 sm:$0xff]   ;;  %v667_v35 = vld [vmem:[%s812_s0 + $0x48] ss:$12 sps:$4 sm:$0xff]  }
   0xd   :  { %609 = vmatpush3.bf16.msra.mxu1 %v637_v9  ;;  %v476_v38 = vld [vmem:[%s813_s2] ss:$0 sm:$0xff] }
   0xe   :  { %610 = vmatprep.subr.bf16.mxu1 %v640_v12 }
   0xf   :  { %559 = vmatpush3.bf16.msra.mxu0 %v638_v10 }
  0x10   :  { %560 = vmatprep.subr.bf16.mxu0 %v639_v11 }
  0x11   :  { %611 = vmatpush3.bf16.msra.mxu1 %v640_v12 }
  0x12   :  { %612 = vmatprep.subr.bf16.mxu1 %v643_v14 }
  0x13   :  { %561 = vmatpush3.bf16.msra.mxu0 %v641_v13 }
  0x14   :  { %562 = vmatprep.subr.bf16.mxu0 %v642_v15 }
  0x15   :  { %613 = vmatpush3.bf16.msra.mxu1 %v643_v14 }
  0x16   :  { %614 = vmatprep.subr.bf16.mxu1 %v646_v17 }
  0x17   :  { %563 = vmatpush3.bf16.msra.mxu0 %v644_v16 }
  0x18   :  { %564 = vmatprep.subr.bf16.mxu0 %v645_v18 }
  0x19   :  { %615 = vmatpush3.bf16.msra.mxu1 %v646_v17 }
  0x1a   :  { %616 = vmatprep.subr.bf16.mxu1 %v649_v21 }
  0x1b   :  { %565 = vmatpush3.bf16.msra.mxu0 %v647_v19 }
  0x1c   :  { %566 = vmatprep.subr.bf16.mxu0 %v648_v20 }
  0x1d   :  { %617 = vmatpush3.bf16.msra.mxu1 %v649_v21 }
  0x1e   :  { %618 = vmatprep.subr.bf16.mxu1 %v654_v25 }
  0x1f   :  { %567 = vmatpush3.bf16.msra.mxu0 %v650_v23 }
  0x21   :  { %619 = vmatpush3.bf16.msra.mxu1 %v654_v25 }
  0x22   :  { %327 = vmatmul.mubr.bf16.vlgmr.msra.gmra.mrb[0].mxu0 %v651_v26 }
  0x23   :  { %334 = vmatprep.mubr.bf16.mxu0 %v657_v27 }
  0x24   :  { %621 = vmatmul.mubr.bf16.vlgmr.msra.gmra.mrb[0].mxu1 %v656_v28 }
  0x25   :  { %624 = vmatprep.mubr.bf16.mxu1 %v663_v29 }
  0x2a   :  { %335 = vmatmul.mubr.bf16.gmra.mrb[4].mxu0 %v659_v30 }
  0x2b   :  { %342 = vmatprep.mubr.bf16.mxu0 %v660_v31 }
  0x2c   :  { %625 = vmatmul.mubr.bf16.gmra.mrb[4].mxu1 %v664_v32 }
  0x32   :  { %343 = vmatmul.mubr.bf16.gmra.mrb[8].mxu0 %v662_v33 }
  0x33   :  { %350 = vmatprep.mubr.bf16.mxu0 %v665_v34 }
  0x3a   :  { %351 = vmatmul.mubr.bf16.gmra.mrb[12].mxu0 %v667_v35 }
  0xf5   :  { %v568_v36 = vpop.f32.mrb[0].mxu0 }
  0xf6   :  { %v569_v37 = vpop.f32.mrb[1].mxu0 }
  0xf7   :  { %v570_v39 = vadd.f32 %v569_v37, %v568_v36  ;;  %v571_v40 = vpop.f32.mrb[2].mxu0  ;;  %v622_v42 = vpop.f32.mrb[0].mxu1 }
  0xf8   :  { %v572_v41 = vpop.f32.mrb[3].mxu0  ;;  %v393_v45 = vpop.f32.mrb[1].mxu1 }
  0xf9   :  { %v573_v43 = vadd.f32 %v572_v41, %v571_v40  ;;  %v329_v44 = vadd.f32 %v570_v39, %v476_v38  ;;  %v623_v46 = vpop.f32.mrb[2].mxu1 }
  0xfa   :  { %v396_v49 = vpop.f32.mrb[3].mxu1 }
  0xfb   :  { %v394_v47 = vadd.f32 %v393_v45, %v329_v44  ;;  %v332_v48 = vadd.f32 %v573_v43, %v476_v38 }
  0xfd   :  { %v397_v50 = vadd.f32 %v396_v49, %v332_v48  ;;  %v574_v51 = vpop.f32.mrb[4].mxu0  ;;  %v424_v53 = vmax.f32 %v394_v47, 0.0 }
  0xfe   :  { %v575_v52 = vpop.f32.mrb[5].mxu0 }
  0xff   :  { %v425_v54 = vmax.f32 %v397_v50, 0.0  ;;  %v576_v55 = vadd.f32 %v575_v52, %v574_v51  ;;  %v577_v56 = vpop.f32.mrb[6].mxu0  ;;  %v626_v58 = vpop.f32.mrb[4].mxu1 }
 0x100   :  { %v578_v57 = vpop.f32.mrb[7].mxu0  ;;  %v409_v62 = vpop.f32.mrb[5].mxu1 }
 0x101   :  { %v532_v59 = vpack.c.bf16 %v425_v54, %v424_v53  ;;  %v337_v60 = vadd.f32 %v576_v55, %v476_v38  ;;  %v579_v61 = vadd.f32 %v578_v57, %v577_v56  ;;  %v627_v63 = vpop.f32.mrb[6].mxu1 }
 0x102   :  { %v412_v2 = vpop.f32.mrb[7].mxu1 }
 0x103   :  { %533 = vst [vmem:[%s814_s3] sm:$0xff] %v532_v59   ;;  %v402_v0 = vadd.f32 %v622_v42, %v337_v60  ;;  %v340_v1 = vadd.f32 %v579_v61, %v476_v38 }
 0x105   :  { %v405_v3 = vadd.f32 %v623_v46, %v340_v1  ;;  %v580_v4 = vpop.f32.mrb[8].mxu0  ;;  %v426_v6 = vmax.f32 %v402_v0, 0.0 }
 0x106   :  { %v581_v5 = vpop.f32.mrb[9].mxu0 }
 0x107   :  { %v427_v7 = vmax.f32 %v405_v3, 0.0  ;;  %v582_v8 = vadd.f32 %v581_v5, %v580_v4  ;;  %v583_v9 = vpop.f32.mrb[10].mxu0 }
 0x108   :  { %v584_v10 = vpop.f32.mrb[11].mxu0 }
 0x109   :  { %v537_v11 = vpack.c.bf16 %v427_v7, %v426_v6  ;;  %v585_v12 = vadd.f32 %v584_v10, %v583_v9  ;;  %v345_v13 = vadd.f32 %v582_v8, %v476_v38 }
 0x10b   :  { %549 = vst [vmem:[%s814_s3 + $0x8] sm:$0xff] %v537_v11   ;;  %v410_v14 = vadd.f32 %v409_v62, %v345_v13  ;;  %v348_v15 = vadd.f32 %v585_v12, %v476_v38 }
 0x10d   :  { %v413_v16 = vadd.f32 %v412_v2, %v348_v15  ;;  %v586_v17 = vpop.f32.mrb[12].mxu0  ;;  %v428_v19 = vmax.f32 %v410_v14, 0.0 }
 0x10e   :  { %v587_v18 = vpop.f32.mrb[13].mxu0 }
 0x10f   :  { %v429_v20 = vmax.f32 %v413_v16, 0.0  ;;  %v588_v21 = vadd.f32 %v587_v18, %v586_v17  ;;  %v589_v22 = vpop.f32.mrb[14].mxu0 }
 0x110   :  { %v590_v23 = vpop.f32.mrb[15].mxu0 }
 0x111   :  { %v542_v24 = vpack.c.bf16 %v429_v20, %v428_v19  ;;  %v353_v25 = vadd.f32 %v588_v21, %v476_v38  ;;  %v591_v26 = vadd.f32 %v590_v23, %v589_v22 }
 0x113   :  { %550 = vst [vmem:[%s814_s3 + $0x10] sm:$0xff] %v542_v24   ;;  %v418_v27 = vadd.f32 %v626_v58, %v353_v25  ;;  %v356_v28 = vadd.f32 %v591_v26, %v476_v38 }
 0x115   :  { %v421_v29 = vadd.f32 %v627_v63, %v356_v28  ;;  %v430_v30 = vmax.f32 %v418_v27, 0.0 }
 0x117   :  { %v431_v31 = vmax.f32 %v421_v29, 0.0 }
 0x119   :  { %v547_v32 = vpack.c.bf16 %v431_v31, %v430_v30 }
 0x11b   :  { %551 = vst [vmem:[%s814_s3 + $0x18] sm:$0xff] %v547_v32  }

// kernel: net_forward.10
= control target key start
LH: loop header
LB: loop body
LE: loop exit
PB: predicated region body
PF: predicated region fallthrough
CT: control target
= control target key end

     0   :  { %s970_s1 = inlined_call_operand.vmem [shape: bf16[640,128], index: 1, kind: input, shape index: {}]   ;;  %s971_s0 = inlined_call_operand.vmem [shape: bf16[32,640], index: 0, kind: input, shape index: {}]   ;;  %s972_s2 = inlined_call_operand.vmem [shape: f32[1,128], index: 2, kind: input, shape index: {}]   ;;  %s973_s3 = inlined_call_operand.vmem [shape: bf16[32,128], index: 3, kind: output, shape index: {}]  }
   0x1   :  { %v737_v0 = vld [vmem:[%s970_s1 + $0x40] sm:$0xff]   ;;  %v741_v4 = vld [vmem:[%s970_s1 + $0x48] sm:$0xff]   ;;  %v745_v8 = vld [vmem:[%s970_s1 + $0x50] sm:$0xff]  }
   0x2   :  { %v738_v1 = vld [vmem:[%s970_s1] sm:$0xff]   ;;  %651 = vmatprep.subr.bf16.mxu0 %v737_v0  ;;  %v742_v5 = vld [vmem:[%s970_s1 + $0x8] sm:$0xff]   ;;  %v746_v9 = vld [vmem:[%s970_s1 + $0x10] sm:$0xff]  }
   0x3   :  { %v739_v2 = vld [vmem:[%s970_s1 + $0xc0] sm:$0xff]   ;;  %652 = vmatpush3.bf16.msra.mxu0 %v738_v1  ;;  %v743_v6 = vld [vmem:[%s970_s1 + $0xc8] sm:$0xff]   ;;  %v747_v10 = vld [vmem:[%s970_s1 + $0xd0] sm:$0xff]  }
   0x4   :  { %v740_v3 = vld [vmem:[%s970_s1 + $0x80] sm:$0xff]   ;;  %679 = vmatprep.subr.bf16.mxu1 %v739_v2  ;;  %653 = vmatprep.subr.bf16.mxu0 %v741_v4  ;;  %v744_v7 = vld [vmem:[%s970_s1 + $0x88] sm:$0xff]   ;;  %v748_v11 = vld [vmem:[%s970_s1 + $0x90] sm:$0xff]  }
   0x5   :  { %680 = vmatpush3.bf16.msra.mxu1 %v740_v3  ;;  %v749_v12 = vld [vmem:[%s970_s1 + $0x58] sm:$0xff]   ;;  %v753_v16 = vld [vmem:[%s970_s1 + $0x60] sm:$0xff]   ;;  %v757_v20 = vld [vmem:[%s970_s1 + $0x68] sm:$0xff]  }
   0x6   :  { %681 = vmatprep.subr.bf16.mxu1 %v743_v6  ;;  %v750_v13 = vld [vmem:[%s970_s1 + $0x18] sm:$0xff]   ;;  %v754_v17 = vld [vmem:[%s970_s1 + $0x20] sm:$0xff]   ;;  %v758_v21 = vld [vmem:[%s970_s1 + $0x28] sm:$0xff]  }
   0x7   :  { %654 = vmatpush3.bf16.msra.mxu0 %v742_v5  ;;  %v751_v14 = vld [vmem:[%s970_s1 + $0xd8] sm:$0xff]   ;;  %v755_v18 = vld [vmem:[%s970_s1 + $0xe0] sm:$0xff]   ;;  %v759_v22 = vld [vmem:[%s970_s1 + $0xe8] sm:$0xff]  }
   0x8   :  { %655 = vmatprep.subr.bf16.mxu0 %v745_v8  ;;  %v752_v15 = vld [vmem:[%s970_s1 + $0x98] sm:$0xff]   ;;  %v756_v19 = vld [vmem:[%s970_s1 + $0xa0] sm:$0xff]   ;;  %v760_v23 = vld [vmem:[%s970_s1 + $0xa8] sm:$0xff]  }
   0x9   :  { %682 = vmatpush3.bf16.msra.mxu1 %v744_v7  ;;  %v761_v24 = vld [vmem:[%s970_s1 + $0x70] sm:$0xff]   ;;  %v765_v28 = vld [vmem:[%s970_s1 + $0x78] sm:$0xff]   ;;  %v772_v34 = vld [vmem:[%s970_s1 + $0x100] sm:$0xff]  }
   0xa   :  { %683 = vmatprep.subr.bf16.mxu1 %v747_v10  ;;  %v762_v25 = vld [vmem:[%s970_s1 + $0x30] sm:$0xff]   ;;  %v766_v29 = vld [vmem:[%s970_s1 + $0x38] sm:$0xff]   ;;  %v775_v36 = vld [vmem:[%s971_s0 + $0xc] ss:$20 sps:$4 sm:$0xff]  }
   0xb   :  { %656 = vmatpush3.bf16.msra.mxu0 %v746_v9  ;;  %v763_v26 = vld [vmem:[%s970_s1 + $0xf0] sm:$0xff]   ;;  %v767_v30 = vld [vmem:[%s970_s1 + $0xf8] sm:$0xff]   ;;  %v776_v37 = vld [vmem:[%s970_s1 + $0x108] sm:$0xff]   ;;  %487 = vmatprep.mubr.bf16.mxu1 %v775_v36 }
   0xc   :  { %657 = vmatprep.subr.bf16.mxu0 %v749_v12  ;;  %v764_v27 = vld [vmem:[%s970_s1 + $0xb0] sm:$0xff]   ;;  %v770_v32 = vld [vmem:[%s971_s0 + $0x4] ss:$20 sps:$4 sm:$0xff]   ;;  %v773_v35 = vld [vmem:[%s971_s0 + $0x8] ss:$20 sps:$4 sm:$0xff]  }
   0xd   :  { %684 = vmatpush3.bf16.msra.mxu1 %v748_v11  ;;  %v768_v31 = vld [vmem:[%s971_s0] ss:$20 sps:$4 sm:$0xff]   ;;  %v771_v33 = vld [vmem:[%s970_s1 + $0xb8] sm:$0xff]   ;;  %438 = vmatprep.mubr.bf16.mxu0 %v770_v32  ;;  %v786_v43 = vld [vmem:[%s971_s0 + $0x30] ss:$20 sps:$4 sm:$0xff]  }
   0xe   :  { %685 = vmatprep.subr.bf16.mxu1 %v751_v14  ;;  %v777_v38 = vld [vmem:[%s970_s1 + $0x110] sm:$0xff]   ;;  %v780_v39 = vld [vmem:[%s971_s0 + $0x2c] ss:$20 sps:$4 sm:$0xff]   ;;  %v778_v40 = vld [vmem:[%s970_s1 + $0x118] sm:$0xff]  }
   0xf   :  { %658 = vmatpush3.bf16.msra.mxu0 %v750_v13  ;;  %v783_v41 = vld [vmem:[%s971_s0 + $0x28] ss:$20 sps:$4 sm:$0xff]   ;;  %v779_v44 = vld [vmem:[%s970_s1 + $0x120] sm:$0xff]   ;;  %v787_v47 = vld [vmem:[%s970_s1 + $0x130] sm:$0xff]  }
  0x10   :  { %659 = vmatprep.subr.bf16.mxu0 %v753_v16  ;;  %v784_v42 = vld [vmem:[%s971_s0 + $0x34] ss:$20 sps:$4 sm:$0xff]   ;;  %v789_v45 = vld [vmem:[%s971_s0 + $0x10] ss:$20 sps:$4 sm:$0xff]   ;;  %v788_v48 = vld [vmem:[%s970_s1 + $0x138] sm:$0xff]  }
  0x11   :  { %686 = vmatpush3.bf16.msra.mxu1 %v752_v15  ;;  %v782_v46 = vld [vmem:[%s970_s1 + $0x128] sm:$0xff]   ;;  %v581_v51 = vld [vmem:[%s972_s2] ss:$0 sm:$0xff] }
  0x12   :  { %687 = vmatprep.subr.bf16.mxu1 %v755_v18  ;;  %v790_v49 = vld [vmem:[%s971_s0 + $0x38] ss:$20 sps:$4 sm:$0xff]  }
  0x13   :  { %660 = vmatpush3.bf16.msra.mxu0 %v754_v17 }
  0x14   :  { %661 = vmatprep.subr.bf16.mxu0 %v757_v20 }
  0x15   :  { %688 = vmatpush3.bf16.msra.mxu1 %v756_v19 }
  0x16   :  { %689 = vmatprep.subr.bf16.mxu1 %v759_v22 }
  0x17   :  { %662 = vmatpush3.bf16.msra.mxu0 %v758_v21 }
  0x18   :  { %663 = vmatprep.subr.bf16.mxu0 %v761_v24 }
  0x19   :  { %690 = vmatpush3.bf16.msra.mxu1 %v760_v23 }
  0x1a   :  { %691 = vmatprep.subr.bf16.mxu1 %v763_v26 }
  0x1b   :  { %664 = vmatpush3.bf16.msra.mxu0 %v762_v25 }
  0x1c   :  { %665 = vmatprep.subr.bf16.mxu0 %v765_v28 }
  0x1d   :  { %692 = vmatpush3.bf16.msra.mxu1 %v764_v27 }
  0x1e   :  { %693 = vmatprep.subr.bf16.mxu1 %v767_v30 }
  0x1f   :  { %666 = vmatpush3.bf16.msra.mxu0 %v766_v29 }
  0x20   :  { %717 = vmatprep.subr.bf16.mxu0 %v772_v34 }
  0x21   :  { %694 = vmatpush3.bf16.msra.mxu1 %v771_v33 }
  0x22   :  { %439 = vmatmul.mubr.bf16.vlgmr.msra.gmra.mrb[0].mxu0 %v768_v31 }
  0x23   :  { %718 = vmatpush3.bf16.msra.mxu0 %v772_v34  ;;  %446 = vmatprep.mubr.bf16.mxu0 %v780_v39 }
  0x24   :  { %488 = vmatmul.mubr.bf16.vlgmr.msra.gmra.mrb[0].mxu1 %v773_v35  ;;  %719 = vmatprep.subr.bf16.mxu0 %v776_v37 }
  0x25   :  { %495 = vmatprep.mubr.bf16.mxu1 %v784_v42 }
  0x27   :  { %720 = vmatpush3.bf16.msra.mxu0 %v776_v37 }
  0x28   :  { %721 = vmatprep.subr.bf16.mxu0 %v777_v38 }
  0x2a   :  { %447 = vmatmul.mubr.bf16.gmra.mrb[4].mxu0 %v783_v41 }
  0x2b   :  { %722 = vmatpush3.bf16.msra.mxu0 %v777_v38  ;;  %733 = vmatprep.mubr.bf16.mxu0 %v789_v45 }
  0x2c   :  { %723 = vmatprep.subr.bf16.mxu0 %v778_v40  ;;  %496 = vmatmul.mubr.bf16.gmra.mrb[4].mxu1 %v786_v43 }
  0x2f   :  { %724 = vmatpush3.bf16.msra.mxu0 %v778_v40 }
  0x30   :  { %725 = vmatprep.subr.bf16.mxu0 %v779_v44 }
  0x33   :  { %726 = vmatpush3.bf16.msra.mxu0 %v779_v44 }
  0x34   :  { %727 = vmatprep.subr.bf16.mxu0 %v782_v46 }
  0x37   :  { %728 = vmatpush3.bf16.msra.mxu0 %v782_v46 }
  0x38   :  { %729 = vmatprep.subr.bf16.mxu0 %v787_v47 }
  0x3b   :  { %730 = vmatpush3.bf16.msra.mxu0 %v787_v47 }
  0x3c   :  { %731 = vmatprep.subr.bf16.mxu0 %v788_v48 }
  0x3f   :  { %732 = vmatpush3.bf16.msra.mxu0 %v788_v48 }
  0x42   :  { %734 = vmatmul.mubr.bf16.vlgmr.msra.gmra.mrb[8].mxu0 %v790_v49 }
  0xf5   :  { %v667_v50 = vpop.f32.mrb[0].mxu0 }
  0xf6   :  { %v668_v52 = vpop.f32.mrb[1].mxu0 }
  0xf7   :  { %v669_v53 = vadd.f32 %v668_v52, %v667_v50  ;;  %v670_v54 = vpop.f32.mrb[2].mxu0  ;;  %v695_v55 = vpop.f32.mrb[0].mxu1 }
  0xf8   :  { %v671_v56 = vpop.f32.mrb[3].mxu0  ;;  %v696_v59 = vpop.f32.mrb[1].mxu1 }
  0xf9   :  { %v441_v57 = vadd.f32 %v669_v53, %v581_v51  ;;  %v672_v58 = vadd.f32 %v671_v56, %v670_v54  ;;  %v697_v60 = vadd.f32 %v696_v59, %v695_v55  ;;  %v698_v61 = vpop.f32.mrb[2].mxu1 }
  0xfa   :  { %v699_v63 = vpop.f32.mrb[3].mxu1 }
  0xfb   :  { %v444_v62 = vadd.f32 %v672_v58, %v581_v51  ;;  %v700_v0 = vadd.f32 %v699_v63, %v698_v61  ;;  %v490_v1 = vadd.f32 %v697_v60, %v441_v57 }
  0xfd   :  { %v673_v2 = vpop.f32.mrb[4].mxu0  ;;  %v493_v4 = vadd.f32 %v700_v0, %v444_v62 }
  0xfe   :  { %v674_v3 = vpop.f32.mrb[5].mxu0 }
  0xff   :  { %v675_v5 = vadd.f32 %v674_v3, %v673_v2  ;;  %v676_v6 = vpop.f32.mrb[6].mxu0  ;;  %v701_v7 = vpop.f32.mrb[4].mxu1 }
 0x100   :  { %v677_v8 = vpop.f32.mrb[7].mxu0  ;;  %v702_v11 = vpop.f32.mrb[5].mxu1 }
 0x101   :  { %v449_v9 = vadd.f32 %v675_v5, %v581_v51  ;;  %v678_v10 = vadd.f32 %v677_v8, %v676_v6  ;;  %v703_v12 = vadd.f32 %v702_v11, %v701_v7  ;;  %v704_v13 = vpop.f32.mrb[6].mxu1 }
 0x102   :  { %v705_v15 = vpop.f32.mrb[7].mxu1 }
 0x103   :  { %v452_v14 = vadd.f32 %v678_v10, %v581_v51  ;;  %v706_v16 = vadd.f32 %v705_v15, %v704_v13  ;;  %v498_v17 = vadd.f32 %v703_v12, %v449_v9 }
 0x105   :  { %v501_v18 = vadd.f32 %v706_v16, %v452_v14 }
 0x115   :  { %v735_v19 = vpop.f32.mrb[8].mxu0 }
 0x116   :  { %v547_v20 = vadd.f32 %v735_v19, %v498_v17  ;;  %v538_v21 = vpop.f32.mrb[9].mxu0 }
 0x117   :  { %v539_v22 = vadd.f32 %v538_v21, %v490_v1  ;;  %v736_v23 = vpop.f32.mrb[10].mxu0 }
 0x118   :  { %v550_v24 = vadd.f32 %v736_v23, %v501_v18  ;;  %v541_v25 = vpop.f32.mrb[11].mxu0  ;;  %v555_v27 = vmax.f32 %v547_v20, 0.0 }
 0x119   :  { %v542_v26 = vadd.f32 %v541_v25, %v493_v4  ;;  %v553_v29 = vmax.f32 %v539_v22, 0.0 }
 0x11a   :  { %v556_v28 = vmax.f32 %v550_v24, 0.0 }
 0x11b   :  { %v554_v30 = vmax.f32 %v542_v26, 0.0 }
 0x11c   :  { %v648_v31 = vpack.c.bf16 %v556_v28, %v555_v27 }
 0x11d   :  { %v643_v32 = vpack.c.bf16 %v554_v30, %v553_v29 }
 0x11e   :  { %650 = vst [vmem:[%s973_s3 + $0x8] sm:$0xff] %v648_v31  }
 0x11f   :  { %644 = vst [vmem:[%s973_s3] sm:$0xff] %v643_v32  }

// kernel: net_forward.11
= control target key start
LH: loop header
LB: loop body
LE: loop exit
PB: predicated region body
PF: predicated region fallthrough
CT: control target
= control target key end

     0   :  { %s2853_s1 = inlined_call_operand.vmem [shape: bf16[1152,256], index: 1, kind: input, shape index: {}]   ;;  %s2854_s0 = inlined_call_operand.vmem [shape: bf16[16,1152], index: 0, kind: input, shape index: {}]   ;;  %s2855_s3 = inlined_call_operand.vmem [shape: bf16[256,256], index: 3, kind: input, shape index: {}]   ;;  %s2856_s5 = inlined_call_operand.vmem [shape: bf16[256,128], index: 5, kind: input, shape index: {}]   ;;  %s2857_s2 = inlined_call_operand.vmem [shape: f32[1,256], index: 2, kind: input, shape index: {}]   ;;  %s2858_s4 = inlined_call_operand.vmem [shape: f32[1,256], index: 4, kind: input, shape index: {}]   ;;  %s2859_s6 = inlined_call_operand.vmem [shape: f32[1,128], index: 6, kind: input, shape index: {}]   ;;  %s2860_s7 = inlined_call_operand.vmem [shape: f32[16,128], index: 7, kind: output, shape index: {}]  }
   0x1   :  { %v1887_v0 = vld [vmem:[%s2853_s1 + $0x104] ss:$8 sps:$4 sm:$0xff]   ;;  %v1889_v1 = vld [vmem:[%s2853_s1 + $0x100] ss:$8 sps:$4 sm:$0xff]   ;;  %v1890_v2 = vld [vmem:[%s2853_s1 + $0x114] ss:$8 sps:$4 sm:$0xff]  }
   0x2   :  { %1002 = vmatprep.subr.bf16.mxu0 %v1887_v0  ;;  %v1892_v3 = vld [vmem:[%s2853_s1 + $0x110] ss:$8 sps:$4 sm:$0xff]   ;;  %v1893_v4 = vld [vmem:[%s2853_s1 + $0x124] ss:$8 sps:$4 sm:$0xff]   ;;  %v1895_v5 = vld [vmem:[%s2853_s1 + $0x120] ss:$8 sps:$4 sm:$0xff]  }
   0x3   :  { %1003 = vmatpush1.bf16.msra.mxu0 %v1889_v1  ;;  %v1896_v6 = vld [vmem:[%s2853_s1 + $0x134] ss:$8 sps:$4 sm:$0xff]   ;;  %v1898_v7 = vld [vmem:[%s2853_s1 + $0x130] ss:$8 sps:$4 sm:$0xff]   ;;  %v1899_v8 = vld [vmem:[%s2853_s1 + $0x144] ss:$8 sps:$4 sm:$0xff]  }
   0x4   :  { %1004 = vmatprep.subr.bf16.mxu0 %v1890_v2  ;;  %v1901_v9 = vld [vmem:[%s2853_s1 + $0x140] ss:$8 sps:$4 sm:$0xff]   ;;  %v1902_v10 = vld [vmem:[%s2853_s1 + $0x154] ss:$8 sps:$4 sm:$0xff]   ;;  %v1904_v11 = vld [vmem:[%s2853_s1 + $0x150] ss:$8 sps:$4 sm:$0xff]  }
   0x5   :  { %v1905_v12 = vld [vmem:[%s2853_s1 + $0x164] ss:$8 sps:$4 sm:$0xff]   ;;  %v1907_v14 = vld [vmem:[%s2853_s1 + $0x160] ss:$8 sps:$4 sm:$0xff]   ;;  %v1908_v15 = vld [vmem:[%s2853_s1 + $0x174] ss:$8 sps:$4 sm:$0xff]  }
   0x6   :  { %v1937_v13 = vld [vmem:[%s2854_s0 + $0xc] ss:$36 sps:$4 sm:$0xff]   ;;  %v1913_v18 = vld [vmem:[%s2853_s1 + $0x180] ss:$8 sps:$4 sm:$0xff]   ;;  %v1914_v19 = vld [vmem:[%s2853_s1 + $0x194] ss:$8 sps:$4 sm:$0xff]  }
   0x7   :  { %1005 = vmatpush1.bf16.msra.mxu0 %v1892_v3  ;;  %1034 = vmatprep.mubr.bf16.mxu0 %v1937_v13  ;;  %v1910_v16 = vld [vmem:[%s2853_s1 + $0x170] ss:$8 sps:$4 sm:$0xff]   ;;  %v1911_v17 = vld [vmem:[%s2853_s1 + $0x184] ss:$8 sps:$4 sm:$0xff]   ;;  %v1964_v21 = vld [vmem:[%s2853_s1] ss:$8 sps:$4 sm:$0xff]  }
   0x8   :  { %1006 = vmatprep.subr.bf16.mxu0 %v1893_v4  ;;  %v1962_v20 = vld [vmem:[%s2853_s1 + $0x4] ss:$8 sps:$4 sm:$0xff]   ;;  %v1916_v22 = vld [vmem:[%s2853_s1 + $0x190] ss:$8 sps:$4 sm:$0xff]   ;;  %v1968_v24 = vld [vmem:[%s2853_s1 + $0x14] ss:$8 sps:$4 sm:$0xff]  }
   0x9   :  { %v1917_v23 = vld [vmem:[%s2853_s1 + $0x1a4] ss:$8 sps:$4 sm:$0xff]   ;;  %959 = vmatprep.subr.bf16.mxu1 %v1962_v20  ;;  %v1970_v25 = vld [vmem:[%s2853_s1 + $0x10] ss:$8 sps:$4 sm:$0xff]   ;;  %v1919_v26 = vld [vmem:[%s2853_s1 + $0x1a0] ss:$8 sps:$4 sm:$0xff]  }
   0xa   :  { %960 = vmatpush1.bf16.msra.mxu1 %v1964_v21  ;;  %v1974_v27 = vld [vmem:[%s2853_s1 + $0x24] ss:$8 sps:$4 sm:$0xff]   ;;  %v1920_v28 = vld [vmem:[%s2853_s1 + $0x1b4] ss:$8 sps:$4 sm:$0xff]   ;;  %v1976_v29 = vld [vmem:[%s2853_s1 + $0x20] ss:$8 sps:$4 sm:$0xff]  }
   0xb   :  { %1007 = vmatpush1.bf16.msra.mxu0 %v1895_v5  ;;  %961 = vmatprep.subr.bf16.mxu1 %v1968_v24  ;;  %v1980_v30 = vld [vmem:[%s2853_s1 + $0x34] ss:$8 sps:$4 sm:$0xff]   ;;  %v1922_v31 = vld [vmem:[%s2853_s1 + $0x1b0] ss:$8 sps:$4 sm:$0xff]   ;;  %v1923_v32 = vld [vmem:[%s2853_s1 + $0x1c4] ss:$8 sps:$4 sm:$0xff]  }
   0xc   :  { %1008 = vmatprep.subr.bf16.mxu0 %v1896_v6  ;;  %v1982_v33 = vld [vmem:[%s2853_s1 + $0x30] ss:$8 sps:$4 sm:$0xff]   ;;  %v1986_v34 = vld [vmem:[%s2853_s1 + $0x44] ss:$8 sps:$4 sm:$0xff]   ;;  %v1925_v35 = vld [vmem:[%s2853_s1 + $0x1c0] ss:$8 sps:$4 sm:$0xff]  }
   0xd   :  { %v1926_v36 = vld [vmem:[%s2853_s1 + $0x1d4] ss:$8 sps:$4 sm:$0xff]   ;;  %v1988_v37 = vld [vmem:[%s2853_s1 + $0x40] ss:$8 sps:$4 sm:$0xff]   ;;  %v1928_v39 = vld [vmem:[%s2853_s1 + $0x1d0] ss:$8 sps:$4 sm:$0xff]  }
   0xe   :  { %962 = vmatpush1.bf16.msra.mxu1 %v1970_v25  ;;  %v1992_v38 = vld [vmem:[%s2853_s1 + $0x54] ss:$8 sps:$4 sm:$0xff]   ;;  %v1929_v40 = vld [vmem:[%s2853_s1 + $0x1e4] ss:$8 sps:$4 sm:$0xff]   ;;  %v1994_v41 = vld [vmem:[%s2853_s1 + $0x50] ss:$8 sps:$4 sm:$0xff]  }
   0xf   :  { %1009 = vmatpush1.bf16.msra.mxu0 %v1898_v7  ;;  %963 = vmatprep.subr.bf16.mxu1 %v1974_v27  ;;  %v1998_v42 = vld [vmem:[%s2853_s1 + $0x64] ss:$8 sps:$4 sm:$0xff]   ;;  %v1931_v43 = vld [vmem:[%s2853_s1 + $0x1e0] ss:$8 sps:$4 sm:$0xff]   ;;  %v1932_v44 = vld [vmem:[%s2853_s1 + $0x1f4] ss:$8 sps:$4 sm:$0xff]  }
  0x10   :  { %1010 = vmatprep.subr.bf16.mxu0 %v1899_v8  ;;  %v2000_v45 = vld [vmem:[%s2853_s1 + $0x60] ss:$8 sps:$4 sm:$0xff]   ;;  %v2004_v46 = vld [vmem:[%s2853_s1 + $0x74] ss:$8 sps:$4 sm:$0xff]   ;;  %v1934_v47 = vld [vmem:[%s2853_s1 + $0x1f0] ss:$8 sps:$4 sm:$0xff]  }
  0x11   :  { %v1940_v48 = vld [vmem:[%s2853_s1 + $0x204] ss:$8 sps:$4 sm:$0xff]   ;;  %v2006_v49 = vld [vmem:[%s2853_s1 + $0x70] ss:$8 sps:$4 sm:$0xff]   ;;  %v1938_v52 = vld [vmem:[%s2853_s1 + $0x200] ss:$8 sps:$4 sm:$0xff]  }
  0x12   :  { %964 = vmatpush1.bf16.msra.mxu1 %v1976_v29  ;;  %v1935_v50 = vld [vmem:[%s2854_s0 + $0x8] ss:$36 sps:$4 sm:$0xff]   ;;  %v2015_v53 = vld [vmem:[%s2854_s0 + $0x14] ss:$36 sps:$4 sm:$0xff]   ;;  %v2061_v24 = vld [vmem:[%s2854_s0] ss:$36 sps:$4 sm:$0xff]  }
  0x13   :  { %1011 = vmatpush1.bf16.msra.mxu0 %v1901_v9  ;;  %965 = vmatprep.subr.bf16.mxu1 %v1980_v30  ;;  %v2010_v51 = vld [vmem:[%s2853_s1 + $0x84] ss:$8 sps:$4 sm:$0xff]   ;;  %v1943_v54 = vld [vmem:[%s2853_s1 + $0x214] ss:$8 sps:$4 sm:$0xff]   ;;  %v2012_v55 = vld [vmem:[%s2853_s1 + $0x80] ss:$8 sps:$4 sm:$0xff]  }
  0x14   :  { %1012 = vmatprep.subr.bf16.mxu0 %v1902_v10  ;;  %v2019_v56 = vld [vmem:[%s2853_s1 + $0x94] ss:$8 sps:$4 sm:$0xff]   ;;  %v1941_v57 = vld [vmem:[%s2853_s1 + $0x210] ss:$8 sps:$4 sm:$0xff]   ;;  %v1946_v58 = vld [vmem:[%s2853_s1 + $0x224] ss:$8 sps:$4 sm:$0xff]  }
  0x15   :  { %v2021_v59 = vld [vmem:[%s2853_s1 + $0x90] ss:$8 sps:$4 sm:$0xff]   ;;  %v2025_v60 = vld [vmem:[%s2853_s1 + $0xa4] ss:$8 sps:$4 sm:$0xff]   ;;  %v1944_v61 = vld [vmem:[%s2853_s1 + $0x220] ss:$8 sps:$4 sm:$0xff]  }
  0x16   :  { %966 = vmatpush1.bf16.msra.mxu1 %v1982_v33  ;;  %v1949_v62 = vld [vmem:[%s2853_s1 + $0x234] ss:$8 sps:$4 sm:$0xff]   ;;  %v2027_v63 = vld [vmem:[%s2853_s1 + $0xa0] ss:$8 sps:$4 sm:$0xff]   ;;  %v1947_v1 = vld [vmem:[%s2853_s1 + $0x230] ss:$8 sps:$4 sm:$0xff]  }
  0x17   :  { %1013 = vmatpush1.bf16.msra.mxu0 %v1904_v11  ;;  %967 = vmatprep.subr.bf16.mxu1 %v1986_v34  ;;  %v2031_v0 = vld [vmem:[%s2853_s1 + $0xb4] ss:$8 sps:$4 sm:$0xff]   ;;  %v1952_v2 = vld [vmem:[%s2853_s1 + $0x244] ss:$8 sps:$4 sm:$0xff]   ;;  %v2033_v3 = vld [vmem:[%s2853_s1 + $0xb0] ss:$8 sps:$4 sm:$0xff]  }
  0x18   :  { %1014 = vmatprep.subr.bf16.mxu0 %v1905_v12  ;;  %v2037_v4 = vld [vmem:[%s2853_s1 + $0xc4] ss:$8 sps:$4 sm:$0xff]   ;;  %v1950_v6 = vld [vmem:[%s2853_s1 + $0x240] ss:$8 sps:$4 sm:$0xff]   ;;  %v1955_v7 = vld [vmem:[%s2853_s1 + $0x254] ss:$8 sps:$4 sm:$0xff]  }
  0x19   :  { %v2063_v5 = vld [vmem:[%s2854_s0 + $0x4] ss:$36 sps:$4 sm:$0xff]   ;;  %v2043_v9 = vld [vmem:[%s2853_s1 + $0xd4] ss:$8 sps:$4 sm:$0xff]   ;;  %v1953_v10 = vld [vmem:[%s2853_s1 + $0x250] ss:$8 sps:$4 sm:$0xff]  }
  0x1a   :  { %968 = vmatpush1.bf16.msra.mxu1 %v1988_v37  ;;  %991 = vmatprep.mubr.bf16.mxu1 %v2063_v5  ;;  %v2039_v8 = vld [vmem:[%s2853_s1 + $0xc0] ss:$8 sps:$4 sm:$0xff]   ;;  %v1958_v11 = vld [vmem:[%s2853_s1 + $0x264] ss:$8 sps:$4 sm:$0xff]   ;;  %v2045_v12 = vld [vmem:[%s2853_s1 + $0xd0] ss:$8 sps:$4 sm:$0xff]  }
  0x1b   :  { %1015 = vmatpush1.bf16.msra.mxu0 %v1907_v14  ;;  %969 = vmatprep.subr.bf16.mxu1 %v1992_v38  ;;  %v2049_v13 = vld [vmem:[%s2853_s1 + $0xe4] ss:$8 sps:$4 sm:$0xff]   ;;  %v1956_v14 = vld [vmem:[%s2853_s1 + $0x260] ss:$8 sps:$4 sm:$0xff]   ;;  %v2057_v20 = vld [vmem:[%s2853_s1 + $0xf0] ss:$8 sps:$4 sm:$0xff]  }
  0x1c   :  { %1016 = vmatprep.subr.bf16.mxu0 %v1908_v15  ;;  %v1961_v15 = vld [vmem:[%s2853_s1 + $0x274] ss:$8 sps:$4 sm:$0xff]   ;;  %v2066_v21 = vld [vmem:[%s2853_s1 + $0x404] ss:$8 sps:$4 sm:$0xff]   ;;  %v2064_v25 = vld [vmem:[%s2853_s1 + $0x400] ss:$8 sps:$4 sm:$0xff]  }
  0x1d   :  { %v1971_v27 = vld [vmem:[%s2853_s1 + $0x290] ss:$8 sps:$4 sm:$0xff]   ;;  %v2188_v30 = vmov 0   ;;  %v1985_v33 = vld [vmem:[%s2853_s1 + $0x2b4] ss:$8 sps:$4 sm:$0xff]  }
  0x1e   :  { %970 = vmatpush1.bf16.msra.mxu1 %v1994_v41  ;;  %v2070_v29 = vld [vmem:[%s2853_s1 + $0x410] ss:$8 sps:$4 sm:$0xff]   ;;  %v2076_v34 = vld [vmem:[%s2853_s1 + $0x420] ss:$8 sps:$4 sm:$0xff]   ;;  %v1991_v37 = vld [vmem:[%s2853_s1 + $0x2c4] ss:$8 sps:$4 sm:$0xff]  }
  0x1f   :  { %1017 = vmatpush1.bf16.msra.mxu0 %v1910_v16  ;;  %971 = vmatprep.subr.bf16.mxu1 %v1998_v42  ;;  %v2051_v16 = vld [vmem:[%s2853_s1 + $0xe0] ss:$8 sps:$4 sm:$0xff]   ;;  %v2082_v38 = vld [vmem:[%s2853_s1 + $0x430] ss:$8 sps:$4 sm:$0xff]   ;;  %v1997_v41 = vld [vmem:[%s2853_s1 + $0x2d4] ss:$8 sps:$4 sm:$0xff]  }
  0x20   :  { %1018 = vmatprep.subr.bf16.mxu0 %v1911_v17  ;;  %v2055_v17 = vld [vmem:[%s2853_s1 + $0xf4] ss:$8 sps:$4 sm:$0xff]   ;;  %v2088_v42 = vld [vmem:[%s2853_s1 + $0x440] ss:$8 sps:$4 sm:$0xff]  }
  0x21   :  { %v2122_v5 = vld [vmem:[%s2855_s3 + $0x20] ss:$8 sps:$4 sm:$0xff]  }
  0x22   :  { %972 = vmatpush1.bf16.msra.mxu1 %v2000_v45  ;;  %v2003_v45 = vld [vmem:[%s2853_s1 + $0x2e4] ss:$8 sps:$4 sm:$0xff]  }
  0x23   :  { %1019 = vmatpush1.bf16.msra.mxu0 %v1913_v18  ;;  %973 = vmatprep.subr.bf16.mxu1 %v2004_v46  ;;  %v1959_v18 = vld [vmem:[%s2853_s1 + $0x270] ss:$8 sps:$4 sm:$0xff]  }
  0x24   :  { %1020 = vmatprep.subr.bf16.mxu0 %v1914_v19  ;;  %v1967_v19 = vld [vmem:[%s2853_s1 + $0x284] ss:$8 sps:$4 sm:$0xff]   ;;  %v2094_v46 = vld [vmem:[%s2853_s1 + $0x450] ss:$8 sps:$4 sm:$0xff]  }
  0x26   :  { %974 = vmatpush1.bf16.msra.mxu1 %v2006_v49  ;;  %v2009_v49 = vld [vmem:[%s2853_s1 + $0x2f4] ss:$8 sps:$4 sm:$0xff]  }
  0x27   :  { %1021 = vmatpush1.bf16.msra.mxu0 %v1916_v22  ;;  %975 = vmatprep.subr.bf16.mxu1 %v2010_v51  ;;  %v1965_v22 = vld [vmem:[%s2853_s1 + $0x280] ss:$8 sps:$4 sm:$0xff]   ;;  %v2108_v51 = vld [vmem:[%s2853_s1 + $0x474] ss:$8 sps:$4 sm:$0xff]  }
  0x28   :  { %1022 = vmatprep.subr.bf16.mxu0 %v1917_v23  ;;  %v1973_v23 = vld [vmem:[%s2853_s1 + $0x294] ss:$8 sps:$4 sm:$0xff]  }
  0x2a   :  { %976 = vmatpush1.bf16.msra.mxu1 %v2012_v55  ;;  %v2013_v55 = vld [vmem:[%s2854_s0 + $0x10] ss:$36 sps:$4 sm:$0xff]  }
  0x2b   :  { %1023 = vmatpush1.bf16.msra.mxu0 %v1919_v26  ;;  %977 = vmatprep.subr.bf16.mxu1 %v2019_v56  ;;  %v2072_v26 = vld [vmem:[%s2853_s1 + $0x414] ss:$8 sps:$4 sm:$0xff]   ;;  %v2118_v56 = vld [vmem:[%s2855_s3 + $0x4] ss:$8 sps:$4 sm:$0xff]  }
  0x2c   :  { %1024 = vmatprep.subr.bf16.mxu0 %v1920_v28  ;;  %v1979_v28 = vld [vmem:[%s2853_s1 + $0x2a4] ss:$8 sps:$4 sm:$0xff]  }
  0x2e   :  { %978 = vmatpush1.bf16.msra.mxu1 %v2021_v59  ;;  %v2024_v59 = vld [vmem:[%s2853_s1 + $0x314] ss:$8 sps:$4 sm:$0xff]  }
  0x2f   :  { %1025 = vmatpush1.bf16.msra.mxu0 %v1922_v31  ;;  %979 = vmatprep.subr.bf16.mxu1 %v2025_v60  ;;  %v2078_v31 = vld [vmem:[%s2853_s1 + $0x424] ss:$8 sps:$4 sm:$0xff]  }
  0x30   :  { %1026 = vmatprep.subr.bf16.mxu0 %v1923_v32  ;;  %v1977_v32 = vld [vmem:[%s2853_s1 + $0x2a0] ss:$8 sps:$4 sm:$0xff]  }
  0x31   :  { %v2115_v60 = vld [vmem:[%s2854_s0 + $0x20] ss:$36 sps:$4 sm:$0xff]  }
  0x32   :  { %980 = vmatpush1.bf16.msra.mxu1 %v2027_v63  ;;  %v2022_v63 = vld [vmem:[%s2853_s1 + $0x310] ss:$8 sps:$4 sm:$0xff]  }
  0x33   :  { %1027 = vmatpush1.bf16.msra.mxu0 %v1925_v35  ;;  %981 = vmatprep.subr.bf16.mxu1 %v2031_v0  ;;  %v2084_v35 = vld [vmem:[%s2853_s1 + $0x434] ss:$8 sps:$4 sm:$0xff]   ;;  %v2030_v0 = vld [vmem:[%s2853_s1 + $0x324] ss:$8 sps:$4 sm:$0xff]  }
  0x34   :  { %1028 = vmatprep.subr.bf16.mxu0 %v1926_v36  ;;  %v1983_v36 = vld [vmem:[%s2853_s1 + $0x2b0] ss:$8 sps:$4 sm:$0xff]  }
  0x36   :  { %982 = vmatpush1.bf16.msra.mxu1 %v2033_v3  ;;  %v2028_v3 = vld [vmem:[%s2853_s1 + $0x320] ss:$8 sps:$4 sm:$0xff]  }
  0x37   :  { %1029 = vmatpush1.bf16.msra.mxu0 %v1928_v39  ;;  %983 = vmatprep.subr.bf16.mxu1 %v2037_v4  ;;  %v1989_v39 = vld [vmem:[%s2853_s1 + $0x2c0] ss:$8 sps:$4 sm:$0xff]   ;;  %v2036_v4 = vld [vmem:[%s2853_s1 + $0x334] ss:$8 sps:$4 sm:$0xff]  }
  0x38   :  { %1030 = vmatprep.subr.bf16.mxu0 %v1929_v40  ;;  %v2090_v40 = vld [vmem:[%s2853_s1 + $0x444] ss:$8 sps:$4 sm:$0xff]  }
  0x3a   :  { %984 = vmatpush1.bf16.msra.mxu1 %v2039_v8  ;;  %v2042_v8 = vld [vmem:[%s2853_s1 + $0x344] ss:$8 sps:$4 sm:$0xff]  }
  0x3b   :  { %1031 = vmatpush1.bf16.msra.mxu0 %v1931_v43  ;;  %985 = vmatprep.subr.bf16.mxu1 %v2043_v9  ;;  %v2096_v43 = vld [vmem:[%s2853_s1 + $0x454] ss:$8 sps:$4 sm:$0xff]   ;;  %v2125_v9 = vld [vmem:[%s2855_s3 + $0x30] ss:$8 sps:$4 sm:$0xff]  }
  0x3c   :  { %1032 = vmatprep.subr.bf16.mxu0 %v1932_v44  ;;  %v1995_v44 = vld [vmem:[%s2853_s1 + $0x2d0] ss:$8 sps:$4 sm:$0xff]  }
  0x3e   :  { %986 = vmatpush1.bf16.msra.mxu1 %v2045_v12  ;;  %v2048_v12 = vld [vmem:[%s2853_s1 + $0x354] ss:$8 sps:$4 sm:$0xff]  }
  0x3f   :  { %1033 = vmatpush1.bf16.msra.mxu0 %v1934_v47  ;;  %987 = vmatprep.subr.bf16.mxu1 %v2049_v13  ;;  %v2102_v47 = vld [vmem:[%s2853_s1 + $0x464] ss:$8 sps:$4 sm:$0xff]   ;;  %v2128_v13 = vld [vmem:[%s2855_s3 + $0x40] ss:$8 sps:$4 sm:$0xff]  }
  0x40   :  { %1045 = vmatprep.subr.bf16.mxu0 %v1940_v48  ;;  %v2001_v48 = vld [vmem:[%s2853_s1 + $0x2e0] ss:$8 sps:$4 sm:$0xff]  }
  0x42   :  { %1035 = vmatmul.mubr.bf16.vlgmr.msra.gmra.mrb[0].mxu0 %v1935_v50  ;;  %988 = vmatpush1.bf16.msra.mxu1 %v2051_v16  ;;  %v2100_v50 = vld [vmem:[%s2853_s1 + $0x460] ss:$8 sps:$4 sm:$0xff]  }
  0x43   :  { %1046 = vmatpush1.bf16.msra.mxu0 %v1938_v52  ;;  %1077 = vmatprep.mubr.bf16.mxu0 %v2015_v53  ;;  %v2007_v52 = vld [vmem:[%s2853_s1 + $0x2f0] ss:$8 sps:$4 sm:$0xff]   ;;  %v2018_v53 = vld [vmem:[%s2853_s1 + $0x304] ss:$8 sps:$4 sm:$0xff]   ;;  %v2052_v16 = vld [vmem:[%s2853_s1 + $0x360] ss:$8 sps:$4 sm:$0xff]  }
  0x44   :  { %1047 = vmatprep.subr.bf16.mxu0 %v1943_v54  ;;  %989 = vmatprep.subr.bf16.mxu1 %v2055_v17  ;;  %v2106_v54 = vld [vmem:[%s2853_s1 + $0x470] ss:$8 sps:$4 sm:$0xff]   ;;  %v2060_v17 = vld [vmem:[%s2853_s1 + $0x374] ss:$8 sps:$4 sm:$0xff]  }
  0x46   :  { %990 = vmatpush1.bf16.msra.mxu1 %v2057_v20  ;;  %v2067_v20 = vld [vmem:[%s2853_s1 + $0x380] ss:$8 sps:$4 sm:$0xff]  }
  0x47   :  { %1048 = vmatpush1.bf16.msra.mxu0 %v1941_v57  ;;  %1131 = vmatprep.subr.bf16.mxu1 %v2066_v21  ;;  %v2016_v57 = vld [vmem:[%s2853_s1 + $0x300] ss:$8 sps:$4 sm:$0xff]   ;;  %v2075_v21 = vld [vmem:[%s2853_s1 + $0x394] ss:$8 sps:$4 sm:$0xff]  }
  0x48   :  { %1049 = vmatprep.subr.bf16.mxu0 %v1946_v58  ;;  %v2114_v58 = vld [vmem:[%s2854_s0 + $0x1c] ss:$36 sps:$4 sm:$0xff]  }
  0x49   :  { %992 = vmatmul.mubr.bf16.vlgmr.msra.gmra.mrb[0].mxu1 %v2061_v24  ;;  %v2079_v24 = vld [vmem:[%s2853_s1 + $0x3a0] ss:$8 sps:$4 sm:$0xff]  }
  0x4a   :  { %1132 = vmatpush1.bf16.msra.mxu1 %v2064_v25  ;;  %1163 = vmatprep.mubr.bf16.mxu1 %v2188_v30  ;;  %v2087_v25 = vld [vmem:[%s2853_s1 + $0x3b4] ss:$8 sps:$4 sm:$0xff]   ;;  %v2097_v30 = vld [vmem:[%s2853_s1 + $0x3d0] ss:$8 sps:$4 sm:$0xff]  }
  0x4b   :  { %1050 = vmatpush1.bf16.msra.mxu0 %v1944_v61  ;;  %1133 = vmatprep.subr.bf16.mxu1 %v2072_v26  ;;  %v2116_v61 = vld [vmem:[%s2855_s3] ss:$8 sps:$4 sm:$0xff]   ;;  %v2085_v26 = vld [vmem:[%s2853_s1 + $0x3b0] ss:$8 sps:$4 sm:$0xff]  }
  0x4c   :  { %1051 = vmatprep.subr.bf16.mxu0 %v1949_v62  ;;  %v2121_v62 = vld [vmem:[%s2855_s3 + $0x14] ss:$8 sps:$4 sm:$0xff]  }
  0x4e   :  { %1134 = vmatpush1.bf16.msra.mxu1 %v2070_v29  ;;  %v2099_v29 = vld [vmem:[%s2853_s1 + $0x3d4] ss:$8 sps:$4 sm:$0xff]  }
  0x4f   :  { %1052 = vmatpush1.bf16.msra.mxu0 %v1947_v1  ;;  %1135 = vmatprep.subr.bf16.mxu1 %v2078_v31  ;;  %v2119_v1 = vld [vmem:[%s2855_s3 + $0x10] ss:$8 sps:$4 sm:$0xff]   ;;  %v2105_v31 = vld [vmem:[%s2853_s1 + $0x3e4] ss:$8 sps:$4 sm:$0xff]  }
  0x50   :  { %1053 = vmatprep.subr.bf16.mxu0 %v1952_v2  ;;  %v2124_v2 = vld [vmem:[%s2855_s3 + $0x24] ss:$8 sps:$4 sm:$0xff]  }
  0x52   :  { %1136 = vmatpush1.bf16.msra.mxu1 %v2076_v34  ;;  %v2131_v34 = vld [vmem:[%s2855_s3 + $0x50] ss:$8 sps:$4 sm:$0xff]  }
  0x53   :  { %1054 = vmatpush1.bf16.msra.mxu0 %v1950_v6  ;;  %1137 = vmatprep.subr.bf16.mxu1 %v2084_v35  ;;  %v2127_v6 = vld [vmem:[%s2855_s3 + $0x34] ss:$8 sps:$4 sm:$0xff]  }
  0x54   :  { %1055 = vmatprep.subr.bf16.mxu0 %v1955_v7  ;;  %v2034_v7 = vld [vmem:[%s2853_s1 + $0x330] ss:$8 sps:$4 sm:$0xff]   ;;  %v2133_v35 = vld [vmem:[%s2855_s3 + $0x54] ss:$8 sps:$4 sm:$0xff]  }
  0x56   :  { %1138 = vmatpush1.bf16.msra.mxu1 %v2082_v38  ;;  %v2134_v38 = vld [vmem:[%s2855_s3 + $0x60] ss:$8 sps:$4 sm:$0xff]  }
  0x57   :  { %1056 = vmatpush1.bf16.msra.mxu0 %v1953_v10  ;;  %1139 = vmatprep.subr.bf16.mxu1 %v2090_v40  ;;  %v2130_v10 = vld [vmem:[%s2855_s3 + $0x44] ss:$8 sps:$4 sm:$0xff]   ;;  %v2112_v40 = vld [vmem:[%s2854_s0 + $0x18] ss:$36 sps:$4 sm:$0xff]  }
  0x58   :  { %1057 = vmatprep.subr.bf16.mxu0 %v1958_v11  ;;  %v2040_v11 = vld [vmem:[%s2853_s1 + $0x340] ss:$8 sps:$4 sm:$0xff]  }
  0x5a   :  { %1140 = vmatpush1.bf16.msra.mxu1 %v2088_v42  ;;  %v2142_v42 = vld [vmem:[%s2855_s3 + $0x84] ss:$8 sps:$4 sm:$0xff]  }
  0x5b   :  { %1058 = vmatpush1.bf16.msra.mxu0 %v1956_v14  ;;  %1141 = vmatprep.subr.bf16.mxu1 %v2096_v43  ;;  %v2046_v14 = vld [vmem:[%s2853_s1 + $0x350] ss:$8 sps:$4 sm:$0xff]   ;;  %v2140_v43 = vld [vmem:[%s2855_s3 + $0x80] ss:$8 sps:$4 sm:$0xff]  }
  0x5c   :  { %1059 = vmatprep.subr.bf16.mxu0 %v1961_v15  ;;  %v2054_v15 = vld [vmem:[%s2853_s1 + $0x364] ss:$8 sps:$4 sm:$0xff]  }
  0x5e   :  { %1142 = vmatpush1.bf16.msra.mxu1 %v2094_v46  ;;  %v2148_v46 = vld [vmem:[%s2855_s3 + $0xa4] ss:$8 sps:$4 sm:$0xff]  }
  0x5f   :  { %1060 = vmatpush1.bf16.msra.mxu0 %v1959_v18  ;;  %1143 = vmatprep.subr.bf16.mxu1 %v2102_v47  ;;  %v2058_v18 = vld [vmem:[%s2853_s1 + $0x370] ss:$8 sps:$4 sm:$0xff]   ;;  %v2146_v47 = vld [vmem:[%s2855_s3 + $0xa0] ss:$8 sps:$4 sm:$0xff]  }
  0x60   :  { %1061 = vmatprep.subr.bf16.mxu0 %v1967_v19  ;;  %v2069_v19 = vld [vmem:[%s2853_s1 + $0x384] ss:$8 sps:$4 sm:$0xff]  }
  0x62   :  { %1144 = vmatpush1.bf16.msra.mxu1 %v2100_v50  ;;  %v2154_v50 = vld [vmem:[%s2855_s3 + $0xc4] ss:$8 sps:$4 sm:$0xff]  }
  0x63   :  { %1062 = vmatpush1.bf16.msra.mxu0 %v1965_v22  ;;  %1145 = vmatprep.subr.bf16.mxu1 %v2108_v51  ;;  %v2073_v22 = vld [vmem:[%s2853_s1 + $0x390] ss:$8 sps:$4 sm:$0xff]   ;;  %v2152_v51 = vld [vmem:[%s2855_s3 + $0xc0] ss:$8 sps:$4 sm:$0xff]  }
  0x64   :  { %1063 = vmatprep.subr.bf16.mxu0 %v1973_v23  ;;  %v2081_v23 = vld [vmem:[%s2853_s1 + $0x3a4] ss:$8 sps:$4 sm:$0xff]  }
  0x66   :  { %1146 = vmatpush1.bf16.msra.mxu1 %v2106_v54  ;;  %v2160_v54 = vld [vmem:[%s2855_s3 + $0xe4] ss:$8 sps:$4 sm:$0xff]  }
  0x67   :  { %1064 = vmatpush1.bf16.msra.mxu0 %v1971_v27  ;;  %1384 = vmatprep.subr.bf16.mxu1 %v2118_v56  ;;  %v2093_v27 = vld [vmem:[%s2853_s1 + $0x3c4] ss:$8 sps:$4 sm:$0xff]   ;;  %v2163_v56 = vld [vmem:[%s2855_s3 + $0xf4] ss:$8 sps:$4 sm:$0xff]  }
  0x68   :  { %1065 = vmatprep.subr.bf16.mxu0 %v1979_v28  ;;  %v2091_v28 = vld [vmem:[%s2853_s1 + $0x3c0] ss:$8 sps:$4 sm:$0xff]  }
  0x69   :  { %1164 = vmatmul.mubr.bf16.vlgmr.msra.gmra.mrb[4].mxu1 %v2115_v60 }
  0x6a   :  { %1385 = vmatpush1.bf16.msra.mxu1 %v2116_v61 }
  0x6b   :  { %1066 = vmatpush1.bf16.msra.mxu0 %v1977_v32  ;;  %1386 = vmatprep.subr.bf16.mxu1 %v2121_v62  ;;  %v2103_v32 = vld [vmem:[%s2853_s1 + $0x3e0] ss:$8 sps:$4 sm:$0xff]  }
  0x6c   :  { %1067 = vmatprep.subr.bf16.mxu0 %v1985_v33  ;;  %v2111_v33 = vld [vmem:[%s2853_s1 + $0x3f4] ss:$8 sps:$4 sm:$0xff]  }
  0x6e   :  { %1387 = vmatpush1.bf16.msra.mxu1 %v2119_v1 }
  0x6f   :  { %1068 = vmatpush1.bf16.msra.mxu0 %v1983_v36  ;;  %1388 = vmatprep.subr.bf16.mxu1 %v2124_v2  ;;  %v2109_v36 = vld [vmem:[%s2853_s1 + $0x3f0] ss:$8 sps:$4 sm:$0xff]  }
  0x70   :  { %1069 = vmatprep.subr.bf16.mxu0 %v1991_v37  ;;  %v2136_v37 = vld [vmem:[%s2855_s3 + $0x64] ss:$8 sps:$4 sm:$0xff]  }
  0x72   :  { %1389 = vmatpush1.bf16.msra.mxu1 %v2122_v5 }
  0x73   :  { %1070 = vmatpush1.bf16.msra.mxu0 %v1989_v39  ;;  %1390 = vmatprep.subr.bf16.mxu1 %v2127_v6  ;;  %v2139_v39 = vld [vmem:[%s2855_s3 + $0x74] ss:$8 sps:$4 sm:$0xff]   ;;  %v181_v6 = vld [vmem:[%s2857_s2] sm:$0x3] }
  0x74   :  { %1071 = vmatprep.subr.bf16.mxu0 %v1997_v41  ;;  %v2137_v41 = vld [vmem:[%s2855_s3 + $0x70] ss:$8 sps:$4 sm:$0xff]  }
  0x76   :  { %1391 = vmatpush1.bf16.msra.mxu1 %v2125_v9 }
  0x77   :  { %1072 = vmatpush1.bf16.msra.mxu0 %v1995_v44  ;;  %1392 = vmatprep.subr.bf16.mxu1 %v2130_v10  ;;  %v2145_v44 = vld [vmem:[%s2855_s3 + $0x94] ss:$8 sps:$4 sm:$0xff]  }
  0x78   :  { %1073 = vmatprep.subr.bf16.mxu0 %v2003_v45  ;;  %v2143_v45 = vld [vmem:[%s2855_s3 + $0x90] ss:$8 sps:$4 sm:$0xff]  }
  0x7a   :  { %1393 = vmatpush1.bf16.msra.mxu1 %v2128_v13 }
  0x7b   :  { %1074 = vmatpush1.bf16.msra.mxu0 %v2001_v48  ;;  %1394 = vmatprep.subr.bf16.mxu1 %v2133_v35  ;;  %v2151_v48 = vld [vmem:[%s2855_s3 + $0xb4] ss:$8 sps:$4 sm:$0xff]  }
  0x7c   :  { %1075 = vmatprep.subr.bf16.mxu0 %v2009_v49  ;;  %v2149_v49 = vld [vmem:[%s2855_s3 + $0xb0] ss:$8 sps:$4 sm:$0xff]  }
  0x7d   :  { %v2168_v35 = vld [vmem:[%s2856_s5 + $0x50] sm:$0xff]  }
  0x7e   :  { %1395 = vmatpush1.bf16.msra.mxu1 %v2131_v34  ;;  %v2167_v34 = vld [vmem:[%s2856_s5 + $0x8] sm:$0xff]  }
  0x7f   :  { %1076 = vmatpush1.bf16.msra.mxu0 %v2007_v52  ;;  %1396 = vmatprep.subr.bf16.mxu1 %v2136_v37  ;;  %v2157_v52 = vld [vmem:[%s2855_s3 + $0xd4] ss:$8 sps:$4 sm:$0xff]  }
  0x80   :  { %1088 = vmatprep.subr.bf16.mxu0 %v2018_v53  ;;  %v2155_v53 = vld [vmem:[%s2855_s3 + $0xd0] ss:$8 sps:$4 sm:$0xff]  }
  0x81   :  { %v2170_v37 = vld [vmem:[%s2856_s5 + $0x58] sm:$0xff]  }
  0x82   :  { %1078 = vmatmul.mubr.bf16.vlgmr.msra.gmra.mrb[0].mxu0 %v2013_v55  ;;  %1397 = vmatpush1.bf16.msra.mxu1 %v2134_v38  ;;  %v2158_v55 = vld [vmem:[%s2855_s3 + $0xe0] ss:$8 sps:$4 sm:$0xff]   ;;  %v2171_v38 = vld [vmem:[%s2856_s5 + $0x18] sm:$0xff]  }
  0x83   :  { %1089 = vmatpush1.bf16.msra.mxu0 %v2016_v57  ;;  %1120 = vmatprep.mubr.bf16.mxu0 %v2114_v58  ;;  %v2161_v57 = vld [vmem:[%s2855_s3 + $0xf0] ss:$8 sps:$4 sm:$0xff]   ;;  %v2164_v58 = vld [vmem:[%s2856_s5 + $0x40] sm:$0xff]  }
  0x84   :  { %1090 = vmatprep.subr.bf16.mxu0 %v2024_v59  ;;  %1398 = vmatprep.subr.bf16.mxu1 %v2139_v39  ;;  %v2172_v39 = vld [vmem:[%s2856_s5 + $0x60] sm:$0xff]  }
  0x86   :  { %1399 = vmatpush1.bf16.msra.mxu1 %v2137_v41  ;;  %v2174_v41 = vld [vmem:[%s2856_s5 + $0x68] sm:$0xff]  }
  0x87   :  { %1091 = vmatpush1.bf16.msra.mxu0 %v2022_v63  ;;  %1400 = vmatprep.subr.bf16.mxu1 %v2142_v42  ;;  %v2175_v42 = vld [vmem:[%s2856_s5 + $0x28] sm:$0xff]  }
  0x88   :  { %1092 = vmatprep.subr.bf16.mxu0 %v2030_v0 }
  0x8a   :  { %1401 = vmatpush1.bf16.msra.mxu1 %v2140_v43  ;;  %v2176_v43 = vld [vmem:[%s2856_s5 + $0x70] sm:$0xff]  }
  0x8b   :  { %1093 = vmatpush1.bf16.msra.mxu0 %v2028_v3  ;;  %1402 = vmatprep.subr.bf16.mxu1 %v2145_v44  ;;  %v183_v3 = vlaneseq  ;;  %v2177_v44 = vld [vmem:[%s2856_s5 + $0x30] sm:$0xff]  }
  0x8c   :  { %1094 = vmatprep.subr.bf16.mxu0 %v2036_v4 }
  0x8d   :  { %v2788_v4 = vshrl.u32 %v183_v3, 7 }
  0x8e   :  { %1403 = vmatpush1.bf16.msra.mxu1 %v2143_v45  ;;  %v2178_v45 = vld [vmem:[%s2856_s5 + $0x78] sm:$0xff]  }
  0x8f   :  { %1095 = vmatpush1.bf16.msra.mxu0 %v2034_v7  ;;  %1404 = vmatprep.subr.bf16.mxu1 %v2148_v46  ;;  %v185_v5 = vsub.s32 0, %v2788_v4  ;;  %v189_v7 = vsub.s32 1, %v2788_v4  ;;  %v2179_v46 = vld [vmem:[%s2856_s5 + $0x38] sm:$0xff]  }
  0x90   :  { %1096 = vmatprep.subr.bf16.mxu0 %v2042_v8 }
  0x91   :  { %v186_v8 = vrot.slane %v181_v6, %v185_v5  ;;  %v190_v9 = vrot.slane %v181_v6, %v189_v7 }
  0x92   :  { %1405 = vmatpush1.bf16.msra.mxu1 %v2146_v47  ;;  %v1212_v47 = vld [vmem:[%s2858_s4] sm:$0x3] }
  0x93   :  { %1097 = vmatpush1.bf16.msra.mxu0 %v2040_v11  ;;  %1406 = vmatprep.subr.bf16.mxu1 %v2151_v48  ;;  %v1217_v48 = vrot.slane %v1212_v47, %v185_v5 }
  0x94   :  { %1098 = vmatprep.subr.bf16.mxu0 %v2048_v12 }
  0x96   :  { %1407 = vmatpush1.bf16.msra.mxu1 %v2149_v49  ;;  %v1221_v49 = vrot.slane %v1212_v47, %v189_v7 }
  0x97   :  { %1099 = vmatpush1.bf16.msra.mxu0 %v2046_v14  ;;  %1408 = vmatprep.subr.bf16.mxu1 %v2154_v50 }
  0x98   :  { %1100 = vmatprep.subr.bf16.mxu0 %v2054_v15 }
  0x9a   :  { %1409 = vmatpush1.bf16.msra.mxu1 %v2152_v51 }
  0x9b   :  { %1101 = vmatpush1.bf16.msra.mxu0 %v2052_v16  ;;  %1410 = vmatprep.subr.bf16.mxu1 %v2157_v52 }
  0x9c   :  { %1102 = vmatprep.subr.bf16.mxu0 %v2060_v17 }
  0x9e   :  { %1411 = vmatpush1.bf16.msra.mxu1 %v2155_v53 }
  0x9f   :  { %1103 = vmatpush1.bf16.msra.mxu0 %v2058_v18  ;;  %1412 = vmatprep.subr.bf16.mxu1 %v2160_v54 }
  0xa0   :  { %1104 = vmatprep.subr.bf16.mxu0 %v2069_v19 }
  0xa2   :  { %1413 = vmatpush1.bf16.msra.mxu1 %v2158_v55 }
  0xa3   :  { %1105 = vmatpush1.bf16.msra.mxu0 %v2067_v20  ;;  %1414 = vmatprep.subr.bf16.mxu1 %v2163_v56 }
  0xa4   :  { %1106 = vmatprep.subr.bf16.mxu0 %v2075_v21 }
  0xa6   :  { %1415 = vmatpush1.bf16.msra.mxu1 %v2161_v57 }
  0xa7   :  { %1107 = vmatpush1.bf16.msra.mxu0 %v2073_v22  ;;  %1844 = vmatprep.subr.bf16.mxu1 %v2164_v58 }
  0xa8   :  { %1108 = vmatprep.subr.bf16.mxu0 %v2081_v23 }
  0xab   :  { %1109 = vmatpush1.bf16.msra.mxu0 %v2079_v24 }
  0xac   :  { %1110 = vmatprep.subr.bf16.mxu0 %v2087_v25 }
  0xaf   :  { %1111 = vmatpush1.bf16.msra.mxu0 %v2085_v26 }
  0xb0   :  { %1112 = vmatprep.subr.bf16.mxu0 %v2093_v27 }
  0xb3   :  { %1113 = vmatpush1.bf16.msra.mxu0 %v2091_v28 }
  0xb4   :  { %1114 = vmatprep.subr.bf16.mxu0 %v2099_v29 }
  0xb7   :  { %1115 = vmatpush1.bf16.msra.mxu0 %v2097_v30 }
  0xb8   :  { %1116 = vmatprep.subr.bf16.mxu0 %v2105_v31 }
  0xbb   :  { %1117 = vmatpush1.bf16.msra.mxu0 %v2103_v32  ;;  %v2165_v32 = vld [vmem:[%s2856_s5] sm:$0xff]  }
  0xbc   :  { %1118 = vmatprep.subr.bf16.mxu0 %v2111_v33  ;;  %v2166_v33 = vld [vmem:[%s2856_s5 + $0x48] sm:$0xff]  }
  0xbf   :  { %1119 = vmatpush1.bf16.msra.mxu0 %v2109_v36  ;;  %v2169_v36 = vld [vmem:[%s2856_s5 + $0x10] sm:$0xff]  }
  0xc2   :  { %1121 = vmatmul.mubr.bf16.vlgmr.msra.gmra.mrb[0].mxu0 %v2112_v40  ;;  %v2173_v40 = vld [vmem:[%s2856_s5 + $0x20] sm:$0xff]  }
 0x11c   :  { %v993_v59 = vpop.f32.mrb[0].mxu1 }
 0x11d   :  { %v995_v60 = vpop.f32.mrb[1].mxu1  ;;  %v994_v10 = vadd.f32 %v993_v59, %v186_v8 }
 0x11e   :  { %v997_v61 = vpop.f32.mrb[2].mxu1  ;;  %v996_v11 = vadd.f32 %v995_v60, %v190_v9 }
 0x11f   :  { %v999_v62 = vpop.f32.mrb[3].mxu1  ;;  %v998_v13 = vadd.f32 %v997_v61, %v186_v8 }
 0x120   :  { %v1000_v16 = vadd.f32 %v999_v62, %v190_v9 }
 0x13c   :  { %v1165_v63 = vpop.f32.mrb[4].mxu1 }
 0x13d   :  { %v1167_v0 = vpop.f32.mrb[5].mxu1 }
 0x13e   :  { %v1169_v1 = vpop.f32.mrb[6].mxu1 }
 0x13f   :  { %v1171_v2 = vpop.f32.mrb[7].mxu1 }
 0x195   :  { %v1122_v12 = vpop.f32.mrb[0].mxu0 }
 0x196   :  { %v1867_v14 = vadd.f32 %v1122_v12, %v994_v10  ;;  %v1124_v15 = vpop.f32.mrb[1].mxu0 }
 0x197   :  { %v1870_v17 = vadd.f32 %v1124_v15, %v996_v11  ;;  %v1126_v18 = vpop.f32.mrb[2].mxu0 }
 0x198   :  { %v1868_v19 = vadd.f32 %v1867_v14, %v1165_v63  ;;  %v1873_v20 = vadd.f32 %v1126_v18, %v998_v13  ;;  %v1128_v21 = vpop.f32.mrb[3].mxu0 }
 0x199   :  { %v1871_v22 = vadd.f32 %v1870_v17, %v1167_v0  ;;  %v1876_v23 = vadd.f32 %v1128_v21, %v1000_v16 }
 0x19a   :  { %v1874_v24 = vadd.f32 %v1873_v20, %v1169_v1  ;;  %v1174_v26 = vmax.f32 %v1868_v19, 0.0  ;;  %v1827_v1 = vld [vmem:[%s2859_s6] ss:$0 sm:$0xff]  ;;  %v1630_v20 = vand.u32 127, %v183_v3 }
 0x19b   :  { %v1877_v25 = vadd.f32 %v1876_v23, %v1171_v2  ;;  %v1175_v28 = vmax.f32 %v1871_v22, 0.0 }
 0x19c   :  { %v1176_v27 = vmax.f32 %v1874_v24, 0.0  ;;  %vm1631_vm0 = vcmp.ge.s32.totalorder %v1630_v20, 1  ;;  %vm1632_vm1 = vcmp.le.s32.totalorder %v1630_v20, 6 }
 0x19d   :  { %v1177_v29 = vmax.f32 %v1877_v25, 0.0  ;;  %vm1633_vm2 = vmand %vm1631_vm0, %vm1632_vm1 }
 0x19e   :  { %v1178_v30 = vpack.c.bf16 %v1176_v27, %v1174_v26 }
 0x19f   :  { %v1179_v31 = vpack.c.bf16 %v1177_v29, %v1175_v28 }
 0x1a1   :  { %1416 = vmatprep.mubr.bf16.mxu1 %v1179_v31 }
 0x1a2   :  { %1417 = vmatmul.mubr.bf16.vlgmr.msra.gmra.mrb[8].mxu1 %v1178_v30 }
 0x1a3   :  { %1845 = vmatpush3.bf16.msra.mxu1 %v2165_v32 }
 0x1a4   :  { %1846 = vmatprep.subr.bf16.mxu1 %v2166_v33 }
 0x1a7   :  { %1847 = vmatpush3.bf16.msra.mxu1 %v2167_v34 }
 0x1a8   :  { %1848 = vmatprep.subr.bf16.mxu1 %v2168_v35 }
 0x1ab   :  { %1849 = vmatpush3.bf16.msra.mxu1 %v2169_v36 }
 0x1ac   :  { %1850 = vmatprep.subr.bf16.mxu1 %v2170_v37 }
 0x1af   :  { %1851 = vmatpush3.bf16.msra.mxu1 %v2171_v38 }
 0x1b0   :  { %1852 = vmatprep.subr.bf16.mxu1 %v2172_v39 }
 0x1b3   :  { %1853 = vmatpush3.bf16.msra.mxu1 %v2173_v40 }
 0x1b4   :  { %1854 = vmatprep.subr.bf16.mxu1 %v2174_v41 }
 0x1b7   :  { %1855 = vmatpush3.bf16.msra.mxu1 %v2175_v42 }
 0x1b8   :  { %1856 = vmatprep.subr.bf16.mxu1 %v2176_v43 }
 0x1bb   :  { %1857 = vmatpush3.bf16.msra.mxu1 %v2177_v44 }
 0x1bc   :  { %1858 = vmatprep.subr.bf16.mxu1 %v2178_v45 }
 0x1bf   :  { %1859 = vmatpush3.bf16.msra.mxu1 %v2179_v46 }
 0x275   :  { %v1418_v50 = vpop.f32.mrb[8].mxu1 }
 0x276   :  { %v1419_v51 = vadd.f32 %v1418_v50, %v1217_v48  ;;  %v1420_v52 = vpop.f32.mrb[9].mxu1 }
 0x277   :  { %v1421_v53 = vadd.f32 %v1420_v52, %v1221_v49  ;;  %v1422_v54 = vpop.f32.mrb[10].mxu1 }
 0x278   :  { %v1423_v55 = vadd.f32 %v1422_v54, %v1217_v48  ;;  %v1424_v56 = vpop.f32.mrb[11].mxu1  ;;  %v1427_v58 = vmax.f32 %v1419_v51, 0.0 }
 0x279   :  { %v1425_v57 = vadd.f32 %v1424_v56, %v1221_v49  ;;  %v1428_v60 = vmax.f32 %v1421_v53, 0.0 }
 0x27a   :  { %v1429_v59 = vmax.f32 %v1423_v55, 0.0 }
 0x27b   :  { %v1430_v61 = vmax.f32 %v1425_v57, 0.0 }
 0x27c   :  { %v1431_v62 = vpack.c.bf16 %v1429_v59, %v1427_v58 }
 0x27d   :  { %v1432_v63 = vpack.c.bf16 %v1430_v61, %v1428_v60 }
 0x27f   :  { %1600 = vmatprep.mubr.bf16.mxu1 %v1432_v63 }
 0x280   :  { %1601 = vmatmul.mubr.bf16.vlgmr.msra.gmra.mrb[12].mxu1 %v1431_v62 }
 0x353   :  { %v1860_v0 = vpop.f32.mrb[12].mxu1 }
 0x354   :  { %v1861_v2 = vpop.f32.mrb[13].mxu1 }
 0x355   :  { %v1862_v4 = vadd.f32 %v1861_v2, %v1860_v0  ;;  %v1863_v5 = vpop.f32.mrb[14].mxu1 }
 0x356   :  { %v1864_v6 = vpop.f32.mrb[15].mxu1 }
 0x357   :  { %v1603_v7 = vadd.f32 %v1862_v4, %v1827_v1  ;;  %v1865_v8 = vadd.f32 %v1864_v6, %v1863_v5 }
 0x359   :  { %v1611_v9 = vand.u32 2147483647, %v1603_v7  ;;  %v1606_v10 = vadd.f32 %v1865_v8, %v1827_v1  ;;  %v1609_v22 = vmax.f32 %v1603_v7, 0.0 }
 0x35b   :  { %v1613_v11 = vsub.f32 0.0, %v1611_v9  ;;  %v1612_v12 = vand.u32 2147483647, %v1606_v10  ;;  %v1610_v26 = vmax.f32 %v1606_v10, 0.0 }
 0x35d   :  { %v1615_v13 = vmul.f32 1.442695, %v1613_v11  ;;  %v1614_v14 = vsub.f32 0.0, %v1612_v12 }
 0x35f   :  { %2180 = vpow2.f32 %v1615_v13  ;;  %v1617_v15 = vmul.f32 1.442695, %v1614_v14 }
 0x361   :  { %2182 = vpow2.f32 %v1617_v15 }
 0x369   :  { %v2181_v16 = vpop.eup %2180 }
 0x36a   :  { %v1619_v17 = vadd.f32 1.0, %v2181_v16 }
 0x36b   :  { %v2183_v18 = vpop.eup %2182 }
 0x36c   :  { %2184 = vlog2.f32 %v1619_v17  ;;  %v1620_v19 = vadd.f32 1.0, %v2183_v18 }
 0x36e   :  { %2186 = vlog2.f32 %v1620_v19 }
 0x376   :  { %v2185_v21 = vpop.eup %2184 }
 0x377   :  { %v1622_v23 = vmul.f32 0.6931472, %v2185_v21 }
 0x378   :  { %v2187_v24 = vpop.eup %2186 }
 0x379   :  { %v1625_v25 = vadd.f32 %v1622_v23, %v1609_v22  ;;  %v1624_v27 = vmul.f32 0.6931472, %v2187_v24 }
 0x37b   :  { %v1627_v28 = vadd.f32 1.0, %v1625_v25  ;;  %v1626_v29 = vadd.f32 %v1624_v27, %v1610_v26 }
 0x37d   :  { %v1634_v30 = vsel %vm1633_vm2, %v1627_v28, %v1603_v7  ;;  %v1628_v31 = vadd.f32 1.0, %v1626_v29 }
 0x37e   :  { %1636 = vst [vmem:[%s2860_s7] sm:$0xff] %v1634_v30 }
 0x37f   :  { %v1635_v32 = vsel %vm1633_vm2, %v1628_v31, %v1606_v10 }
 0x380   :  { %1637 = vst [vmem:[%s2860_s7 + $0x8] sm:$0xff] %v1635_v32 }

</bundles_post_ra>
